<compile_context>
chip_gen: v7x
topology: tpu7x:2x2x1
jax: 0.10.0
libtpu: 0.0.40
codegen_flags: <defaults>
</compile_context>

<pallas_src>
import functools

import numpy as np
import jax
import jax.numpy as jnp
from jax.experimental import pallas as pl
from jax.experimental.pallas import tpu as pltpu


def _round_up(x, m):
    return (x + m - 1) // m * m


# ---------------------------------------------------------------------------
# Fused forward kernel: 5 matmuls + bias (+ ReLU), everything resident in VMEM.
# ---------------------------------------------------------------------------
def _fused_forward_kernel(x_ref,
                          w1_ref, b1_ref, w2_ref, b2_ref, w3_ref, b3_ref,
                          w4_ref, b4_ref, w5_ref, b5_ref,
                          o_ref, *, bf16_epilogue):
    def hidden_layer(h, w_ref, b_ref):
        y = jnp.dot(h, w_ref[...], preferred_element_type=jnp.float32)
        if bf16_epilogue:
            # v6e/v7x: native bf16 VALU -> half the VPU traffic on wide intermediates.
            y = y.astype(jnp.bfloat16) + b_ref[...].astype(jnp.bfloat16)
            return jnp.maximum(y, 0.0)
        # v5e (no bf16 VALU): f32 bias/ReLU epilogue, then cast for the next MXU op.
        y = y + b_ref[...]
        return jnp.maximum(y, 0.0).astype(jnp.bfloat16)

    # Input tile arrives as f32; cast to bf16 in-kernel (saves an XLA cast pass
    # and an extra HBM round trip of the input).
    h = x_ref[...].astype(jnp.bfloat16)
    h = hidden_layer(h, w1_ref, b1_ref)          # conv1 (folded) + ReLU
    h = hidden_layer(h, w2_ref, b2_ref)          # conv2 (folded) + ReLU
    h = hidden_layer(h, w3_ref, b3_ref)          # conv3 (folded) + ReLU == Flatten
    h = hidden_layer(h, w4_ref, b4_ref)          # [pi_fc1 | v_fc1] + ReLU
    # Final head layer: narrow (128-lane) output, keep f32 epilogue for precision.
    y = jnp.dot(h, w5_ref[...], preferred_element_type=jnp.float32)
    o_ref[...] = (y + b5_ref[...]).astype(o_ref.dtype)   # [logits | value | 0pad]


_WEIGHT_KEYS = ("w1", "b1", "w2", "b2", "w3", "b3", "w4", "b4", "w5", "b5")


def _use_bf16_epilogue():
    """bf16 bias/ReLU epilogue only on chips with bf16 VALU (v6e / v7x)."""
    try:
        kind = jax.devices()[0].device_kind.lower()
    except Exception:
        return False
    return any(t in kind for t in ("v6", "6e", "v7", "7x"))


def ppo_forward(params, x, *, n_actions):
    """x: (B, C, H, W) NCHW float32 -> (logits (B, n_actions), value (B, 1))."""
    B = x.shape[0]
    x_flat = x.reshape(B, -1)                    # f32; cast to bf16 inside the kernel
    K0 = x_flat.shape[1]

    # M tiling:
    #  * B >= 512 : 256-row tiles (amortize per-step overhead + MXU weight pushes)
    #  * 256..511 : 128-row tiles
    #  * 32..255  : >= 2 tiles so the "parallel" axis feeds both v7x TensorCores
    #  * tiny B   : one sublane-aligned tile
    if B >= 512:
        TILE_M = 256
    elif B >= 256:
        TILE_M = 128
    elif B >= 32:
        TILE_M = _round_up(-(-B // 2), 16)
    else:
        TILE_M = _round_up(B, 8)
    M_pad = _round_up(B, TILE_M)
    if M_pad != B:
        x_flat = jnp.pad(x_flat, ((0, M_pad - B), (0, 0)))

    NP = params["w5"].shape[1]                   # lane-dense padded head width (>=128)

    x_spec = pl.BlockSpec((TILE_M, K0), lambda i: (i, 0))
    # Resident weights/biases: constant index_map, never re-fetched across grid
    # steps -> single-buffered (saves ~5 MB of VMEM vs. default double buffering).
    w_specs = [
        pl.BlockSpec(params[k].shape, lambda i: (0, 0), pipeline_mode=pl.Buffered(1))
        for k in _WEIGHT_KEYS
    ]

    n1 = params["w1"].shape[1]
    n2 = params["w2"].shape[1]
    n3 = params["w3"].shape[1]
    n4 = params["w4"].shape[1]
    flops = 2 * M_pad * (K0 * n1 + n1 * n2 + n2 * n3 + n3 * n4 + n4 * NP)
    weight_bytes = sum(int(params[k].size) * params[k].dtype.itemsize
                       for k in _WEIGHT_KEYS)
    bytes_accessed = weight_bytes + M_pad * K0 * 4 + M_pad * NP * 4

    kernel = functools.partial(_fused_forward_kernel,
                               bf16_epilogue=_use_bf16_epilogue())

    out = pl.pallas_call(
        kernel,
        out_shape=jax.ShapeDtypeStruct((M_pad, NP), jnp.float32),
        grid=(M_pad // TILE_M,),
        in_specs=[x_spec] + w_specs,
        out_specs=pl.BlockSpec((TILE_M, NP), lambda i: (i, 0)),
        compiler_params=pltpu.CompilerParams(
            dimension_semantics=("parallel",),
            vmem_limit_bytes=32 * 1024 * 1024,   # ~8 MB actually needed; v5e/v6e/v7x safe
        ),
        cost_estimate=pl.CostEstimate(flops=flops, transcendentals=0,
                                      bytes_accessed=bytes_accessed),
    )(x_flat, *[params[k] for k in _WEIGHT_KEYS])

    logits = out[:B, :n_actions]
    value = out[:B, n_actions:n_actions + 1]
    return logits, value


# ---------------------------------------------------------------------------
# Parameter init (orthogonal, gain sqrt(2), zero bias) + conv->dense folding.
# ---------------------------------------------------------------------------
def _orthogonal(rng, rows, cols, gain):
    a = rng.standard_normal((rows, cols))
    flip = rows < cols
    if flip:
        a = a.T
    q, r = np.linalg.qr(a)
    d = np.diag(r)
    q = q * np.where(d >= 0, 1.0, -1.0)          # robust sign (no zeroed columns)
    if flip:
        q = q.T
    return (gain * q).astype(np.float32)


def _conv_to_dense(w, H, W, stride):
    """Fold Conv2d(kh, kw, stride, no-pad) into a dense (Cin*H*W, O*Ho*Wo)
    matrix acting on NCHW-flattened activations (exact torch flatten order)."""
    O, C, kh, kw = w.shape
    Ho = (H - kh) // stride + 1
    Wo = (W - kw) // stride + 1
    big = np.zeros((C * H * W, O * Ho * Wo), np.float32)
    ii, jj = np.meshgrid(np.arange(Ho), np.arange(Wo), indexing="ij")
    ii = ii.ravel()
    jj = jj.ravel()                                                   # (Ho*Wo,)
    cols = ii[:, None] * Wo + jj[:, None] + np.arange(O)[None, :] * (Ho * Wo)  # (HoWo, O)
    for c in range(C):
        for p in range(kh):
            for q in range(kw):
                rows = c * H * W + (stride * ii + p) * W + (stride * jj + q)   # (HoWo,)
                big[rows[:, None], cols] = w[:, c, p, q][None, :]
    return big, Ho, Wo


def _pad_to(a, shape):
    out = np.zeros(shape, a.dtype)
    out[:a.shape[0], :a.shape[1]] = a
    return out


def init_params(input_shape, n_actions, seed=0):
    C, H, W = input_shape
    rng = np.random.default_rng(seed)
    gain = float(np.sqrt(2.0))

    def conv_w(o, c, k):
        return _orthogonal(rng, o, c * k * k, gain).reshape(o, c, k, k)

    # Conv trunk (biases are zero-init, matching the torch module).
    c1 = conv_w(32, C, 3)
    c2 = conv_w(64, 32, 3)
    c3 = conv_w(64, 64, 3)
    w1, H1, W1 = _conv_to_dense(c1, H, W, 2)
    w2, H2, W2 = _conv_to_dense(c2, H1, W1, 2)
    w3, H3, W3 = _conv_to_dense(c3, H2, W2, 2)
    flat = 64 * H3 * W3

    # Heads (same deterministic draw order as before).
    pi1 = _orthogonal(rng, 256, flat, gain)
    pi2 = _orthogonal(rng, n_actions, 256, gain)
    v1 = _orthogonal(rng, 256, flat, gain)
    v2 = _orthogonal(rng, 1, 256, gain)

    # Lane-align every intermediate width: pad output columns with zeros and the
    # matching input rows of the next weight with zeros (biases stay zero on pads).
    n1 = _round_up(w1.shape[1], 128)             # e.g. 1568 -> 1664
    n2 = _round_up(w2.shape[1], 128)             # e.g. 576  -> 640
    n3 = _round_up(w3.shape[1], 128)             # e.g. 64   -> 128
    w1 = _pad_to(w1, (w1.shape[0], n1))
    w2 = _pad_to(w2, (n1, n2))
    w3 = _pad_to(w3, (n2, n3))

    # Fused first head layer: (flat, 512) = [pi_fc1 | v_fc1], rows padded to n3.
    w4 = _pad_to(np.concatenate([pi1.T, v1.T], axis=1), (n3, 512))
    # Fused + lane-padded second head layer: (512, NP) = [pi_fc2 | v_fc2 | 0].
    NP = _round_up(max(n_actions + 1, 128), 128)
    w5 = np.zeros((512, NP), np.float32)
    w5[:256, :n_actions] = pi2.T
    w5[256:, n_actions:n_actions + 1] = v2.T

    def bf16(a):
        return jnp.asarray(a, jnp.bfloat16)

    def zero_bias(n):        # all torch biases are constant-0 initialized
        return jnp.zeros((1, n), jnp.float32)

    params = {
        "w1": bf16(w1), "b1": zero_bias(n1),
        "w2": bf16(w2), "b2": zero_bias(n2),
        "w3": bf16(w3), "b3": zero_bias(n3),
        "w4": bf16(w4), "b4": zero_bias(512),
        "w5": bf16(w5), "b5": zero_bias(NP),
    }
    raw = {"c1": c1, "c2": c2, "c3": c3, "pi1": pi1, "pi2": pi2, "v1": v1, "v2": v2}
    return params, raw


# ---------------------------------------------------------------------------
# Pure-JAX f32 reference (real convs) for tolerance checking.
# ---------------------------------------------------------------------------
def reference_forward(raw, x):
    def conv(h, w, stride):
        return jax.lax.conv_general_dilated(
            h, jnp.asarray(w), window_strides=(stride, stride), padding="VALID",
            dimension_numbers=("NCHW", "OIHW", "NCHW"))
    h = jax.nn.relu(conv(x, raw["c1"], 2))
    h = jax.nn.relu(conv(h, raw["c2"], 2))
    h = jax.nn.relu(conv(h, raw["c3"], 2))
    h = h.reshape(x.shape[0], -1)
    pi = jax.nn.relu(h @ jnp.asarray(raw["pi1"]).T) @ jnp.asarray(raw["pi2"]).T
    v = jax.nn.relu(h @ jnp.asarray(raw["v1"]).T) @ jnp.asarray(raw["v2"]).T
    return pi, v


if __name__ == "__main__":
    input_shape = (3, 16, 16)   # (C, H, W): the torch module hardcodes 3 input channels
    n_actions = 5
    batch = 2

    params, raw = init_params(input_shape, n_actions, seed=0)

    key = jax.random.PRNGKey(0)
    x = jax.random.normal(key, (batch,) + input_shape, dtype=jnp.float32)

    fwd = jax.jit(functools.partial(ppo_forward, n_actions=n_actions))
    logits, value = fwd(params, x)
    jax.block_until_ready((logits, value))

    assert logits.shape == (batch, n_actions), logits.shape
    assert value.shape == (batch, 1), value.shape
    assert bool(jnp.all(jnp.isfinite(logits))) and bool(jnp.all(jnp.isfinite(value)))

    # Tolerance check vs. an f32 real-conv reference (bf16 weights/activations ->
    # ~1e-2 level deviation expected; a broken fold would be O(1) off).
    ref_logits, ref_value = reference_forward(raw, x)
    l_err = float(jnp.max(jnp.abs(logits - ref_logits)))
    v_err = float(jnp.max(jnp.abs(value - ref_value)))
    assert l_err < 0.25 and v_err < 0.25, (l_err, v_err)

    print("KERNEL_OK")
</pallas_src>

<mosaic_0001>
module attributes {stable_mosaic.version = 11 : i64} {
  func.func @_fused_forward_kernel(%arg0: i32, %arg1: memref<8x768xf32, #tpu.memory_space<vmem>>, %arg2: memref<768x1664xbf16, #tpu.memory_space<vmem>>, %arg3: memref<1x1664xf32, #tpu.memory_space<vmem>>, %arg4: memref<1664x640xbf16, #tpu.memory_space<vmem>>, %arg5: memref<1x640xf32, #tpu.memory_space<vmem>>, %arg6: memref<640x128xbf16, #tpu.memory_space<vmem>>, %arg7: memref<1x128xf32, #tpu.memory_space<vmem>>, %arg8: memref<128x512xbf16, #tpu.memory_space<vmem>>, %arg9: memref<1x512xf32, #tpu.memory_space<vmem>>, %arg10: memref<512x128xbf16, #tpu.memory_space<vmem>>, %arg11: memref<1x128xf32, #tpu.memory_space<vmem>>, %arg12: memref<8x128xf32, #tpu.memory_space<vmem>>) attributes {dimension_semantics = [#tpu.dimension_semantics<parallel>], iteration_bounds = array<i64: 1>, scalar_prefetch = 0 : i64, scratch_operands = 0 : i64, tpu.core_type = #tpu.core_type<tc>, window_params = [{transform_indices = @transform_0, window_bounds = array<i64: 8, 768>}, {pipeline_mode = #tpu.pipeline_mode<synchronous>, transform_indices = @transform_1, window_bounds = array<i64: 768, 1664>}, {pipeline_mode = #tpu.pipeline_mode<synchronous>, transform_indices = @transform_2, window_bounds = array<i64: 1, 1664>}, {pipeline_mode = #tpu.pipeline_mode<synchronous>, transform_indices = @transform_3, window_bounds = array<i64: 1664, 640>}, {pipeline_mode = #tpu.pipeline_mode<synchronous>, transform_indices = @transform_4, window_bounds = array<i64: 1, 640>}, {pipeline_mode = #tpu.pipeline_mode<synchronous>, transform_indices = @transform_5, window_bounds = array<i64: 640, 128>}, {pipeline_mode = #tpu.pipeline_mode<synchronous>, transform_indices = @transform_6, window_bounds = array<i64: 1, 128>}, {pipeline_mode = #tpu.pipeline_mode<synchronous>, transform_indices = @transform_7, window_bounds = array<i64: 128, 512>}, {pipeline_mode = #tpu.pipeline_mode<synchronous>, transform_indices = @transform_8, window_bounds = array<i64: 1, 512>}, {pipeline_mode = #tpu.pipeline_mode<synchronous>, transform_indices = @transform_9, window_bounds = array<i64: 512, 128>}, {pipeline_mode = #tpu.pipeline_mode<synchronous>, transform_indices = @transform_10, window_bounds = array<i64: 1, 128>}, {transform_indices = @transform_11, window_bounds = array<i64: 8, 128>}]} {
    %c0 = arith.constant 0 : index
    %c0_0 = arith.constant 0 : index
    %0 = vector.load %arg1[%c0, %c0_0] : memref<8x768xf32, #tpu.memory_space<vmem>>, vector<8x768xf32>
    %1 = arith.truncf %0 : vector<8x768xf32> to vector<8x768xbf16>
    %c0_1 = arith.constant 0 : index
    %c0_2 = arith.constant 0 : index
    %2 = vector.load %arg2[%c0_1, %c0_2] : memref<768x1664xbf16, #tpu.memory_space<vmem>>, vector<768x1664xbf16>
    %cst = arith.constant dense<0.000000e+00> : vector<8x1664xf32>
    %3 = tpu.matmul %1, %2, %cst {dimension_numbers = #tpu.dot_dimension_numbers<[1], [0], [0], [1], [0, 0, 1, 1], [], []>} : vector<8x768xbf16>, vector<768x1664xbf16>, vector<8x1664xf32> -> vector<8x1664xf32>
    %c0_3 = arith.constant 0 : index
    %c0_4 = arith.constant 0 : index
    %4 = vector.load %arg3[%c0_3, %c0_4] : memref<1x1664xf32, #tpu.memory_space<vmem>>, vector<1x1664xf32>
    %5 = vector.broadcast %4 : vector<1x1664xf32> to vector<8x1664xf32>
    %6 = arith.addf %3, %5 : vector<8x1664xf32>
    %cst_5 = arith.constant 0.000000e+00 : f32
    %7 = vector.broadcast %cst_5 : f32 to vector<8x1664xf32>
    %8 = arith.maximumf %6, %7 : vector<8x1664xf32>
    %9 = arith.truncf %8 : vector<8x1664xf32> to vector<8x1664xbf16>
    %c0_6 = arith.constant 0 : index
    %c0_7 = arith.constant 0 : index
    %10 = vector.load %arg4[%c0_6, %c0_7] : memref<1664x640xbf16, #tpu.memory_space<vmem>>, vector<1664x640xbf16>
    %cst_8 = arith.constant dense<0.000000e+00> : vector<8x640xf32>
    %11 = tpu.matmul %9, %10, %cst_8 {dimension_numbers = #tpu.dot_dimension_numbers<[1], [0], [0], [1], [0, 0, 1, 1], [], []>} : vector<8x1664xbf16>, vector<1664x640xbf16>, vector<8x640xf32> -> vector<8x640xf32>
    %c0_9 = arith.constant 0 : index
    %c0_10 = arith.constant 0 : index
    %12 = vector.load %arg5[%c0_9, %c0_10] : memref<1x640xf32, #tpu.memory_space<vmem>>, vector<1x640xf32>
    %13 = vector.broadcast %12 : vector<1x640xf32> to vector<8x640xf32>
    %14 = arith.addf %11, %13 : vector<8x640xf32>
    %cst_11 = arith.constant 0.000000e+00 : f32
    %15 = vector.broadcast %cst_11 : f32 to vector<8x640xf32>
    %16 = arith.maximumf %14, %15 : vector<8x640xf32>
    %17 = arith.truncf %16 : vector<8x640xf32> to vector<8x640xbf16>
    %c0_12 = arith.constant 0 : index
    %c0_13 = arith.constant 0 : index
    %18 = vector.load %arg6[%c0_12, %c0_13] : memref<640x128xbf16, #tpu.memory_space<vmem>>, vector<640x128xbf16>
    %cst_14 = arith.constant dense<0.000000e+00> : vector<8x128xf32>
    %19 = tpu.matmul %17, %18, %cst_14 {dimension_numbers = #tpu.dot_dimension_numbers<[1], [0], [0], [1], [0, 0, 1, 1], [], []>} : vector<8x640xbf16>, vector<640x128xbf16>, vector<8x128xf32> -> vector<8x128xf32>
    %c0_15 = arith.constant 0 : index
    %c0_16 = arith.constant 0 : index
    %20 = vector.load %arg7[%c0_15, %c0_16] : memref<1x128xf32, #tpu.memory_space<vmem>>, vector<1x128xf32>
    %21 = vector.broadcast %20 : vector<1x128xf32> to vector<8x128xf32>
    %22 = arith.addf %19, %21 : vector<8x128xf32>
    %cst_17 = arith.constant 0.000000e+00 : f32
    %23 = vector.broadcast %cst_17 : f32 to vector<8x128xf32>
    %24 = arith.maximumf %22, %23 : vector<8x128xf32>
    %25 = arith.truncf %24 : vector<8x128xf32> to vector<8x128xbf16>
    %c0_18 = arith.constant 0 : index
    %c0_19 = arith.constant 0 : index
    %26 = vector.load %arg8[%c0_18, %c0_19] : memref<128x512xbf16, #tpu.memory_space<vmem>>, vector<128x512xbf16>
    %cst_20 = arith.constant dense<0.000000e+00> : vector<8x512xf32>
    %27 = tpu.matmul %25, %26, %cst_20 {dimension_numbers = #tpu.dot_dimension_numbers<[1], [0], [0], [1], [0, 0, 1, 1], [], []>} : vector<8x128xbf16>, vector<128x512xbf16>, vector<8x512xf32> -> vector<8x512xf32>
    %c0_21 = arith.constant 0 : index
    %c0_22 = arith.constant 0 : index
    %28 = vector.load %arg9[%c0_21, %c0_22] : memref<1x512xf32, #tpu.memory_space<vmem>>, vector<1x512xf32>
    %29 = vector.broadcast %28 : vector<1x512xf32> to vector<8x512xf32>
    %30 = arith.addf %27, %29 : vector<8x512xf32>
    %cst_23 = arith.constant 0.000000e+00 : f32
    %31 = vector.broadcast %cst_23 : f32 to vector<8x512xf32>
    %32 = arith.maximumf %30, %31 : vector<8x512xf32>
    %33 = arith.truncf %32 : vector<8x512xf32> to vector<8x512xbf16>
    %c0_24 = arith.constant 0 : index
    %c0_25 = arith.constant 0 : index
    %34 = vector.load %arg10[%c0_24, %c0_25] : memref<512x128xbf16, #tpu.memory_space<vmem>>, vector<512x128xbf16>
    %cst_26 = arith.constant dense<0.000000e+00> : vector<8x128xf32>
    %35 = tpu.matmul %33, %34, %cst_26 {dimension_numbers = #tpu.dot_dimension_numbers<[1], [0], [0], [1], [0, 0, 1, 1], [], []>} : vector<8x512xbf16>, vector<512x128xbf16>, vector<8x128xf32> -> vector<8x128xf32>
    %c0_27 = arith.constant 0 : index
    %c0_28 = arith.constant 0 : index
    %36 = vector.load %arg11[%c0_27, %c0_28] : memref<1x128xf32, #tpu.memory_space<vmem>>, vector<1x128xf32>
    %37 = vector.broadcast %36 : vector<1x128xf32> to vector<8x128xf32>
    %38 = arith.addf %35, %37 : vector<8x128xf32>
    %c0_29 = arith.constant 0 : index
    %c0_30 = arith.constant 0 : index
    %39 = vector.load %arg12[%c0_29, %c0_30] : memref<8x128xf32, #tpu.memory_space<vmem>>, vector<8x128xf32>
    tpu.vector_store %arg12[%c0_29, %c0_30], %38 {strides = array<i32>} : memref<8x128xf32, #tpu.memory_space<vmem>>, vector<8x128xf32>,
    return
  }
  func.func @transform_0(%arg0: i32) -> (i32, i32) {
    %c0_i32 = arith.constant 0 : i32
    %c0_i32_0 = arith.constant 0 : i32
    return %arg0, %c0_i32 : i32, i32
  }
  func.func @transform_1(%arg0: i32) -> (i32, i32) {
    %c0_i32 = arith.constant 0 : i32
    %c0_i32_0 = arith.constant 0 : i32
    %c0_i32_1 = arith.constant 0 : i32
    return %c0_i32, %c0_i32_0 : i32, i32
  }
  func.func @transform_2(%arg0: i32) -> (i32, i32) {
    %c0_i32 = arith.constant 0 : i32
    %c0_i32_0 = arith.constant 0 : i32
    %c0_i32_1 = arith.constant 0 : i32
    return %c0_i32, %c0_i32_0 : i32, i32
  }
  func.func @transform_3(%arg0: i32) -> (i32, i32) {
    %c0_i32 = arith.constant 0 : i32
    %c0_i32_0 = arith.constant 0 : i32
    %c0_i32_1 = arith.constant 0 : i32
    return %c0_i32, %c0_i32_0 : i32, i32
  }
  func.func @transform_4(%arg0: i32) -> (i32, i32) {
    %c0_i32 = arith.constant 0 : i32
    %c0_i32_0 = arith.constant 0 : i32
    %c0_i32_1 = arith.constant 0 : i32
    return %c0_i32, %c0_i32_0 : i32, i32
  }
  func.func @transform_5(%arg0: i32) -> (i32, i32) {
    %c0_i32 = arith.constant 0 : i32
    %c0_i32_0 = arith.constant 0 : i32
    %c0_i32_1 = arith.constant 0 : i32
    return %c0_i32, %c0_i32_0 : i32, i32
  }
  func.func @transform_6(%arg0: i32) -> (i32, i32) {
    %c0_i32 = arith.constant 0 : i32
    %c0_i32_0 = arith.constant 0 : i32
    %c0_i32_1 = arith.constant 0 : i32
    return %c0_i32, %c0_i32_0 : i32, i32
  }
  func.func @transform_7(%arg0: i32) -> (i32, i32) {
    %c0_i32 = arith.constant 0 : i32
    %c0_i32_0 = arith.constant 0 : i32
    %c0_i32_1 = arith.constant 0 : i32
    return %c0_i32, %c0_i32_0 : i32, i32
  }
  func.func @transform_8(%arg0: i32) -> (i32, i32) {
    %c0_i32 = arith.constant 0 : i32
    %c0_i32_0 = arith.constant 0 : i32
    %c0_i32_1 = arith.constant 0 : i32
    return %c0_i32, %c0_i32_0 : i32, i32
  }
  func.func @transform_9(%arg0: i32) -> (i32, i32) {
    %c0_i32 = arith.constant 0 : i32
    %c0_i32_0 = arith.constant 0 : i32
    %c0_i32_1 = arith.constant 0 : i32
    return %c0_i32, %c0_i32_0 : i32, i32
  }
  func.func @transform_10(%arg0: i32) -> (i32, i32) {
    %c0_i32 = arith.constant 0 : i32
    %c0_i32_0 = arith.constant 0 : i32
    %c0_i32_1 = arith.constant 0 : i32
    return %c0_i32, %c0_i32_0 : i32, i32
  }
  func.func @transform_11(%arg0: i32) -> (i32, i32) {
    %c0_i32 = arith.constant 0 : i32
    %c0_i32_0 = arith.constant 0 : i32
    return %arg0, %c0_i32 : i32, i32
  }
}

</mosaic_0001>

<bundles_post_ra>
// kernel: ppo_forward.1
= control target key start
LH: loop header
LB: loop body
LE: loop exit
PB: predicated region body
PF: predicated region fallthrough
CT: control target
= control target key end

     0   :  { %16 = vsyncpa [#allocation3], 0  ;;  %s14494_s0 = inlined_call_operand.vmem [shape: f32[8,768], index: 0, kind: input, shape index: {}]   ;;  %s14495_s1 = inlined_call_operand.hbm [shape: bf16[768,1664], index: 1, kind: input, shape index: {}]   ;;  %s14496_s2 = inlined_call_operand.hbm [shape: f32[1,1664], index: 2, kind: input, shape index: {}]   ;;  %s14497_s3 = inlined_call_operand.hbm [shape: bf16[1664,640], index: 3, kind: input, shape index: {}]   ;;  %s14498_s4 = inlined_call_operand.hbm [shape: f32[1,640], index: 4, kind: input, shape index: {}]   ;;  %s14499_s5 = inlined_call_operand.hbm [shape: bf16[640,128], index: 5, kind: input, shape index: {}]   ;;  %s14500_s6 = inlined_call_operand.hbm [shape: f32[1,128], index: 6, kind: input, shape index: {}]   ;;  %s14501_s7 = inlined_call_operand.hbm [shape: bf16[128,512], index: 7, kind: input, shape index: {}]   ;;  %s14502_s8 = inlined_call_operand.hbm [shape: f32[1,512], index: 8, kind: input, shape index: {}]   ;;  %s14503_s9 = inlined_call_operand.hbm [shape: bf16[512,128], index: 9, kind: input, shape index: {}]   ;;  %s14504_s10 = inlined_call_operand.hbm [shape: f32[1,128], index: 10, kind: input, shape index: {}]   ;;  %s14505_s11 = inlined_call_operand.vmem [shape: f32[8,128], index: 11, kind: output, shape index: {}]  }
   0x1   :  { %17 = vsyncpa [#allocation5], 0 }
   0x2   :  { %18 = vsyncpa [#allocation8], 0 }
   0x3   :  { %19 = vsyncpa [#allocation11], 0 }
   0x4   :  { %20 = vsyncpa [#allocation14], 0 }
   0x5   :  { %21 = vsyncpa [#allocation17], 0  ;;  %s14016_s17 = smov [#allocation4]   ;;  %s14017_s19 = smov [#allocation7]  }
   0x6   :  { %s42_s18 = sshll.u32 %s14016_s17, 4  ;;  %s64_s20 = sshll.u32 %s14017_s19, 4  ;;  %s43_s18 = int_to_ptr.vmem [resolvable:$true] %s42_s18  ;;  %s65_s20 = int_to_ptr.vmem [resolvable:$true] %s64_s20 }
   0x7   :  { %s13784_s23 = scalar_lea.hbm %s14496_s2, 208 }
   0x8   :  { %p13785_p0 = scmp.ne.s32.totalorder %s14496_s2, %s13784_s23  ;;  %p13788_p1 = scmp.lt.u32.totalorder %s13784_s23, %s14496_s2 }
   0xa   :  { %p13790_p2 = pnand %p13788_p1, %p13785_p0 }
   0xc   :  { %13793 = shalt.err (!%p13790_p2)
}
   0xd   :  { %s13794_s28 = scalar_lea.vmem %s43_s18, 208  ;;  %s13798_s29 = scalar_lea.vmem %s43_s18, 224 }
   0xe   :  { %p13795_p3 = scmp.ne.s32.totalorder %s43_s18, %s13794_s28  ;;  %p13799_p4 = scmp.lt.s32.totalorder %s43_s18, %s43_s18 }
   0xf   :  { %p13800_p5 = scmp.lt.s32.totalorder %s13798_s29, %s13794_s28 }
  0x11   :  { %p13801_p6 = por %p13800_p5, %p13799_p4 }
  0x13   :  { %p13802_p7 = pnand %p13801_p6, %p13795_p3 }
  0x15   :  { %13805 = shalt.err (!%p13802_p7)
}
  0x16   :  { %45 = dma.hbm_to_vmem [thread:$0]  %s14496_s2, 208, %s43_s18, [#allocation5]  }
  0x17   :  { %s13806_s15 = scalar_lea.hbm %s14498_s4, 80 }
  0x18   :  { %p13807_p8 = scmp.ne.s32.totalorder %s14498_s4, %s13806_s15  ;;  %p13810_p9 = scmp.lt.u32.totalorder %s13806_s15, %s14498_s4 }
  0x1a   :  { %p13812_p10 = pnand %p13810_p9, %p13807_p8 }
  0x1c   :  { %13815 = shalt.err (!%p13812_p10)
}
  0x1d   :  { %s13816_s22 = scalar_lea.vmem %s65_s20, 80  ;;  %s13820_s23 = scalar_lea.vmem %s65_s20, 96 }
  0x1e   :  { %p13817_p11 = scmp.ne.s32.totalorder %s65_s20, %s13816_s22  ;;  %p13821_p12 = scmp.lt.s32.totalorder %s65_s20, %s65_s20 }
  0x1f   :  { %p13822_p13 = scmp.lt.s32.totalorder %s13820_s23, %s13816_s22 }
  0x21   :  { %p13823_p0 = por %p13822_p13, %p13821_p12 }
  0x23   :  { %p13824_p1 = pnand %p13823_p0, %p13817_p11 }
  0x25   :  { %13827 = shalt.err (!%p13824_p1)
}
  0x26   :  { %67 = dma.hbm_to_vmem [thread:$0]  %s14498_s4, 80, %s65_s20, [#allocation8]  }
  0x27   :  { %s14018_s24 = smov [#allocation10]   ;;  %s14019_s26 = smov [#allocation13]  }
  0x28   :  { %s86_s25 = sshll.u32 %s14018_s24, 4  ;;  %s108_s27 = sshll.u32 %s14019_s26, 4  ;;  %s87_s25 = int_to_ptr.vmem [resolvable:$true] %s86_s25  ;;  %s109_s27 = int_to_ptr.vmem [resolvable:$true] %s108_s27 }
  0x29   :  { %s13828_s30 = scalar_lea.hbm %s14500_s6, 16 }
  0x2a   :  { %p13829_p2 = scmp.ne.s32.totalorder %s14500_s6, %s13828_s30  ;;  %p13832_p3 = scmp.lt.u32.totalorder %s13828_s30, %s14500_s6 }
  0x2c   :  { %p13834_p4 = pnand %p13832_p3, %p13829_p2 }
  0x2e   :  { %13837 = shalt.err (!%p13834_p4)
}
  0x2f   :  { %s13838_s4 = scalar_lea.vmem %s87_s25, 16  ;;  %s13842_s20 = scalar_lea.vmem %s87_s25, 32 }
  0x30   :  { %p13839_p5 = scmp.ne.s32.totalorder %s87_s25, %s13838_s4  ;;  %p13843_p6 = scmp.lt.s32.totalorder %s87_s25, %s87_s25 }
  0x31   :  { %p13844_p7 = scmp.lt.s32.totalorder %s13842_s20, %s13838_s4 }
  0x33   :  { %p13845_p8 = por %p13844_p7, %p13843_p6 }
  0x35   :  { %p13846_p9 = pnand %p13845_p8, %p13839_p5 }
  0x37   :  { %13849 = shalt.err (!%p13846_p9)
}
  0x38   :  { %89 = dma.hbm_to_vmem [thread:$0]  %s14500_s6, 16, %s87_s25, [#allocation11]  }
  0x39   :  { %s13850_s22 = scalar_lea.hbm %s14502_s8, 64 }
  0x3a   :  { %p13851_p10 = scmp.ne.s32.totalorder %s14502_s8, %s13850_s22  ;;  %p13854_p11 = scmp.lt.u32.totalorder %s13850_s22, %s14502_s8 }
  0x3c   :  { %p13856_p12 = pnand %p13854_p11, %p13851_p10 }
  0x3e   :  { %13859 = shalt.err (!%p13856_p12)
}
  0x3f   :  { %s13860_s26 = scalar_lea.vmem %s109_s27, 64  ;;  %p13865_p0 = scmp.lt.s32.totalorder %s109_s27, %s109_s27 }
  0x40   :  { %p13861_p13 = scmp.ne.s32.totalorder %s109_s27, %s13860_s26  ;;  %p13866_p1 = scmp.lt.s32.totalorder %s13860_s26, %s13860_s26 }
  0x42   :  { %p13867_p2 = por %p13866_p1, %p13865_p0 }
  0x44   :  { %p13868_p3 = pnand %p13867_p2, %p13861_p13 }
  0x46   :  { %13871 = shalt.err (!%p13868_p3)
}
  0x47   :  { %111 = dma.hbm_to_vmem [thread:$0]  %s14502_s8, 64, %s109_s27, [#allocation14]  }
  0x48   :  { %s14020_s28 = smov [#allocation2]   ;;  %s13872_s13 = scalar_lea.hbm %s14495_s1, 79872 }
  0x49   :  { %s29_s29 = sshll.u32 %s14020_s28, 4  ;;  %p13873_p4 = scmp.ne.s32.totalorder %s14495_s1, %s13872_s13  ;;  %s30_s29 = int_to_ptr.vmem [resolvable:$true] %s29_s29 }
  0x4a   :  { %p13876_p5 = scmp.lt.u32.totalorder %s13872_s13, %s14495_s1 }
  0x4c   :  { %p13878_p6 = pnand %p13876_p5, %p13873_p4 }
  0x4e   :  { %13881 = shalt.err (!%p13878_p6)
}
  0x4f   :  { %s13882_s16 = scalar_lea.vmem %s30_s29, 79872  ;;  %p13887_p8 = scmp.lt.s32.totalorder %s30_s29, %s30_s29 }
  0x50   :  { %p13883_p7 = scmp.ne.s32.totalorder %s30_s29, %s13882_s16  ;;  %p13888_p9 = scmp.lt.s32.totalorder %s13882_s16, %s13882_s16 }
  0x52   :  { %p13889_p10 = por %p13888_p9, %p13887_p8 }
  0x54   :  { %p13890_p11 = pnand %p13889_p10, %p13883_p7 }
  0x56   :  { %13893 = shalt.err (!%p13890_p11)
}
  0x57   :  { %s14021_s8 = smov 832   ;;  %s14022_s27 = smov 52  }
  0x58   :  { %35 = dma.hbm_to_vmem [thread:$0]  %s14495_s1, 79872, %s30_s29, [#allocation3], %s14021_s8, %s14021_s8, %s14022_s27  }
  0x59   :  { %s14023_s21 = smov [#allocation6]   ;;  %s13894_s18 = scalar_lea.hbm %s14497_s3, 66560 }
  0x5a   :  { %s51_s22 = sshll.u32 %s14023_s21, 4  ;;  %p13895_p12 = scmp.ne.s32.totalorder %s14497_s3, %s13894_s18  ;;  %s52_s22 = int_to_ptr.vmem [resolvable:$true] %s51_s22 }
  0x5b   :  { %p13898_p13 = scmp.lt.u32.totalorder %s13894_s18, %s14497_s3 }
  0x5d   :  { %p13900_p0 = pnand %p13898_p13, %p13895_p12 }
  0x5f   :  { %13903 = shalt.err (!%p13900_p0)
}
  0x60   :  { %s13904_s28 = scalar_lea.vmem %s52_s22, 66560  ;;  %p13909_p2 = scmp.lt.s32.totalorder %s52_s22, %s52_s22 }
  0x61   :  { %p13905_p1 = scmp.ne.s32.totalorder %s52_s22, %s13904_s28  ;;  %p13910_p3 = scmp.lt.s32.totalorder %s13904_s28, %s13904_s28 }
  0x63   :  { %p13911_p4 = por %p13910_p3, %p13909_p2 }
  0x65   :  { %p13912_p5 = pnand %p13911_p4, %p13905_p1 }
  0x67   :  { %13915 = shalt.err (!%p13912_p5)
}
  0x68   :  { %s14024_s1 = smov 320   ;;  %s14025_s29 = smov 20  }
  0x69   :  { %57 = dma.hbm_to_vmem [thread:$0]  %s14497_s3, 66560, %s52_s22, [#allocation5], %s14024_s1, %s14024_s1, %s14025_s29  }
  0x6a   :  { %s14026_s13 = smov [#allocation9]   ;;  %s13916_s20 = scalar_lea.hbm %s14499_s5, 5120 }
  0x6b   :  { %s73_s14 = sshll.u32 %s14026_s13, 4  ;;  %p13917_p6 = scmp.ne.s32.totalorder %s14499_s5, %s13916_s20  ;;  %s74_s14 = int_to_ptr.vmem [resolvable:$true] %s73_s14 }
  0x6c   :  { %p13920_p7 = scmp.lt.u32.totalorder %s13916_s20, %s14499_s5 }
  0x6e   :  { %p13922_p8 = pnand %p13920_p7, %p13917_p6 }
  0x70   :  { %13925 = shalt.err (!%p13922_p8)
}
  0x71   :  { %s13926_s19 = scalar_lea.vmem %s74_s14, 5120  ;;  %p13931_p10 = scmp.lt.s32.totalorder %s74_s14, %s74_s14 }
  0x72   :  { %p13927_p9 = scmp.ne.s32.totalorder %s74_s14, %s13926_s19  ;;  %p13932_p11 = scmp.lt.s32.totalorder %s13926_s19, %s13926_s19 }
  0x74   :  { %p13933_p12 = por %p13932_p11, %p13931_p10 }
  0x76   :  { %p13934_p13 = pnand %p13933_p12, %p13927_p9 }
  0x78   :  { %13937 = shalt.err (!%p13934_p13)
}
  0x79   :  { %s14027_s3 = smov 64   ;;  %s14028_s21 = smov 4  }
  0x7a   :  { %79 = dma.hbm_to_vmem [thread:$0]  %s14499_s5, 5120, %s74_s14, [#allocation8], %s14027_s3, %s14027_s3, %s14028_s21  }
  0x7b   :  { %s14029_s2 = smov [#allocation12]   ;;  %s13938_s6 = scalar_lea.hbm %s14501_s7, 4096 }
  0x7c   :  { %s95_s18 = sshll.u32 %s14029_s2, 4  ;;  %p13939_p0 = scmp.ne.s32.totalorder %s14501_s7, %s13938_s6  ;;  %s96_s18 = int_to_ptr.vmem [resolvable:$true] %s95_s18 }
  0x7d   :  { %p13942_p1 = scmp.lt.u32.totalorder %s13938_s6, %s14501_s7 }
  0x7f   :  { %p13944_p2 = pnand %p13942_p1, %p13939_p0 }
  0x81   :  { %13947 = shalt.err (!%p13944_p2)
}
  0x82   :  { %s13948_s30 = scalar_lea.vmem %s96_s18, 4096  ;;  %p13953_p4 = scmp.lt.s32.totalorder %s96_s18, %s96_s18 }
  0x83   :  { %p13949_p3 = scmp.ne.s32.totalorder %s96_s18, %s13948_s30  ;;  %p13954_p5 = scmp.lt.s32.totalorder %s13948_s30, %s13948_s30 }
  0x85   :  { %p13955_p6 = por %p13954_p5, %p13953_p4 }
  0x87   :  { %p13956_p7 = pnand %p13955_p6, %p13949_p3 }
  0x89   :  { %13959 = shalt.err (!%p13956_p7)
}
  0x8a   :  { %s14030_s5 = smov 256   ;;  %s14031_s12 = smov 16  }
  0x8b   :  { %101 = dma.hbm_to_vmem [thread:$0]  %s14501_s7, 4096, %s96_s18, [#allocation11], %s14030_s5, %s14030_s5, %s14031_s12  }
  0x8c   :  { %s14032_s15 = smov [#allocation15]   ;;  %s14033_s20 = smov [#allocation16]  }
  0x8d   :  { %s117_s4 = sshll.u32 %s14032_s15, 4  ;;  %s130_s16 = sshll.u32 %s14033_s20, 4  ;;  %s118_s4 = int_to_ptr.vmem [resolvable:$true] %s117_s4  ;;  %s131_s16 = int_to_ptr.vmem [resolvable:$true] %s130_s16 }
  0x8e   :  { %s13960_s17 = scalar_lea.hbm %s14503_s9, 4096 }
  0x8f   :  { %p13961_p8 = scmp.ne.s32.totalorder %s14503_s9, %s13960_s17  ;;  %p13964_p9 = scmp.lt.u32.totalorder %s13960_s17, %s14503_s9 }
  0x91   :  { %p13966_p10 = pnand %p13964_p9, %p13961_p8 }
  0x93   :  { %13969 = shalt.err (!%p13966_p10)
}
  0x94   :  { %s13970_s7 = scalar_lea.vmem %s118_s4, 4096  ;;  %p13975_p12 = scmp.lt.s32.totalorder %s118_s4, %s118_s4 }
  0x95   :  { %p13971_p11 = scmp.ne.s32.totalorder %s118_s4, %s13970_s7  ;;  %p13976_p13 = scmp.lt.s32.totalorder %s13970_s7, %s13970_s7 }
  0x97   :  { %p13977_p0 = por %p13976_p13, %p13975_p12 }
  0x99   :  { %p13978_p1 = pnand %p13977_p0, %p13971_p11 }
  0x9b   :  { %13981 = shalt.err (!%p13978_p1)
}
  0x9c   :  { %123 = dma.hbm_to_vmem [thread:$0]  %s14503_s9, 4096, %s118_s4, [#allocation14], %s14027_s3, %s14027_s3, %s14028_s21  }
  0x9d   :  { %s13982_s25 = scalar_lea.hbm %s14504_s10, 16 }
  0x9e   :  { %p13983_p2 = scmp.ne.s32.totalorder %s14504_s10, %s13982_s25  ;;  %p13986_p3 = scmp.lt.u32.totalorder %s13982_s25, %s14504_s10 }
  0xa0   :  { %p13988_p4 = pnand %p13986_p3, %p13983_p2 }
  0xa2   :  { %13991 = shalt.err (!%p13988_p4)
}
  0xa3   :  { %s13992_s5 = scalar_lea.vmem %s131_s16, 16  ;;  %s13996_s12 = scalar_lea.vmem %s131_s16, 32 }
  0xa4   :  { %p13993_p5 = scmp.ne.s32.totalorder %s131_s16, %s13992_s5  ;;  %p13997_p6 = scmp.lt.s32.totalorder %s131_s16, %s131_s16 }
  0xa5   :  { %p13998_p7 = scmp.lt.s32.totalorder %s13996_s12, %s13992_s5 }
  0xa7   :  { %p13999_p8 = por %p13998_p7, %p13997_p6 }
  0xa9   :  { %p14000_p9 = pnand %p13999_p8, %p13993_p5 }
  0xab   :  { %14003 = shalt.err (!%p14000_p9)
}
  0xac   :  { %133 = dma.hbm_to_vmem [thread:$0]  %s14504_s10, 16, %s131_s16, [#allocation17]  }
  0xad   :  { %14004 = dma.done.wait [#allocation3], 79872  }
  0xae   :  { %14005 = vsyncadd [#allocation3], 4294887424 }
  0xaf   :  { %14006 = dma.done.wait [#allocation5], 66768  }
  0xb0   :  { %14007 = vsyncadd [#allocation5], 4294900528 }
  0xb1   :  { %14008 = dma.done.wait [#allocation8], 5200  }
  0xb2   :  { %14009 = vsyncadd [#allocation8], 4294962096 }
  0xb3   :  { %14010 = dma.done.wait [#allocation11], 4112  }
  0xb4   :  { %14011 = vsyncadd [#allocation11], 4294963184 }
  0xb5   :  { %14012 = dma.done.wait [#allocation14], 4160  }
  0xb6   :  { %14013 = vsyncadd [#allocation14], 4294963136 }
  0xb7   :  { %14014 = dma.done.wait [#allocation17], 16  }
  0xb8   :  { %14015 = vsyncadd [#allocation17], 4294967280  ;;  %v12023_v0 = vld [vmem:[#allocation2 + $0x4] ss:$52 sps:$4 sm:$0xff]   ;;  %v12025_v1 = vld [vmem:[#allocation2 + $0xc] ss:$52 sps:$4 sm:$0xff]  }
  0xb9   :  { %4086 = vmatprep.subr.bf16.mxu0 %v12023_v0  ;;  %v12027_v2 = vld [vmem:[#allocation2] ss:$52 sps:$4 sm:$0xff]   ;;  %v12028_v3 = vld [vmem:[#allocation2 + $0x8] ss:$52 sps:$4 sm:$0xff]   ;;  %4209 = vmatprep.subr.bf16.mxu1 %v12025_v1  ;;  %v12034_v7 = vld [vmem:[#allocation2 + $0x70] ss:$52 sps:$4 sm:$0xff]  }
  0xba   :  { %v12029_v4 = vld [vmem:[#allocation2 + $0x6c] ss:$52 sps:$4 sm:$0xff]   ;;  %4087 = vmatpush1.bf16.msra.mxu0 %v12027_v2  ;;  %4210 = vmatpush1.bf16.msra.mxu1 %v12028_v3  ;;  %v12031_v5 = vld [vmem:[#allocation2 + $0x74] ss:$52 sps:$4 sm:$0xff]   ;;  %v12037_v9 = vld [vmem:[#allocation2 + $0xdc] ss:$52 sps:$4 sm:$0xff]  }
  0xbb   :  { %v12033_v6 = vld [vmem:[#allocation2 + $0x68] ss:$52 sps:$4 sm:$0xff]   ;;  %4088 = vmatprep.subr.bf16.mxu0 %v12029_v4  ;;  %4211 = vmatprep.subr.bf16.mxu1 %v12031_v5  ;;  %v12039_v10 = vld [vmem:[#allocation2 + $0xd0] ss:$52 sps:$4 sm:$0xff]   ;;  %v12040_v11 = vld [vmem:[#allocation2 + $0xd8] ss:$52 sps:$4 sm:$0xff]  }
  0xbc   :  { %v12035_v8 = vld [vmem:[#allocation2 + $0xd4] ss:$52 sps:$4 sm:$0xff]   ;;  %v12041_v12 = vld [vmem:[#allocation2 + $0x13c] ss:$52 sps:$4 sm:$0xff]   ;;  %v12043_v13 = vld [vmem:[#allocation2 + $0x144] ss:$52 sps:$4 sm:$0xff]  }
  0xbd   :  { %v12045_v14 = vld [vmem:[#allocation2 + $0x138] ss:$52 sps:$4 sm:$0xff]   ;;  %v12046_v15 = vld [vmem:[#allocation2 + $0x140] ss:$52 sps:$4 sm:$0xff]   ;;  %v12052_v19 = vld [vmem:[#allocation2 + $0x1a8] ss:$52 sps:$4 sm:$0xff]  }
  0xbe   :  { %4089 = vmatpush1.bf16.msra.mxu0 %v12033_v6  ;;  %4212 = vmatpush1.bf16.msra.mxu1 %v12034_v7  ;;  %v12047_v16 = vld [vmem:[#allocation2 + $0x1a4] ss:$52 sps:$4 sm:$0xff]   ;;  %v12049_v17 = vld [vmem:[#allocation2 + $0x1ac] ss:$52 sps:$4 sm:$0xff]   ;;  %v12055_v21 = vld [vmem:[#allocation2 + $0x214] ss:$52 sps:$4 sm:$0xff]  }
  0xbf   :  { %4090 = vmatprep.subr.bf16.mxu0 %v12035_v8  ;;  %4213 = vmatprep.subr.bf16.mxu1 %v12037_v9  ;;  %v12051_v18 = vld [vmem:[#allocation2 + $0x1a0] ss:$52 sps:$4 sm:$0xff]   ;;  %v12057_v22 = vld [vmem:[#allocation2 + $0x208] ss:$52 sps:$4 sm:$0xff]   ;;  %v12058_v23 = vld [vmem:[#allocation2 + $0x210] ss:$52 sps:$4 sm:$0xff]  }
  0xc0   :  { %v12053_v20 = vld [vmem:[#allocation2 + $0x20c] ss:$52 sps:$4 sm:$0xff]   ;;  %v12059_v24 = vld [vmem:[#allocation2 + $0x274] ss:$52 sps:$4 sm:$0xff]   ;;  %v12061_v25 = vld [vmem:[#allocation2 + $0x27c] ss:$52 sps:$4 sm:$0xff]  }
  0xc1   :  { %v12063_v26 = vld [vmem:[#allocation2 + $0x270] ss:$52 sps:$4 sm:$0xff]   ;;  %v12064_v27 = vld [vmem:[#allocation2 + $0x278] ss:$52 sps:$4 sm:$0xff]   ;;  %v12070_v31 = vld [vmem:[#allocation2 + $0x2e0] ss:$52 sps:$4 sm:$0xff]  }
  0xc2   :  { %4091 = vmatpush1.bf16.msra.mxu0 %v12039_v10  ;;  %4214 = vmatpush1.bf16.msra.mxu1 %v12040_v11  ;;  %v12065_v28 = vld [vmem:[#allocation2 + $0x2dc] ss:$52 sps:$4 sm:$0xff]   ;;  %v12067_v29 = vld [vmem:[#allocation2 + $0x2e4] ss:$52 sps:$4 sm:$0xff]   ;;  %v12073_v33 = vld [vmem:[#allocation2 + $0x34c] ss:$52 sps:$4 sm:$0xff]  }
  0xc3   :  { %4092 = vmatprep.subr.bf16.mxu0 %v12041_v12  ;;  %4215 = vmatprep.subr.bf16.mxu1 %v12043_v13  ;;  %v12069_v30 = vld [vmem:[#allocation2 + $0x2d8] ss:$52 sps:$4 sm:$0xff]   ;;  %v12075_v34 = vld [vmem:[#allocation2 + $0x340] ss:$52 sps:$4 sm:$0xff]   ;;  %v12076_v35 = vld [vmem:[#allocation2 + $0x348] ss:$52 sps:$4 sm:$0xff]  }
  0xc4   :  { %v12071_v32 = vld [vmem:[#allocation2 + $0x344] ss:$52 sps:$4 sm:$0xff]   ;;  %v12077_v36 = vld [vmem:[#allocation2 + $0x3ac] ss:$52 sps:$4 sm:$0xff]   ;;  %v12079_v37 = vld [vmem:[#allocation2 + $0x3b4] ss:$52 sps:$4 sm:$0xff]  }
  0xc5   :  { %v12081_v38 = vld [vmem:[#allocation2 + $0x3a8] ss:$52 sps:$4 sm:$0xff]   ;;  %v12082_v39 = vld [vmem:[#allocation2 + $0x3b0] ss:$52 sps:$4 sm:$0xff]   ;;  %v12088_v43 = vld [vmem:[#allocation2 + $0x418] ss:$52 sps:$4 sm:$0xff]  }
  0xc6   :  { %4093 = vmatpush1.bf16.msra.mxu0 %v12045_v14  ;;  %4216 = vmatpush1.bf16.msra.mxu1 %v12046_v15  ;;  %v12083_v40 = vld [vmem:[#allocation2 + $0x414] ss:$52 sps:$4 sm:$0xff]   ;;  %v12085_v41 = vld [vmem:[#allocation2 + $0x41c] ss:$52 sps:$4 sm:$0xff]   ;;  %v12091_v45 = vld [vmem:[#allocation2 + $0x484] ss:$52 sps:$4 sm:$0xff]  }
  0xc7   :  { %4094 = vmatprep.subr.bf16.mxu0 %v12047_v16  ;;  %4217 = vmatprep.subr.bf16.mxu1 %v12049_v17  ;;  %v12087_v42 = vld [vmem:[#allocation2 + $0x410] ss:$52 sps:$4 sm:$0xff]   ;;  %v166_v46 = vld [vmem:[%s14494_s0 + $0x8] sm:$0xff]  ;;  %v12094_v49 = vld [vmem:[#allocation2 + $0x480] ss:$52 sps:$4 sm:$0xff]   ;;  %vm14036_vm0 = vmmov 0  }
  0xc8   :  { %v12089_v44 = vld [vmem:[#allocation2 + $0x47c] ss:$52 sps:$4 sm:$0xff]   ;;  %v12093_v47 = vld [vmem:[#allocation2 + $0x478] ss:$52 sps:$4 sm:$0xff]   ;;  %v14226_v48 = vpack.c.bf16 %v166_v46, %v166_v46  ;;  %v12099_v52 = vld [vmem:[#allocation2 + $0x4e0] ss:$52 sps:$4 sm:$0xff]  }
  0xc9   :  { %v12095_v50 = vld [vmem:[#allocation2 + $0x4e4] ss:$52 sps:$4 sm:$0xff]   ;;  %v12097_v51 = vld [vmem:[#allocation2 + $0x4ec] ss:$52 sps:$4 sm:$0xff]   ;;  %v12100_v53 = vld [vmem:[#allocation2 + $0x4e8] ss:$52 sps:$4 sm:$0xff]  }
  0xca   :  { %4095 = vmatpush1.bf16.msra.mxu0 %v12051_v18  ;;  %4218 = vmatpush1.bf16.msra.mxu1 %v12052_v19  ;;  %v12101_v54 = vld [vmem:[#allocation2 + $0x54c] ss:$52 sps:$4 sm:$0xff]   ;;  %v12103_v55 = vld [vmem:[#allocation2 + $0x554] ss:$52 sps:$4 sm:$0xff]   ;;  %v12106_v57 = vld [vmem:[#allocation2 + $0x550] ss:$52 sps:$4 sm:$0xff]  }
  0xcb   :  { %4096 = vmatprep.subr.bf16.mxu0 %v12053_v20  ;;  %4219 = vmatprep.subr.bf16.mxu1 %v12055_v21  ;;  %v12105_v56 = vld [vmem:[#allocation2 + $0x548] ss:$52 sps:$4 sm:$0xff]   ;;  %v12111_v60 = vld [vmem:[#allocation2 + $0x5b0] ss:$52 sps:$4 sm:$0xff]   ;;  %v12112_v61 = vld [vmem:[#allocation2 + $0x5b8] ss:$52 sps:$4 sm:$0xff]  }
  0xcc   :  { %4118 = vmatprep.mubr.bf16.mxu0 %v14226_v48  ;;  %4241 = vmatprep.mubr.bf16.mxu1 %v14226_v48  ;;  %v12107_v58 = vld [vmem:[#allocation2 + $0x5b4] ss:$52 sps:$4 sm:$0xff]   ;;  %v12109_v59 = vld [vmem:[#allocation2 + $0x5bc] ss:$52 sps:$4 sm:$0xff]   ;;  %v12115_v63 = vld [vmem:[#allocation2 + $0x624] ss:$52 sps:$4 sm:$0xff]  }
  0xcd   :  { %v12113_v62 = vld [vmem:[#allocation2 + $0x61c] ss:$52 sps:$4 sm:$0xff]   ;;  %v12117_v0 = vld [vmem:[#allocation2 + $0x618] ss:$52 sps:$4 sm:$0xff]   ;;  %v12118_v1 = vld [vmem:[#allocation2 + $0x620] ss:$52 sps:$4 sm:$0xff]  }
  0xce   :  { %4097 = vmatpush1.bf16.msra.mxu0 %v12057_v22  ;;  %4220 = vmatpush1.bf16.msra.mxu1 %v12058_v23  ;;  %v165_v2 = vld [vmem:[%s14494_s0] sm:$0xff]  ;;  %v12122_v7 = vld [vmem:[#allocation2 + $0x688] ss:$52 sps:$4 sm:$0xff]   ;;  %v12134_v15 = vld [vmem:[#allocation2 + $0x758] ss:$52 sps:$4 sm:$0xff]  }
  0xcf   :  { %4098 = vmatprep.subr.bf16.mxu0 %v12059_v24  ;;  %4221 = vmatprep.subr.bf16.mxu1 %v12061_v25  ;;  %v12121_v3 = vld [vmem:[#allocation2 + $0x684] ss:$52 sps:$4 sm:$0xff]   ;;  %v12124_v4 = vld [vmem:[#allocation2 + $0x68c] ss:$52 sps:$4 sm:$0xff]   ;;  %v14233_v5 = vpack.c.bf16 %v165_v2, %v165_v2  ;;  %v12130_v9 = vld [vmem:[#allocation2 + $0x6f4] ss:$52 sps:$4 sm:$0xff]  }
  0xd0   :  { %v12119_v6 = vld [vmem:[#allocation2 + $0x680] ss:$52 sps:$4 sm:$0xff]   ;;  %v12125_v10 = vld [vmem:[#allocation2 + $0x6e8] ss:$52 sps:$4 sm:$0xff]   ;;  %v12128_v11 = vld [vmem:[#allocation2 + $0x6f0] ss:$52 sps:$4 sm:$0xff]  }
  0xd1   :  { %v12127_v8 = vld [vmem:[#allocation2 + $0x6ec] ss:$52 sps:$4 sm:$0xff]   ;;  %v12133_v12 = vld [vmem:[#allocation2 + $0x754] ss:$52 sps:$4 sm:$0xff]   ;;  %v12136_v13 = vld [vmem:[#allocation2 + $0x75c] ss:$52 sps:$4 sm:$0xff]  }
  0xd2   :  { %4099 = vmatpush1.bf16.msra.mxu0 %v12063_v26  ;;  %4222 = vmatpush1.bf16.msra.mxu1 %v12064_v27  ;;  %v12131_v14 = vld [vmem:[#allocation2 + $0x750] ss:$52 sps:$4 sm:$0xff]   ;;  %v12137_v18 = vld [vmem:[#allocation2 + $0x7b8] ss:$52 sps:$4 sm:$0xff]   ;;  %v12140_v19 = vld [vmem:[#allocation2 + $0x7c0] ss:$52 sps:$4 sm:$0xff]  }
  0xd3   :  { %4100 = vmatprep.subr.bf16.mxu0 %v12065_v28  ;;  %4223 = vmatprep.subr.bf16.mxu1 %v12067_v29  ;;  %v12139_v16 = vld [vmem:[#allocation2 + $0x7bc] ss:$52 sps:$4 sm:$0xff]   ;;  %v12142_v17 = vld [vmem:[#allocation2 + $0x7c4] ss:$52 sps:$4 sm:$0xff]   ;;  %v12148_v21 = vld [vmem:[#allocation2 + $0x82c] ss:$52 sps:$4 sm:$0xff]  }
  0xd4   :  { %v12145_v20 = vld [vmem:[#allocation2 + $0x824] ss:$52 sps:$4 sm:$0xff]   ;;  %v12143_v22 = vld [vmem:[#allocation2 + $0x820] ss:$52 sps:$4 sm:$0xff]   ;;  %v12146_v23 = vld [vmem:[#allocation2 + $0x828] ss:$52 sps:$4 sm:$0xff]  }
  0xd5   :  { %v12151_v24 = vld [vmem:[#allocation2 + $0x88c] ss:$52 sps:$4 sm:$0xff]   ;;  %v12154_v25 = vld [vmem:[#allocation2 + $0x894] ss:$52 sps:$4 sm:$0xff]   ;;  %v12152_v27 = vld [vmem:[#allocation2 + $0x890] ss:$52 sps:$4 sm:$0xff]  }
  0xd6   :  { %4101 = vmatpush1.bf16.msra.mxu0 %v12069_v30  ;;  %4224 = vmatpush1.bf16.msra.mxu1 %v12070_v31  ;;  %v12149_v26 = vld [vmem:[#allocation2 + $0x888] ss:$52 sps:$4 sm:$0xff]   ;;  %v12155_v31 = vld [vmem:[#allocation2 + $0x8f0] ss:$52 sps:$4 sm:$0xff]   ;;  %v12206_v2 = vld [vmem:[#allocation2 + $0xc38] ss:$52 sps:$4 sm:$0xff]  }
  0xd7   :  { %4102 = vmatprep.subr.bf16.mxu0 %v12071_v32  ;;  %4225 = vmatprep.subr.bf16.mxu1 %v12073_v33  ;;  %v12157_v28 = vld [vmem:[#allocation2 + $0x8f4] ss:$52 sps:$4 sm:$0xff]   ;;  %v12160_v29 = vld [vmem:[#allocation2 + $0x8fc] ss:$52 sps:$4 sm:$0xff]   ;;  %v12158_v33 = vld [vmem:[#allocation2 + $0x8f8] ss:$52 sps:$4 sm:$0xff]  }
  0xd8   :  { %v168_v30 = vld [vmem:[%s14494_s0 + $0x18] sm:$0xff]  ;;  %v12181_v46 = vld [vmem:[#allocation2 + $0xa94] ss:$52 sps:$4 sm:$0xff]  }
  0xd9   :  { %v14240_v32 = vpack.c.bf16 %v168_v30, %v168_v30  ;;  %v12239_v30 = vld [vmem:[#allocation2 + $0xea0] ss:$52 sps:$4 sm:$0xff]  }
  0xda   :  { %4103 = vmatpush1.bf16.msra.mxu0 %v12075_v34  ;;  %4226 = vmatpush1.bf16.msra.mxu1 %v12076_v35  ;;  %v12163_v34 = vld [vmem:[#allocation2 + $0x95c] ss:$52 sps:$4 sm:$0xff]   ;;  %v12166_v35 = vld [vmem:[#allocation2 + $0x964] ss:$52 sps:$4 sm:$0xff]  }
  0xdb   :  { %4104 = vmatprep.subr.bf16.mxu0 %v12077_v36  ;;  %4227 = vmatprep.subr.bf16.mxu1 %v12079_v37  ;;  %v12161_v36 = vld [vmem:[#allocation2 + $0x958] ss:$52 sps:$4 sm:$0xff]   ;;  %v12164_v37 = vld [vmem:[#allocation2 + $0x960] ss:$52 sps:$4 sm:$0xff]  }
  0xde   :  { %4105 = vmatpush1.bf16.msra.mxu0 %v12081_v38  ;;  %4228 = vmatpush1.bf16.msra.mxu1 %v12082_v39  ;;  %v12169_v38 = vld [vmem:[#allocation2 + $0x9c4] ss:$52 sps:$4 sm:$0xff]   ;;  %v12172_v39 = vld [vmem:[#allocation2 + $0x9cc] ss:$52 sps:$4 sm:$0xff]  }
  0xdf   :  { %4106 = vmatprep.subr.bf16.mxu0 %v12083_v40  ;;  %4229 = vmatprep.subr.bf16.mxu1 %v12085_v41  ;;  %v12167_v40 = vld [vmem:[#allocation2 + $0x9c0] ss:$52 sps:$4 sm:$0xff]   ;;  %v12170_v41 = vld [vmem:[#allocation2 + $0x9c8] ss:$52 sps:$4 sm:$0xff]  }
  0xe2   :  { %4107 = vmatpush1.bf16.msra.mxu0 %v12087_v42  ;;  %4230 = vmatpush1.bf16.msra.mxu1 %v12088_v43  ;;  %v12175_v42 = vld [vmem:[#allocation2 + $0xa2c] ss:$52 sps:$4 sm:$0xff]   ;;  %v12178_v43 = vld [vmem:[#allocation2 + $0xa34] ss:$52 sps:$4 sm:$0xff]  }
  0xe3   :  { %4108 = vmatprep.subr.bf16.mxu0 %v12089_v44  ;;  %4231 = vmatprep.subr.bf16.mxu1 %v12091_v45  ;;  %v12173_v44 = vld [vmem:[#allocation2 + $0xa28] ss:$52 sps:$4 sm:$0xff]   ;;  %v12176_v45 = vld [vmem:[#allocation2 + $0xa30] ss:$52 sps:$4 sm:$0xff]  }
  0xe6   :  { %4109 = vmatpush1.bf16.msra.mxu0 %v12093_v47  ;;  %4232 = vmatpush1.bf16.msra.mxu1 %v12094_v49  ;;  %v12184_v47 = vld [vmem:[#allocation2 + $0xa9c] ss:$52 sps:$4 sm:$0xff]  }
  0xe7   :  { %4110 = vmatprep.subr.bf16.mxu0 %v12095_v50  ;;  %4233 = vmatprep.subr.bf16.mxu1 %v12097_v51  ;;  %v12179_v49 = vld [vmem:[#allocation2 + $0xa90] ss:$52 sps:$4 sm:$0xff]   ;;  %v12182_v50 = vld [vmem:[#allocation2 + $0xa98] ss:$52 sps:$4 sm:$0xff]  }
  0xe8   :  { %v12187_v51 = vld [vmem:[#allocation2 + $0xafc] ss:$52 sps:$4 sm:$0xff]  }
  0xea   :  { %4111 = vmatpush1.bf16.msra.mxu0 %v12099_v52  ;;  %4234 = vmatpush1.bf16.msra.mxu1 %v12100_v53  ;;  %v12190_v52 = vld [vmem:[#allocation2 + $0xb04] ss:$52 sps:$4 sm:$0xff]  }
  0xeb   :  { %4112 = vmatprep.subr.bf16.mxu0 %v12101_v54  ;;  %4235 = vmatprep.subr.bf16.mxu1 %v12103_v55  ;;  %v12185_v53 = vld [vmem:[#allocation2 + $0xaf8] ss:$52 sps:$4 sm:$0xff]   ;;  %v12188_v54 = vld [vmem:[#allocation2 + $0xb00] ss:$52 sps:$4 sm:$0xff]  }
  0xec   :  { %v12193_v55 = vld [vmem:[#allocation2 + $0xb64] ss:$52 sps:$4 sm:$0xff]  }
  0xee   :  { %4113 = vmatpush1.bf16.msra.mxu0 %v12105_v56  ;;  %4236 = vmatpush1.bf16.msra.mxu1 %v12106_v57  ;;  %v12196_v56 = vld [vmem:[#allocation2 + $0xb6c] ss:$52 sps:$4 sm:$0xff]  }
  0xef   :  { %4114 = vmatprep.subr.bf16.mxu0 %v12107_v58  ;;  %4237 = vmatprep.subr.bf16.mxu1 %v12109_v59  ;;  %v12191_v57 = vld [vmem:[#allocation2 + $0xb60] ss:$52 sps:$4 sm:$0xff]   ;;  %v12194_v58 = vld [vmem:[#allocation2 + $0xb68] ss:$52 sps:$4 sm:$0xff]  }
  0xf0   :  { %v12199_v59 = vld [vmem:[#allocation2 + $0xbcc] ss:$52 sps:$4 sm:$0xff]  }
  0xf2   :  { %4115 = vmatpush1.bf16.msra.mxu0 %v12111_v60  ;;  %4238 = vmatpush1.bf16.msra.mxu1 %v12112_v61  ;;  %v12202_v60 = vld [vmem:[#allocation2 + $0xbd4] ss:$52 sps:$4 sm:$0xff]  }
  0xf3   :  { %4116 = vmatprep.subr.bf16.mxu0 %v12113_v62  ;;  %4239 = vmatprep.subr.bf16.mxu1 %v12115_v63  ;;  %v12197_v61 = vld [vmem:[#allocation2 + $0xbc8] ss:$52 sps:$4 sm:$0xff]   ;;  %v12200_v62 = vld [vmem:[#allocation2 + $0xbd0] ss:$52 sps:$4 sm:$0xff]  }
  0xf4   :  { %v12205_v63 = vld [vmem:[#allocation2 + $0xc34] ss:$52 sps:$4 sm:$0xff]  }
  0xf6   :  { %4117 = vmatpush1.bf16.msra.mxu0 %v12117_v0  ;;  %4240 = vmatpush1.bf16.msra.mxu1 %v12118_v1  ;;  %v12208_v0 = vld [vmem:[#allocation2 + $0xc3c] ss:$52 sps:$4 sm:$0xff]  }
  0xf7   :  { %4127 = vmatprep.subr.bf16.mxu0 %v12121_v3  ;;  %4250 = vmatprep.subr.bf16.mxu1 %v12124_v4  ;;  %v12203_v1 = vld [vmem:[#allocation2 + $0xc30] ss:$52 sps:$4 sm:$0xff]  }
  0xf8   :  { %v12211_v3 = vld [vmem:[#allocation2 + $0xc9c] ss:$52 sps:$4 sm:$0xff]   ;;  %v12214_v4 = vld [vmem:[#allocation2 + $0xca4] ss:$52 sps:$4 sm:$0xff]  }
  0xf9   :  { %4119 = vmatmul.mubr.bf16.vlgmr.msra.gmra.mrb[0].mxu0 %v14233_v5  ;;  %4242 = vmatmul.mubr.bf16.vlgmr.msra.gmra.mrb[0].mxu1 %v14233_v5 }
  0xfa   :  { %4128 = vmatpush1.bf16.msra.mxu0 %v12119_v6  ;;  %4251 = vmatpush1.bf16.msra.mxu1 %v12122_v7  ;;  %v12209_v6 = vld [vmem:[#allocation2 + $0xc98] ss:$52 sps:$4 sm:$0xff]   ;;  %v12212_v7 = vld [vmem:[#allocation2 + $0xca0] ss:$52 sps:$4 sm:$0xff]  }
  0xfb   :  { %4129 = vmatprep.subr.bf16.mxu0 %v12127_v8  ;;  %4252 = vmatprep.subr.bf16.mxu1 %v12130_v9  ;;  %v12217_v8 = vld [vmem:[#allocation2 + $0xd04] ss:$52 sps:$4 sm:$0xff]   ;;  %v167_v9 = vld [vmem:[%s14494_s0 + $0x10] sm:$0xff] }
  0xfc   :  { %4159 = vmatprep.mubr.bf16.mxu0 %v14240_v32  ;;  %4282 = vmatprep.mubr.bf16.mxu1 %v14240_v32 }
  0xfe   :  { %4130 = vmatpush1.bf16.msra.mxu0 %v12125_v10  ;;  %4253 = vmatpush1.bf16.msra.mxu1 %v12128_v11  ;;  %v12220_v10 = vld [vmem:[#allocation2 + $0xd0c] ss:$52 sps:$4 sm:$0xff]  }
  0xff   :  { %4131 = vmatprep.subr.bf16.mxu0 %v12133_v12  ;;  %4254 = vmatprep.subr.bf16.mxu1 %v12136_v13  ;;  %v12215_v11 = vld [vmem:[#allocation2 + $0xd00] ss:$52 sps:$4 sm:$0xff]   ;;  %v14247_v12 = vpack.c.bf16 %v167_v9, %v167_v9  ;;  %v12218_v13 = vld [vmem:[#allocation2 + $0xd08] ss:$52 sps:$4 sm:$0xff]   ;;  %v12299_v9 = vld [vmem:[#allocation2 + $0x12b0] ss:$52 sps:$4 sm:$0xff]  }
 0x102   :  { %4132 = vmatpush1.bf16.msra.mxu0 %v12131_v14  ;;  %4255 = vmatpush1.bf16.msra.mxu1 %v12134_v15  ;;  %v12223_v14 = vld [vmem:[#allocation2 + $0xd6c] ss:$52 sps:$4 sm:$0xff]   ;;  %v12226_v15 = vld [vmem:[#allocation2 + $0xd74] ss:$52 sps:$4 sm:$0xff]  }
 0x103   :  { %4133 = vmatprep.subr.bf16.mxu0 %v12139_v16  ;;  %4256 = vmatprep.subr.bf16.mxu1 %v12142_v17  ;;  %v170_v16 = vld [vmem:[%s14494_s0 + $0x28] sm:$0xff] }
 0x104   :  { %v14252_v17 = vpack.c.bf16 %v170_v16, %v170_v16  ;;  %v169_v16 = vld [vmem:[%s14494_s0 + $0x20] sm:$0xff] }
 0x106   :  { %4134 = vmatpush1.bf16.msra.mxu0 %v12137_v18  ;;  %4257 = vmatpush1.bf16.msra.mxu1 %v12140_v19  ;;  %v12221_v18 = vld [vmem:[#allocation2 + $0xd68] ss:$52 sps:$4 sm:$0xff]   ;;  %v12224_v19 = vld [vmem:[#allocation2 + $0xd70] ss:$52 sps:$4 sm:$0xff]  }
 0x107   :  { %4135 = vmatprep.subr.bf16.mxu0 %v12145_v20  ;;  %4258 = vmatprep.subr.bf16.mxu1 %v12148_v21  ;;  %v12229_v20 = vld [vmem:[#allocation2 + $0xdd4] ss:$52 sps:$4 sm:$0xff]   ;;  %v12232_v21 = vld [vmem:[#allocation2 + $0xddc] ss:$52 sps:$4 sm:$0xff]  }
 0x10a   :  { %4136 = vmatpush1.bf16.msra.mxu0 %v12143_v22  ;;  %4259 = vmatpush1.bf16.msra.mxu1 %v12146_v23  ;;  %v12227_v22 = vld [vmem:[#allocation2 + $0xdd0] ss:$52 sps:$4 sm:$0xff]   ;;  %v12230_v23 = vld [vmem:[#allocation2 + $0xdd8] ss:$52 sps:$4 sm:$0xff]  }
 0x10b   :  { %4137 = vmatprep.subr.bf16.mxu0 %v12151_v24  ;;  %4260 = vmatprep.subr.bf16.mxu1 %v12154_v25  ;;  %v12235_v24 = vld [vmem:[#allocation2 + $0xe3c] ss:$52 sps:$4 sm:$0xff]   ;;  %v12238_v25 = vld [vmem:[#allocation2 + $0xe44] ss:$52 sps:$4 sm:$0xff]  }
 0x10e   :  { %4138 = vmatpush1.bf16.msra.mxu0 %v12149_v26  ;;  %4261 = vmatpush1.bf16.msra.mxu1 %v12152_v27  ;;  %v12233_v26 = vld [vmem:[#allocation2 + $0xe38] ss:$52 sps:$4 sm:$0xff]   ;;  %v12236_v27 = vld [vmem:[#allocation2 + $0xe40] ss:$52 sps:$4 sm:$0xff]  }
 0x10f   :  { %4139 = vmatprep.subr.bf16.mxu0 %v12157_v28  ;;  %4262 = vmatprep.subr.bf16.mxu1 %v12160_v29  ;;  %v12241_v28 = vld [vmem:[#allocation2 + $0xea4] ss:$52 sps:$4 sm:$0xff]   ;;  %v12244_v29 = vld [vmem:[#allocation2 + $0xeac] ss:$52 sps:$4 sm:$0xff]  }
 0x112   :  { %4140 = vmatpush1.bf16.msra.mxu0 %v12155_v31  ;;  %4263 = vmatpush1.bf16.msra.mxu1 %v12158_v33  ;;  %v12242_v31 = vld [vmem:[#allocation2 + $0xea8] ss:$52 sps:$4 sm:$0xff]   ;;  %v12247_v33 = vld [vmem:[#allocation2 + $0xf0c] ss:$52 sps:$4 sm:$0xff]  }
 0x113   :  { %4141 = vmatprep.subr.bf16.mxu0 %v12163_v34  ;;  %4264 = vmatprep.subr.bf16.mxu1 %v12166_v35  ;;  %v12250_v34 = vld [vmem:[#allocation2 + $0xf14] ss:$52 sps:$4 sm:$0xff]  }
 0x114   :  { %v12245_v35 = vld [vmem:[#allocation2 + $0xf08] ss:$52 sps:$4 sm:$0xff]  }
 0x116   :  { %4142 = vmatpush1.bf16.msra.mxu0 %v12161_v36  ;;  %4265 = vmatpush1.bf16.msra.mxu1 %v12164_v37  ;;  %v12248_v36 = vld [vmem:[#allocation2 + $0xf10] ss:$52 sps:$4 sm:$0xff]   ;;  %v12253_v37 = vld [vmem:[#allocation2 + $0xf74] ss:$52 sps:$4 sm:$0xff]  }
 0x117   :  { %4143 = vmatprep.subr.bf16.mxu0 %v12169_v38  ;;  %4266 = vmatprep.subr.bf16.mxu1 %v12172_v39  ;;  %v12256_v38 = vld [vmem:[#allocation2 + $0xf7c] ss:$52 sps:$4 sm:$0xff]  }
 0x118   :  { %v12251_v39 = vld [vmem:[#allocation2 + $0xf70] ss:$52 sps:$4 sm:$0xff]  }
 0x11a   :  { %4144 = vmatpush1.bf16.msra.mxu0 %v12167_v40  ;;  %4267 = vmatpush1.bf16.msra.mxu1 %v12170_v41  ;;  %v12254_v40 = vld [vmem:[#allocation2 + $0xf78] ss:$52 sps:$4 sm:$0xff]   ;;  %v12259_v41 = vld [vmem:[#allocation2 + $0xfdc] ss:$52 sps:$4 sm:$0xff]  }
 0x11b   :  { %4145 = vmatprep.subr.bf16.mxu0 %v12175_v42  ;;  %4268 = vmatprep.subr.bf16.mxu1 %v12178_v43  ;;  %v12262_v42 = vld [vmem:[#allocation2 + $0xfe4] ss:$52 sps:$4 sm:$0xff]  }
 0x11c   :  { %v12257_v43 = vld [vmem:[#allocation2 + $0xfd8] ss:$52 sps:$4 sm:$0xff]  }
 0x11e   :  { %4146 = vmatpush1.bf16.msra.mxu0 %v12173_v44  ;;  %4269 = vmatpush1.bf16.msra.mxu1 %v12176_v45  ;;  %v12260_v44 = vld [vmem:[#allocation2 + $0xfe0] ss:$52 sps:$4 sm:$0xff]   ;;  %v12265_v45 = vld [vmem:[#allocation2 + $0x1044] ss:$52 sps:$4 sm:$0xff]  }
 0x11f   :  { %4147 = vmatprep.subr.bf16.mxu0 %v12181_v46  ;;  %4270 = vmatprep.subr.bf16.mxu1 %v12184_v47  ;;  %v12268_v46 = vld [vmem:[#allocation2 + $0x104c] ss:$52 sps:$4 sm:$0xff]  }
 0x120   :  { %v12263_v47 = vld [vmem:[#allocation2 + $0x1040] ss:$52 sps:$4 sm:$0xff]  }
 0x122   :  { %4148 = vmatpush1.bf16.msra.mxu0 %v12179_v49  ;;  %4271 = vmatpush1.bf16.msra.mxu1 %v12182_v50  ;;  %v12266_v49 = vld [vmem:[#allocation2 + $0x1048] ss:$52 sps:$4 sm:$0xff]   ;;  %v12271_v50 = vld [vmem:[#allocation2 + $0x10ac] ss:$52 sps:$4 sm:$0xff]  }
 0x123   :  { %4149 = vmatprep.subr.bf16.mxu0 %v12187_v51  ;;  %4272 = vmatprep.subr.bf16.mxu1 %v12190_v52  ;;  %v12274_v51 = vld [vmem:[#allocation2 + $0x10b4] ss:$52 sps:$4 sm:$0xff]  }
 0x124   :  { %v12269_v52 = vld [vmem:[#allocation2 + $0x10a8] ss:$52 sps:$4 sm:$0xff]  }
 0x126   :  { %4150 = vmatpush1.bf16.msra.mxu0 %v12185_v53  ;;  %4273 = vmatpush1.bf16.msra.mxu1 %v12188_v54  ;;  %v12272_v53 = vld [vmem:[#allocation2 + $0x10b0] ss:$52 sps:$4 sm:$0xff]   ;;  %v12277_v54 = vld [vmem:[#allocation2 + $0x1114] ss:$52 sps:$4 sm:$0xff]  }
 0x127   :  { %4151 = vmatprep.subr.bf16.mxu0 %v12193_v55  ;;  %4274 = vmatprep.subr.bf16.mxu1 %v12196_v56  ;;  %v12280_v55 = vld [vmem:[#allocation2 + $0x111c] ss:$52 sps:$4 sm:$0xff]  }
 0x128   :  { %v12275_v56 = vld [vmem:[#allocation2 + $0x1110] ss:$52 sps:$4 sm:$0xff]  }
 0x12a   :  { %4152 = vmatpush1.bf16.msra.mxu0 %v12191_v57  ;;  %4275 = vmatpush1.bf16.msra.mxu1 %v12194_v58  ;;  %v12278_v57 = vld [vmem:[#allocation2 + $0x1118] ss:$52 sps:$4 sm:$0xff]   ;;  %v12283_v58 = vld [vmem:[#allocation2 + $0x117c] ss:$52 sps:$4 sm:$0xff]  }
 0x12b   :  { %4153 = vmatprep.subr.bf16.mxu0 %v12199_v59  ;;  %4276 = vmatprep.subr.bf16.mxu1 %v12202_v60  ;;  %v12286_v59 = vld [vmem:[#allocation2 + $0x1184] ss:$52 sps:$4 sm:$0xff]  }
 0x12c   :  { %v12281_v60 = vld [vmem:[#allocation2 + $0x1178] ss:$52 sps:$4 sm:$0xff]  }
 0x12e   :  { %4154 = vmatpush1.bf16.msra.mxu0 %v12197_v61  ;;  %4277 = vmatpush1.bf16.msra.mxu1 %v12200_v62  ;;  %v12284_v61 = vld [vmem:[#allocation2 + $0x1180] ss:$52 sps:$4 sm:$0xff]   ;;  %v12289_v62 = vld [vmem:[#allocation2 + $0x11e4] ss:$52 sps:$4 sm:$0xff]  }
 0x12f   :  { %4155 = vmatprep.subr.bf16.mxu0 %v12205_v63  ;;  %4278 = vmatprep.subr.bf16.mxu1 %v12208_v0  ;;  %v12292_v63 = vld [vmem:[#allocation2 + $0x11ec] ss:$52 sps:$4 sm:$0xff]  }
 0x130   :  { %v12287_v0 = vld [vmem:[#allocation2 + $0x11e0] ss:$52 sps:$4 sm:$0xff]  }
 0x132   :  { %4156 = vmatpush1.bf16.msra.mxu0 %v12203_v1  ;;  %4279 = vmatpush1.bf16.msra.mxu1 %v12206_v2  ;;  %v12290_v1 = vld [vmem:[#allocation2 + $0x11e8] ss:$52 sps:$4 sm:$0xff]   ;;  %v12295_v2 = vld [vmem:[#allocation2 + $0x124c] ss:$52 sps:$4 sm:$0xff]  }
 0x133   :  { %4157 = vmatprep.subr.bf16.mxu0 %v12211_v3  ;;  %4280 = vmatprep.subr.bf16.mxu1 %v12214_v4  ;;  %v12298_v3 = vld [vmem:[#allocation2 + $0x1254] ss:$52 sps:$4 sm:$0xff]  }
 0x134   :  { %v12293_v4 = vld [vmem:[#allocation2 + $0x1248] ss:$52 sps:$4 sm:$0xff]  }
 0x136   :  { %4158 = vmatpush1.bf16.msra.mxu0 %v12209_v6  ;;  %4281 = vmatpush1.bf16.msra.mxu1 %v12212_v7  ;;  %v12296_v6 = vld [vmem:[#allocation2 + $0x1250] ss:$52 sps:$4 sm:$0xff]   ;;  %v12301_v7 = vld [vmem:[#allocation2 + $0x12b4] ss:$52 sps:$4 sm:$0xff]  }
 0x137   :  { %4168 = vmatprep.subr.bf16.mxu0 %v12217_v8  ;;  %4291 = vmatprep.subr.bf16.mxu1 %v12220_v10  ;;  %v12304_v8 = vld [vmem:[#allocation2 + $0x12bc] ss:$52 sps:$4 sm:$0xff]   ;;  %v12302_v10 = vld [vmem:[#allocation2 + $0x12b8] ss:$52 sps:$4 sm:$0xff]  }
 0x139   :  { %4160 = vmatmul.mubr.bf16.vlgmr.msra.gmra.mrb[0].mxu0 %v14247_v12  ;;  %4283 = vmatmul.mubr.bf16.vlgmr.msra.gmra.mrb[0].mxu1 %v14247_v12 }
 0x13a   :  { %4169 = vmatpush1.bf16.msra.mxu0 %v12215_v11  ;;  %4292 = vmatpush1.bf16.msra.mxu1 %v12218_v13  ;;  %v12307_v11 = vld [vmem:[#allocation2 + $0x131c] ss:$52 sps:$4 sm:$0xff]   ;;  %v12310_v13 = vld [vmem:[#allocation2 + $0x1324] ss:$52 sps:$4 sm:$0xff]  }
 0x13b   :  { %4170 = vmatprep.subr.bf16.mxu0 %v12223_v14  ;;  %4293 = vmatprep.subr.bf16.mxu1 %v12226_v15  ;;  %v12305_v14 = vld [vmem:[#allocation2 + $0x1318] ss:$52 sps:$4 sm:$0xff]   ;;  %v12308_v15 = vld [vmem:[#allocation2 + $0x1320] ss:$52 sps:$4 sm:$0xff]  }
 0x13c   :  { %4200 = vmatprep.mubr.bf16.mxu0 %v14252_v17  ;;  %4323 = vmatprep.mubr.bf16.mxu1 %v14252_v17 }
 0x13e   :  { %4171 = vmatpush1.bf16.msra.mxu0 %v12221_v18  ;;  %4294 = vmatpush1.bf16.msra.mxu1 %v12224_v19  ;;  %v12313_v18 = vld [vmem:[#allocation2 + $0x14] ss:$52 sps:$4 sm:$0xff]   ;;  %v12316_v19 = vld [vmem:[#allocation2 + $0x1c] ss:$52 sps:$4 sm:$0xff]  }
 0x13f   :  { %4172 = vmatprep.subr.bf16.mxu0 %v12229_v20  ;;  %4295 = vmatprep.subr.bf16.mxu1 %v12232_v21  ;;  %v14261_v20 = vpack.c.bf16 %v169_v16, %v169_v16  ;;  %v12311_v21 = vld [vmem:[#allocation2 + $0x10] ss:$52 sps:$4 sm:$0xff]   ;;  %v12400_v16 = vld [vmem:[#allocation2 + $0x5cc] ss:$52 sps:$4 sm:$0xff]  }
 0x142   :  { %4173 = vmatpush1.bf16.msra.mxu0 %v12227_v22  ;;  %4296 = vmatpush1.bf16.msra.mxu1 %v12230_v23  ;;  %v12314_v22 = vld [vmem:[#allocation2 + $0x18] ss:$52 sps:$4 sm:$0xff]   ;;  %v12319_v23 = vld [vmem:[#allocation2 + $0x7c] ss:$52 sps:$4 sm:$0xff]  }
 0x143   :  { %4174 = vmatprep.subr.bf16.mxu0 %v12235_v24  ;;  %4297 = vmatprep.subr.bf16.mxu1 %v12238_v25  ;;  %v12322_v24 = vld [vmem:[#allocation2 + $0x84] ss:$52 sps:$4 sm:$0xff]  }
 0x144   :  { %v12317_v25 = vld [vmem:[#allocation2 + $0x78] ss:$52 sps:$4 sm:$0xff]  }
 0x146   :  { %4175 = vmatpush1.bf16.msra.mxu0 %v12233_v26  ;;  %4298 = vmatpush1.bf16.msra.mxu1 %v12236_v27  ;;  %v12320_v26 = vld [vmem:[#allocation2 + $0x80] ss:$52 sps:$4 sm:$0xff]   ;;  %v12325_v27 = vld [vmem:[#allocation2 + $0xe4] ss:$52 sps:$4 sm:$0xff]  }
 0x147   :  { %4176 = vmatprep.subr.bf16.mxu0 %v12241_v28  ;;  %4299 = vmatprep.subr.bf16.mxu1 %v12244_v29  ;;  %v12328_v28 = vld [vmem:[#allocation2 + $0xec] ss:$52 sps:$4 sm:$0xff]  }
 0x148   :  { %v12323_v29 = vld [vmem:[#allocation2 + $0xe0] ss:$52 sps:$4 sm:$0xff]  }
 0x14a   :  { %4177 = vmatpush1.bf16.msra.mxu0 %v12239_v30  ;;  %4300 = vmatpush1.bf16.msra.mxu1 %v12242_v31  ;;  %v12326_v30 = vld [vmem:[#allocation2 + $0xe8] ss:$52 sps:$4 sm:$0xff]   ;;  %v12331_v31 = vld [vmem:[#allocation2 + $0x14c] ss:$52 sps:$4 sm:$0xff]  }
 0x14b   :  { %4178 = vmatprep.subr.bf16.mxu0 %v12247_v33  ;;  %4301 = vmatprep.subr.bf16.mxu1 %v12250_v34  ;;  %v12334_v33 = vld [vmem:[#allocation2 + $0x154] ss:$52 sps:$4 sm:$0xff]  }
 0x14c   :  { %v12329_v34 = vld [vmem:[#allocation2 + $0x148] ss:$52 sps:$4 sm:$0xff]  }
 0x14e   :  { %4179 = vmatpush1.bf16.msra.mxu0 %v12245_v35  ;;  %4302 = vmatpush1.bf16.msra.mxu1 %v12248_v36  ;;  %v12332_v35 = vld [vmem:[#allocation2 + $0x150] ss:$52 sps:$4 sm:$0xff]   ;;  %v12337_v36 = vld [vmem:[#allocation2 + $0x1b4] ss:$52 sps:$4 sm:$0xff]  }
 0x14f   :  { %4180 = vmatprep.subr.bf16.mxu0 %v12253_v37  ;;  %4303 = vmatprep.subr.bf16.mxu1 %v12256_v38  ;;  %v12340_v37 = vld [vmem:[#allocation2 + $0x1bc] ss:$52 sps:$4 sm:$0xff]  }
 0x150   :  { %v12335_v38 = vld [vmem:[#allocation2 + $0x1b0] ss:$52 sps:$4 sm:$0xff]  }
 0x152   :  { %4181 = vmatpush1.bf16.msra.mxu0 %v12251_v39  ;;  %4304 = vmatpush1.bf16.msra.mxu1 %v12254_v40  ;;  %v12338_v39 = vld [vmem:[#allocation2 + $0x1b8] ss:$52 sps:$4 sm:$0xff]   ;;  %v12343_v40 = vld [vmem:[#allocation2 + $0x21c] ss:$52 sps:$4 sm:$0xff]  }
 0x153   :  { %4182 = vmatprep.subr.bf16.mxu0 %v12259_v41  ;;  %4305 = vmatprep.subr.bf16.mxu1 %v12262_v42  ;;  %v12346_v41 = vld [vmem:[#allocation2 + $0x224] ss:$52 sps:$4 sm:$0xff]  }
 0x154   :  { %v12341_v42 = vld [vmem:[#allocation2 + $0x218] ss:$52 sps:$4 sm:$0xff]  }
 0x156   :  { %4183 = vmatpush1.bf16.msra.mxu0 %v12257_v43  ;;  %4306 = vmatpush1.bf16.msra.mxu1 %v12260_v44  ;;  %v12344_v43 = vld [vmem:[#allocation2 + $0x220] ss:$52 sps:$4 sm:$0xff]   ;;  %v12349_v44 = vld [vmem:[#allocation2 + $0x284] ss:$52 sps:$4 sm:$0xff]  }
 0x157   :  { %4184 = vmatprep.subr.bf16.mxu0 %v12265_v45  ;;  %4307 = vmatprep.subr.bf16.mxu1 %v12268_v46  ;;  %v12352_v45 = vld [vmem:[#allocation2 + $0x28c] ss:$52 sps:$4 sm:$0xff]  }
 0x158   :  { %v12347_v46 = vld [vmem:[#allocation2 + $0x280] ss:$52 sps:$4 sm:$0xff]  }
 0x15a   :  { %4185 = vmatpush1.bf16.msra.mxu0 %v12263_v47  ;;  %4308 = vmatpush1.bf16.msra.mxu1 %v12266_v49  ;;  %v12350_v47 = vld [vmem:[#allocation2 + $0x288] ss:$52 sps:$4 sm:$0xff]   ;;  %v12355_v49 = vld [vmem:[#allocation2 + $0x2ec] ss:$52 sps:$4 sm:$0xff]  }
 0x15b   :  { %4186 = vmatprep.subr.bf16.mxu0 %v12271_v50  ;;  %4309 = vmatprep.subr.bf16.mxu1 %v12274_v51  ;;  %v12358_v50 = vld [vmem:[#allocation2 + $0x2f4] ss:$52 sps:$4 sm:$0xff]  }
 0x15c   :  { %v12353_v51 = vld [vmem:[#allocation2 + $0x2e8] ss:$52 sps:$4 sm:$0xff]  }
 0x15e   :  { %4187 = vmatpush1.bf16.msra.mxu0 %v12269_v52  ;;  %4310 = vmatpush1.bf16.msra.mxu1 %v12272_v53  ;;  %v12356_v52 = vld [vmem:[#allocation2 + $0x2f0] ss:$52 sps:$4 sm:$0xff]   ;;  %v12361_v53 = vld [vmem:[#allocation2 + $0x354] ss:$52 sps:$4 sm:$0xff]  }
 0x15f   :  { %4188 = vmatprep.subr.bf16.mxu0 %v12277_v54  ;;  %4311 = vmatprep.subr.bf16.mxu1 %v12280_v55  ;;  %v12364_v54 = vld [vmem:[#allocation2 + $0x35c] ss:$52 sps:$4 sm:$0xff]  }
 0x160   :  { %v12359_v55 = vld [vmem:[#allocation2 + $0x350] ss:$52 sps:$4 sm:$0xff]  }
 0x162   :  { %4189 = vmatpush1.bf16.msra.mxu0 %v12275_v56  ;;  %4312 = vmatpush1.bf16.msra.mxu1 %v12278_v57  ;;  %v12362_v56 = vld [vmem:[#allocation2 + $0x358] ss:$52 sps:$4 sm:$0xff]   ;;  %v12367_v57 = vld [vmem:[#allocation2 + $0x3bc] ss:$52 sps:$4 sm:$0xff]  }
 0x163   :  { %4190 = vmatprep.subr.bf16.mxu0 %v12283_v58  ;;  %4313 = vmatprep.subr.bf16.mxu1 %v12286_v59  ;;  %v12370_v58 = vld [vmem:[#allocation2 + $0x3c4] ss:$52 sps:$4 sm:$0xff]  }
 0x164   :  { %v12365_v59 = vld [vmem:[#allocation2 + $0x3b8] ss:$52 sps:$4 sm:$0xff]  }
 0x166   :  { %4191 = vmatpush1.bf16.msra.mxu0 %v12281_v60  ;;  %4314 = vmatpush1.bf16.msra.mxu1 %v12284_v61  ;;  %v12368_v60 = vld [vmem:[#allocation2 + $0x3c0] ss:$52 sps:$4 sm:$0xff]   ;;  %v12373_v61 = vld [vmem:[#allocation2 + $0x424] ss:$52 sps:$4 sm:$0xff]  }
 0x167   :  { %4192 = vmatprep.subr.bf16.mxu0 %v12289_v62  ;;  %4315 = vmatprep.subr.bf16.mxu1 %v12292_v63  ;;  %v12376_v62 = vld [vmem:[#allocation2 + $0x42c] ss:$52 sps:$4 sm:$0xff]  }
 0x168   :  { %v12371_v63 = vld [vmem:[#allocation2 + $0x420] ss:$52 sps:$4 sm:$0xff]  }
 0x16a   :  { %4193 = vmatpush1.bf16.msra.mxu0 %v12287_v0  ;;  %4316 = vmatpush1.bf16.msra.mxu1 %v12290_v1  ;;  %v12374_v0 = vld [vmem:[#allocation2 + $0x428] ss:$52 sps:$4 sm:$0xff]   ;;  %v12379_v1 = vld [vmem:[#allocation2 + $0x48c] ss:$52 sps:$4 sm:$0xff]  }
 0x16b   :  { %4194 = vmatprep.subr.bf16.mxu0 %v12295_v2  ;;  %4317 = vmatprep.subr.bf16.mxu1 %v12298_v3  ;;  %v12382_v2 = vld [vmem:[#allocation2 + $0x494] ss:$52 sps:$4 sm:$0xff]  }
 0x16c   :  { %v12377_v3 = vld [vmem:[#allocation2 + $0x488] ss:$52 sps:$4 sm:$0xff]  }
 0x16e   :  { %4195 = vmatpush1.bf16.msra.mxu0 %v12293_v4  ;;  %4318 = vmatpush1.bf16.msra.mxu1 %v12296_v6  ;;  %v12380_v4 = vld [vmem:[#allocation2 + $0x490] ss:$52 sps:$4 sm:$0xff]   ;;  %v12385_v6 = vld [vmem:[#allocation2 + $0x4f4] ss:$52 sps:$4 sm:$0xff]  }
 0x16f   :  { %4196 = vmatprep.subr.bf16.mxu0 %v12301_v7  ;;  %4319 = vmatprep.subr.bf16.mxu1 %v12304_v8  ;;  %v12388_v7 = vld [vmem:[#allocation2 + $0x4fc] ss:$52 sps:$4 sm:$0xff]  }
 0x170   :  { %v12383_v8 = vld [vmem:[#allocation2 + $0x4f0] ss:$52 sps:$4 sm:$0xff]  }
 0x172   :  { %4197 = vmatpush1.bf16.msra.mxu0 %v12299_v9  ;;  %4320 = vmatpush1.bf16.msra.mxu1 %v12302_v10  ;;  %v12386_v9 = vld [vmem:[#allocation2 + $0x4f8] ss:$52 sps:$4 sm:$0xff]   ;;  %v12391_v10 = vld [vmem:[#allocation2 + $0x55c] ss:$52 sps:$4 sm:$0xff]  }
 0x173   :  { %4198 = vmatprep.subr.bf16.mxu0 %v12307_v11  ;;  %4321 = vmatprep.subr.bf16.mxu1 %v12310_v13  ;;  %v12394_v11 = vld [vmem:[#allocation2 + $0x564] ss:$52 sps:$4 sm:$0xff]  }
 0x174   :  { %v12389_v13 = vld [vmem:[#allocation2 + $0x558] ss:$52 sps:$4 sm:$0xff]  }
 0x176   :  { %4199 = vmatpush1.bf16.msra.mxu0 %v12305_v14  ;;  %4322 = vmatpush1.bf16.msra.mxu1 %v12308_v15  ;;  %v12392_v14 = vld [vmem:[#allocation2 + $0x560] ss:$52 sps:$4 sm:$0xff]   ;;  %v12397_v15 = vld [vmem:[#allocation2 + $0x5c4] ss:$52 sps:$4 sm:$0xff]  }
 0x177   :  { %4332 = vmatprep.subr.bf16.mxu0 %v12313_v18  ;;  %4455 = vmatprep.subr.bf16.mxu1 %v12316_v19  ;;  %v12395_v18 = vld [vmem:[#allocation2 + $0x5c0] ss:$52 sps:$4 sm:$0xff]   ;;  %v12398_v19 = vld [vmem:[#allocation2 + $0x5c8] ss:$52 sps:$4 sm:$0xff]  }
 0x179   :  { %4201 = vmatmul.mubr.bf16.vlgmr.msra.gmra.mrb[0].mxu0 %v14261_v20  ;;  %4324 = vmatmul.mubr.bf16.vlgmr.msra.gmra.mrb[0].mxu1 %v14261_v20 }
 0x17a   :  { %4333 = vmatpush1.bf16.msra.mxu0 %v12311_v21  ;;  %4456 = vmatpush1.bf16.msra.mxu1 %v12314_v22  ;;  %v12403_v21 = vld [vmem:[#allocation2 + $0x62c] ss:$52 sps:$4 sm:$0xff]   ;;  %v12406_v22 = vld [vmem:[#allocation2 + $0x634] ss:$52 sps:$4 sm:$0xff]  }
 0x17b   :  { %4334 = vmatprep.subr.bf16.mxu0 %v12319_v23  ;;  %4457 = vmatprep.subr.bf16.mxu1 %v12322_v24  ;;  %v12401_v23 = vld [vmem:[#allocation2 + $0x628] ss:$52 sps:$4 sm:$0xff]   ;;  %v12404_v24 = vld [vmem:[#allocation2 + $0x630] ss:$52 sps:$4 sm:$0xff]  }
 0x17c   :  { %4364 = vmatprep.mubr.bf16.mxu0 %v14226_v48  ;;  %4487 = vmatprep.mubr.bf16.mxu1 %v14226_v48 }
 0x17e   :  { %4335 = vmatpush1.bf16.msra.mxu0 %v12317_v25  ;;  %4458 = vmatpush1.bf16.msra.mxu1 %v12320_v26  ;;  %v12409_v25 = vld [vmem:[#allocation2 + $0x694] ss:$52 sps:$4 sm:$0xff]   ;;  %v12412_v26 = vld [vmem:[#allocation2 + $0x69c] ss:$52 sps:$4 sm:$0xff]  }
 0x17f   :  { %4336 = vmatprep.subr.bf16.mxu0 %v12325_v27  ;;  %4459 = vmatprep.subr.bf16.mxu1 %v12328_v28  ;;  %v12407_v27 = vld [vmem:[#allocation2 + $0x690] ss:$52 sps:$4 sm:$0xff]   ;;  %v12410_v28 = vld [vmem:[#allocation2 + $0x698] ss:$52 sps:$4 sm:$0xff]  }
 0x182   :  { %4337 = vmatpush1.bf16.msra.mxu0 %v12323_v29  ;;  %4460 = vmatpush1.bf16.msra.mxu1 %v12326_v30  ;;  %v12415_v29 = vld [vmem:[#allocation2 + $0x6fc] ss:$52 sps:$4 sm:$0xff]   ;;  %v12418_v30 = vld [vmem:[#allocation2 + $0x704] ss:$52 sps:$4 sm:$0xff]  }
 0x183   :  { %4338 = vmatprep.subr.bf16.mxu0 %v12331_v31  ;;  %4461 = vmatprep.subr.bf16.mxu1 %v12334_v33  ;;  %v12413_v31 = vld [vmem:[#allocation2 + $0x6f8] ss:$52 sps:$4 sm:$0xff]   ;;  %v12416_v33 = vld [vmem:[#allocation2 + $0x700] ss:$52 sps:$4 sm:$0xff]  }
 0x186   :  { %4339 = vmatpush1.bf16.msra.mxu0 %v12329_v34  ;;  %4462 = vmatpush1.bf16.msra.mxu1 %v12332_v35  ;;  %v12421_v34 = vld [vmem:[#allocation2 + $0x764] ss:$52 sps:$4 sm:$0xff]   ;;  %v12424_v35 = vld [vmem:[#allocation2 + $0x76c] ss:$52 sps:$4 sm:$0xff]  }
 0x187   :  { %4340 = vmatprep.subr.bf16.mxu0 %v12337_v36  ;;  %4463 = vmatprep.subr.bf16.mxu1 %v12340_v37  ;;  %v12419_v36 = vld [vmem:[#allocation2 + $0x760] ss:$52 sps:$4 sm:$0xff]   ;;  %v12422_v37 = vld [vmem:[#allocation2 + $0x768] ss:$52 sps:$4 sm:$0xff]  }
 0x18a   :  { %4341 = vmatpush1.bf16.msra.mxu0 %v12335_v38  ;;  %4464 = vmatpush1.bf16.msra.mxu1 %v12338_v39  ;;  %v12427_v38 = vld [vmem:[#allocation2 + $0x7cc] ss:$52 sps:$4 sm:$0xff]   ;;  %v12430_v39 = vld [vmem:[#allocation2 + $0x7d4] ss:$52 sps:$4 sm:$0xff]  }
 0x18b   :  { %4342 = vmatprep.subr.bf16.mxu0 %v12343_v40  ;;  %4465 = vmatprep.subr.bf16.mxu1 %v12346_v41  ;;  %v12425_v40 = vld [vmem:[#allocation2 + $0x7c8] ss:$52 sps:$4 sm:$0xff]   ;;  %v12428_v41 = vld [vmem:[#allocation2 + $0x7d0] ss:$52 sps:$4 sm:$0xff]  }
 0x18e   :  { %4343 = vmatpush1.bf16.msra.mxu0 %v12341_v42  ;;  %4466 = vmatpush1.bf16.msra.mxu1 %v12344_v43  ;;  %v12433_v42 = vld [vmem:[#allocation2 + $0x834] ss:$52 sps:$4 sm:$0xff]   ;;  %v12436_v43 = vld [vmem:[#allocation2 + $0x83c] ss:$52 sps:$4 sm:$0xff]  }
 0x18f   :  { %4344 = vmatprep.subr.bf16.mxu0 %v12349_v44  ;;  %4467 = vmatprep.subr.bf16.mxu1 %v12352_v45  ;;  %v12431_v44 = vld [vmem:[#allocation2 + $0x830] ss:$52 sps:$4 sm:$0xff]   ;;  %v12434_v45 = vld [vmem:[#allocation2 + $0x838] ss:$52 sps:$4 sm:$0xff]  }
 0x192   :  { %4345 = vmatpush1.bf16.msra.mxu0 %v12347_v46  ;;  %4468 = vmatpush1.bf16.msra.mxu1 %v12350_v47  ;;  %v12439_v46 = vld [vmem:[#allocation2 + $0x89c] ss:$52 sps:$4 sm:$0xff]   ;;  %v12442_v47 = vld [vmem:[#allocation2 + $0x8a4] ss:$52 sps:$4 sm:$0xff]  }
 0x193   :  { %4346 = vmatprep.subr.bf16.mxu0 %v12355_v49  ;;  %4469 = vmatprep.subr.bf16.mxu1 %v12358_v50  ;;  %v12437_v49 = vld [vmem:[#allocation2 + $0x898] ss:$52 sps:$4 sm:$0xff]   ;;  %v12440_v50 = vld [vmem:[#allocation2 + $0x8a0] ss:$52 sps:$4 sm:$0xff]  }
 0x196   :  { %4347 = vmatpush1.bf16.msra.mxu0 %v12353_v51  ;;  %4470 = vmatpush1.bf16.msra.mxu1 %v12356_v52  ;;  %v12445_v51 = vld [vmem:[#allocation2 + $0x904] ss:$52 sps:$4 sm:$0xff]   ;;  %v12448_v52 = vld [vmem:[#allocation2 + $0x90c] ss:$52 sps:$4 sm:$0xff]  }
 0x197   :  { %4348 = vmatprep.subr.bf16.mxu0 %v12361_v53  ;;  %4471 = vmatprep.subr.bf16.mxu1 %v12364_v54  ;;  %v12443_v53 = vld [vmem:[#allocation2 + $0x900] ss:$52 sps:$4 sm:$0xff]   ;;  %v12446_v54 = vld [vmem:[#allocation2 + $0x908] ss:$52 sps:$4 sm:$0xff]  }
 0x19a   :  { %4349 = vmatpush1.bf16.msra.mxu0 %v12359_v55  ;;  %4472 = vmatpush1.bf16.msra.mxu1 %v12362_v56  ;;  %v12451_v55 = vld [vmem:[#allocation2 + $0x96c] ss:$52 sps:$4 sm:$0xff]   ;;  %v12454_v56 = vld [vmem:[#allocation2 + $0x974] ss:$52 sps:$4 sm:$0xff]  }
 0x19b   :  { %4350 = vmatprep.subr.bf16.mxu0 %v12367_v57  ;;  %4473 = vmatprep.subr.bf16.mxu1 %v12370_v58  ;;  %v12449_v57 = vld [vmem:[#allocation2 + $0x968] ss:$52 sps:$4 sm:$0xff]   ;;  %v12452_v58 = vld [vmem:[#allocation2 + $0x970] ss:$52 sps:$4 sm:$0xff]  }
 0x19e   :  { %4351 = vmatpush1.bf16.msra.mxu0 %v12365_v59  ;;  %4474 = vmatpush1.bf16.msra.mxu1 %v12368_v60  ;;  %v12457_v59 = vld [vmem:[#allocation2 + $0x9d4] ss:$52 sps:$4 sm:$0xff]   ;;  %v12460_v60 = vld [vmem:[#allocation2 + $0x9dc] ss:$52 sps:$4 sm:$0xff]  }
 0x19f   :  { %4352 = vmatprep.subr.bf16.mxu0 %v12373_v61  ;;  %4475 = vmatprep.subr.bf16.mxu1 %v12376_v62  ;;  %v12455_v61 = vld [vmem:[#allocation2 + $0x9d0] ss:$52 sps:$4 sm:$0xff]   ;;  %v12458_v62 = vld [vmem:[#allocation2 + $0x9d8] ss:$52 sps:$4 sm:$0xff]  }
 0x1a2   :  { %4353 = vmatpush1.bf16.msra.mxu0 %v12371_v63  ;;  %4476 = vmatpush1.bf16.msra.mxu1 %v12374_v0  ;;  %v12463_v63 = vld [vmem:[#allocation2 + $0xa3c] ss:$52 sps:$4 sm:$0xff]   ;;  %v12466_v0 = vld [vmem:[#allocation2 + $0xa44] ss:$52 sps:$4 sm:$0xff]  }
 0x1a3   :  { %4354 = vmatprep.subr.bf16.mxu0 %v12379_v1  ;;  %4477 = vmatprep.subr.bf16.mxu1 %v12382_v2  ;;  %v12461_v1 = vld [vmem:[#allocation2 + $0xa38] ss:$52 sps:$4 sm:$0xff]   ;;  %v12464_v2 = vld [vmem:[#allocation2 + $0xa40] ss:$52 sps:$4 sm:$0xff]  }
 0x1a6   :  { %4355 = vmatpush1.bf16.msra.mxu0 %v12377_v3  ;;  %4478 = vmatpush1.bf16.msra.mxu1 %v12380_v4  ;;  %v12469_v3 = vld [vmem:[#allocation2 + $0xaa4] ss:$52 sps:$4 sm:$0xff]   ;;  %v12472_v4 = vld [vmem:[#allocation2 + $0xaac] ss:$52 sps:$4 sm:$0xff]  }
 0x1a7   :  { %4356 = vmatprep.subr.bf16.mxu0 %v12385_v6  ;;  %4479 = vmatprep.subr.bf16.mxu1 %v12388_v7  ;;  %v12467_v6 = vld [vmem:[#allocation2 + $0xaa0] ss:$52 sps:$4 sm:$0xff]   ;;  %v12470_v7 = vld [vmem:[#allocation2 + $0xaa8] ss:$52 sps:$4 sm:$0xff]  }
 0x1aa   :  { %4357 = vmatpush1.bf16.msra.mxu0 %v12383_v8  ;;  %4480 = vmatpush1.bf16.msra.mxu1 %v12386_v9  ;;  %v12475_v8 = vld [vmem:[#allocation2 + $0xb0c] ss:$52 sps:$4 sm:$0xff]   ;;  %v12478_v9 = vld [vmem:[#allocation2 + $0xb14] ss:$52 sps:$4 sm:$0xff]  }
 0x1ab   :  { %4358 = vmatprep.subr.bf16.mxu0 %v12391_v10  ;;  %4481 = vmatprep.subr.bf16.mxu1 %v12394_v11  ;;  %v12473_v10 = vld [vmem:[#allocation2 + $0xb08] ss:$52 sps:$4 sm:$0xff]   ;;  %v12476_v11 = vld [vmem:[#allocation2 + $0xb10] ss:$52 sps:$4 sm:$0xff]  }
 0x1ae   :  { %4359 = vmatpush1.bf16.msra.mxu0 %v12389_v13  ;;  %4482 = vmatpush1.bf16.msra.mxu1 %v12392_v14  ;;  %v12481_v13 = vld [vmem:[#allocation2 + $0xb74] ss:$52 sps:$4 sm:$0xff]   ;;  %v12484_v14 = vld [vmem:[#allocation2 + $0xb7c] ss:$52 sps:$4 sm:$0xff]  }
 0x1af   :  { %4360 = vmatprep.subr.bf16.mxu0 %v12397_v15  ;;  %4483 = vmatprep.subr.bf16.mxu1 %v12400_v16  ;;  %v12479_v15 = vld [vmem:[#allocation2 + $0xb70] ss:$52 sps:$4 sm:$0xff]   ;;  %v12482_v16 = vld [vmem:[#allocation2 + $0xb78] ss:$52 sps:$4 sm:$0xff]  }
 0x1b2   :  { %4361 = vmatpush1.bf16.msra.mxu0 %v12395_v18  ;;  %4484 = vmatpush1.bf16.msra.mxu1 %v12398_v19  ;;  %v12487_v18 = vld [vmem:[#allocation2 + $0xbdc] ss:$52 sps:$4 sm:$0xff]   ;;  %v12490_v19 = vld [vmem:[#allocation2 + $0xbe4] ss:$52 sps:$4 sm:$0xff]  }
 0x1b3   :  { %4362 = vmatprep.subr.bf16.mxu0 %v12403_v21  ;;  %4485 = vmatprep.subr.bf16.mxu1 %v12406_v22  ;;  %v12485_v21 = vld [vmem:[#allocation2 + $0xbd8] ss:$52 sps:$4 sm:$0xff]   ;;  %v12488_v22 = vld [vmem:[#allocation2 + $0xbe0] ss:$52 sps:$4 sm:$0xff]  }
 0x1b6   :  { %4363 = vmatpush1.bf16.msra.mxu0 %v12401_v23  ;;  %4486 = vmatpush1.bf16.msra.mxu1 %v12404_v24  ;;  %v12493_v23 = vld [vmem:[#allocation2 + $0xc44] ss:$52 sps:$4 sm:$0xff]   ;;  %v12496_v24 = vld [vmem:[#allocation2 + $0xc4c] ss:$52 sps:$4 sm:$0xff]  }
 0x1b7   :  { %4373 = vmatprep.subr.bf16.mxu0 %v12409_v25  ;;  %4496 = vmatprep.subr.bf16.mxu1 %v12412_v26  ;;  %v12491_v25 = vld [vmem:[#allocation2 + $0xc40] ss:$52 sps:$4 sm:$0xff]   ;;  %v12494_v26 = vld [vmem:[#allocation2 + $0xc48] ss:$52 sps:$4 sm:$0xff]  }
 0x1b9   :  { %4365 = vmatmul.mubr.bf16.vlgmr.msra.gmra.mrb[4].mxu0 %v14233_v5  ;;  %4488 = vmatmul.mubr.bf16.vlgmr.msra.gmra.mrb[4].mxu1 %v14233_v5 }
 0x1ba   :  { %4374 = vmatpush1.bf16.msra.mxu0 %v12407_v27  ;;  %4497 = vmatpush1.bf16.msra.mxu1 %v12410_v28  ;;  %v12499_v27 = vld [vmem:[#allocation2 + $0xcac] ss:$52 sps:$4 sm:$0xff]   ;;  %v12502_v28 = vld [vmem:[#allocation2 + $0xcb4] ss:$52 sps:$4 sm:$0xff]  }
 0x1bb   :  { %4375 = vmatprep.subr.bf16.mxu0 %v12415_v29  ;;  %4498 = vmatprep.subr.bf16.mxu1 %v12418_v30  ;;  %v12497_v29 = vld [vmem:[#allocation2 + $0xca8] ss:$52 sps:$4 sm:$0xff]   ;;  %v12500_v30 = vld [vmem:[#allocation2 + $0xcb0] ss:$52 sps:$4 sm:$0xff]  }
 0x1bc   :  { %4405 = vmatprep.mubr.bf16.mxu0 %v14240_v32  ;;  %4528 = vmatprep.mubr.bf16.mxu1 %v14240_v32 }
 0x1be   :  { %4376 = vmatpush1.bf16.msra.mxu0 %v12413_v31  ;;  %4499 = vmatpush1.bf16.msra.mxu1 %v12416_v33  ;;  %v12505_v31 = vld [vmem:[#allocation2 + $0xd14] ss:$52 sps:$4 sm:$0xff]   ;;  %v12508_v33 = vld [vmem:[#allocation2 + $0xd1c] ss:$52 sps:$4 sm:$0xff]  }
 0x1bf   :  { %4377 = vmatprep.subr.bf16.mxu0 %v12421_v34  ;;  %4500 = vmatprep.subr.bf16.mxu1 %v12424_v35  ;;  %v12503_v34 = vld [vmem:[#allocation2 + $0xd10] ss:$52 sps:$4 sm:$0xff]   ;;  %v12506_v35 = vld [vmem:[#allocation2 + $0xd18] ss:$52 sps:$4 sm:$0xff]  }
 0x1c2   :  { %4378 = vmatpush1.bf16.msra.mxu0 %v12419_v36  ;;  %4501 = vmatpush1.bf16.msra.mxu1 %v12422_v37  ;;  %v12511_v36 = vld [vmem:[#allocation2 + $0xd7c] ss:$52 sps:$4 sm:$0xff]   ;;  %v12514_v37 = vld [vmem:[#allocation2 + $0xd84] ss:$52 sps:$4 sm:$0xff]  }
 0x1c3   :  { %4379 = vmatprep.subr.bf16.mxu0 %v12427_v38  ;;  %4502 = vmatprep.subr.bf16.mxu1 %v12430_v39  ;;  %v12509_v38 = vld [vmem:[#allocation2 + $0xd78] ss:$52 sps:$4 sm:$0xff]   ;;  %v12512_v39 = vld [vmem:[#allocation2 + $0xd80] ss:$52 sps:$4 sm:$0xff]  }
 0x1c6   :  { %4380 = vmatpush1.bf16.msra.mxu0 %v12425_v40  ;;  %4503 = vmatpush1.bf16.msra.mxu1 %v12428_v41  ;;  %v12517_v40 = vld [vmem:[#allocation2 + $0xde4] ss:$52 sps:$4 sm:$0xff]   ;;  %v12520_v41 = vld [vmem:[#allocation2 + $0xdec] ss:$52 sps:$4 sm:$0xff]  }
 0x1c7   :  { %4381 = vmatprep.subr.bf16.mxu0 %v12433_v42  ;;  %4504 = vmatprep.subr.bf16.mxu1 %v12436_v43  ;;  %v12515_v42 = vld [vmem:[#allocation2 + $0xde0] ss:$52 sps:$4 sm:$0xff]   ;;  %v12518_v43 = vld [vmem:[#allocation2 + $0xde8] ss:$52 sps:$4 sm:$0xff]  }
 0x1ca   :  { %4382 = vmatpush1.bf16.msra.mxu0 %v12431_v44  ;;  %4505 = vmatpush1.bf16.msra.mxu1 %v12434_v45  ;;  %v12523_v44 = vld [vmem:[#allocation2 + $0xe4c] ss:$52 sps:$4 sm:$0xff]   ;;  %v12526_v45 = vld [vmem:[#allocation2 + $0xe54] ss:$52 sps:$4 sm:$0xff]  }
 0x1cb   :  { %4383 = vmatprep.subr.bf16.mxu0 %v12439_v46  ;;  %4506 = vmatprep.subr.bf16.mxu1 %v12442_v47  ;;  %v12521_v46 = vld [vmem:[#allocation2 + $0xe48] ss:$52 sps:$4 sm:$0xff]   ;;  %v12524_v47 = vld [vmem:[#allocation2 + $0xe50] ss:$52 sps:$4 sm:$0xff]  }
 0x1ce   :  { %4384 = vmatpush1.bf16.msra.mxu0 %v12437_v49  ;;  %4507 = vmatpush1.bf16.msra.mxu1 %v12440_v50  ;;  %v12529_v49 = vld [vmem:[#allocation2 + $0xeb4] ss:$52 sps:$4 sm:$0xff]   ;;  %v12532_v50 = vld [vmem:[#allocation2 + $0xebc] ss:$52 sps:$4 sm:$0xff]  }
 0x1cf   :  { %4385 = vmatprep.subr.bf16.mxu0 %v12445_v51  ;;  %4508 = vmatprep.subr.bf16.mxu1 %v12448_v52  ;;  %v12527_v51 = vld [vmem:[#allocation2 + $0xeb0] ss:$52 sps:$4 sm:$0xff]   ;;  %v12530_v52 = vld [vmem:[#allocation2 + $0xeb8] ss:$52 sps:$4 sm:$0xff]  }
 0x1d2   :  { %4386 = vmatpush1.bf16.msra.mxu0 %v12443_v53  ;;  %4509 = vmatpush1.bf16.msra.mxu1 %v12446_v54  ;;  %v12535_v53 = vld [vmem:[#allocation2 + $0xf1c] ss:$52 sps:$4 sm:$0xff]   ;;  %v12538_v54 = vld [vmem:[#allocation2 + $0xf24] ss:$52 sps:$4 sm:$0xff]  }
 0x1d3   :  { %4387 = vmatprep.subr.bf16.mxu0 %v12451_v55  ;;  %4510 = vmatprep.subr.bf16.mxu1 %v12454_v56  ;;  %v12533_v55 = vld [vmem:[#allocation2 + $0xf18] ss:$52 sps:$4 sm:$0xff]   ;;  %v12536_v56 = vld [vmem:[#allocation2 + $0xf20] ss:$52 sps:$4 sm:$0xff]  }
 0x1d6   :  { %4388 = vmatpush1.bf16.msra.mxu0 %v12449_v57  ;;  %4511 = vmatpush1.bf16.msra.mxu1 %v12452_v58  ;;  %v12541_v57 = vld [vmem:[#allocation2 + $0xf84] ss:$52 sps:$4 sm:$0xff]   ;;  %v12544_v58 = vld [vmem:[#allocation2 + $0xf8c] ss:$52 sps:$4 sm:$0xff]  }
 0x1d7   :  { %4389 = vmatprep.subr.bf16.mxu0 %v12457_v59  ;;  %4512 = vmatprep.subr.bf16.mxu1 %v12460_v60  ;;  %v12539_v59 = vld [vmem:[#allocation2 + $0xf80] ss:$52 sps:$4 sm:$0xff]   ;;  %v12542_v60 = vld [vmem:[#allocation2 + $0xf88] ss:$52 sps:$4 sm:$0xff]  }
 0x1da   :  { %4390 = vmatpush1.bf16.msra.mxu0 %v12455_v61  ;;  %4513 = vmatpush1.bf16.msra.mxu1 %v12458_v62  ;;  %v12547_v61 = vld [vmem:[#allocation2 + $0xfec] ss:$52 sps:$4 sm:$0xff]   ;;  %v12550_v62 = vld [vmem:[#allocation2 + $0xff4] ss:$52 sps:$4 sm:$0xff]  }
 0x1db   :  { %4391 = vmatprep.subr.bf16.mxu0 %v12463_v63  ;;  %4514 = vmatprep.subr.bf16.mxu1 %v12466_v0  ;;  %v12545_v63 = vld [vmem:[#allocation2 + $0xfe8] ss:$52 sps:$4 sm:$0xff]   ;;  %v12548_v0 = vld [vmem:[#allocation2 + $0xff0] ss:$52 sps:$4 sm:$0xff]  }
 0x1de   :  { %4392 = vmatpush1.bf16.msra.mxu0 %v12461_v1  ;;  %4515 = vmatpush1.bf16.msra.mxu1 %v12464_v2  ;;  %v12553_v1 = vld [vmem:[#allocation2 + $0x1054] ss:$52 sps:$4 sm:$0xff]   ;;  %v12556_v2 = vld [vmem:[#allocation2 + $0x105c] ss:$52 sps:$4 sm:$0xff]  }
 0x1df   :  { %4393 = vmatprep.subr.bf16.mxu0 %v12469_v3  ;;  %4516 = vmatprep.subr.bf16.mxu1 %v12472_v4  ;;  %v12551_v3 = vld [vmem:[#allocation2 + $0x1050] ss:$52 sps:$4 sm:$0xff]   ;;  %v12554_v4 = vld [vmem:[#allocation2 + $0x1058] ss:$52 sps:$4 sm:$0xff]  }
 0x1e2   :  { %4394 = vmatpush1.bf16.msra.mxu0 %v12467_v6  ;;  %4517 = vmatpush1.bf16.msra.mxu1 %v12470_v7  ;;  %v12559_v6 = vld [vmem:[#allocation2 + $0x10bc] ss:$52 sps:$4 sm:$0xff]   ;;  %v12562_v7 = vld [vmem:[#allocation2 + $0x10c4] ss:$52 sps:$4 sm:$0xff]  }
 0x1e3   :  { %4395 = vmatprep.subr.bf16.mxu0 %v12475_v8  ;;  %4518 = vmatprep.subr.bf16.mxu1 %v12478_v9  ;;  %v12557_v8 = vld [vmem:[#allocation2 + $0x10b8] ss:$52 sps:$4 sm:$0xff]   ;;  %v12560_v9 = vld [vmem:[#allocation2 + $0x10c0] ss:$52 sps:$4 sm:$0xff]  }
 0x1e6   :  { %4396 = vmatpush1.bf16.msra.mxu0 %v12473_v10  ;;  %4519 = vmatpush1.bf16.msra.mxu1 %v12476_v11  ;;  %v12565_v10 = vld [vmem:[#allocation2 + $0x1124] ss:$52 sps:$4 sm:$0xff]   ;;  %v12568_v11 = vld [vmem:[#allocation2 + $0x112c] ss:$52 sps:$4 sm:$0xff]  }
 0x1e7   :  { %4397 = vmatprep.subr.bf16.mxu0 %v12481_v13  ;;  %4520 = vmatprep.subr.bf16.mxu1 %v12484_v14  ;;  %v12563_v13 = vld [vmem:[#allocation2 + $0x1120] ss:$52 sps:$4 sm:$0xff]   ;;  %v12566_v14 = vld [vmem:[#allocation2 + $0x1128] ss:$52 sps:$4 sm:$0xff]  }
 0x1ea   :  { %4398 = vmatpush1.bf16.msra.mxu0 %v12479_v15  ;;  %4521 = vmatpush1.bf16.msra.mxu1 %v12482_v16  ;;  %v12571_v15 = vld [vmem:[#allocation2 + $0x118c] ss:$52 sps:$4 sm:$0xff]   ;;  %v12574_v16 = vld [vmem:[#allocation2 + $0x1194] ss:$52 sps:$4 sm:$0xff]  }
 0x1eb   :  { %4399 = vmatprep.subr.bf16.mxu0 %v12487_v18  ;;  %4522 = vmatprep.subr.bf16.mxu1 %v12490_v19  ;;  %v12569_v18 = vld [vmem:[#allocation2 + $0x1188] ss:$52 sps:$4 sm:$0xff]   ;;  %v12572_v19 = vld [vmem:[#allocation2 + $0x1190] ss:$52 sps:$4 sm:$0xff]  }
 0x1ee   :  { %4400 = vmatpush1.bf16.msra.mxu0 %v12485_v21  ;;  %4523 = vmatpush1.bf16.msra.mxu1 %v12488_v22  ;;  %v12577_v21 = vld [vmem:[#allocation2 + $0x11f4] ss:$52 sps:$4 sm:$0xff]   ;;  %v12580_v22 = vld [vmem:[#allocation2 + $0x11fc] ss:$52 sps:$4 sm:$0xff]  }
 0x1ef   :  { %4401 = vmatprep.subr.bf16.mxu0 %v12493_v23  ;;  %4524 = vmatprep.subr.bf16.mxu1 %v12496_v24  ;;  %v12575_v23 = vld [vmem:[#allocation2 + $0x11f0] ss:$52 sps:$4 sm:$0xff]   ;;  %v12578_v24 = vld [vmem:[#allocation2 + $0x11f8] ss:$52 sps:$4 sm:$0xff]  }
 0x1f2   :  { %4402 = vmatpush1.bf16.msra.mxu0 %v12491_v25  ;;  %4525 = vmatpush1.bf16.msra.mxu1 %v12494_v26  ;;  %v12583_v25 = vld [vmem:[#allocation2 + $0x125c] ss:$52 sps:$4 sm:$0xff]   ;;  %v12586_v26 = vld [vmem:[#allocation2 + $0x1264] ss:$52 sps:$4 sm:$0xff]  }
 0x1f3   :  { %4403 = vmatprep.subr.bf16.mxu0 %v12499_v27  ;;  %4526 = vmatprep.subr.bf16.mxu1 %v12502_v28  ;;  %v12581_v27 = vld [vmem:[#allocation2 + $0x1258] ss:$52 sps:$4 sm:$0xff]   ;;  %v12584_v28 = vld [vmem:[#allocation2 + $0x1260] ss:$52 sps:$4 sm:$0xff]  }
 0x1f6   :  { %4404 = vmatpush1.bf16.msra.mxu0 %v12497_v29  ;;  %4527 = vmatpush1.bf16.msra.mxu1 %v12500_v30  ;;  %v12589_v29 = vld [vmem:[#allocation2 + $0x12c4] ss:$52 sps:$4 sm:$0xff]   ;;  %v12592_v30 = vld [vmem:[#allocation2 + $0x12cc] ss:$52 sps:$4 sm:$0xff]  }
 0x1f7   :  { %4414 = vmatprep.subr.bf16.mxu0 %v12505_v31  ;;  %4537 = vmatprep.subr.bf16.mxu1 %v12508_v33  ;;  %v12587_v31 = vld [vmem:[#allocation2 + $0x12c0] ss:$52 sps:$4 sm:$0xff]   ;;  %v12590_v33 = vld [vmem:[#allocation2 + $0x12c8] ss:$52 sps:$4 sm:$0xff]  }
 0x1f9   :  { %4406 = vmatmul.mubr.bf16.vlgmr.msra.gmra.mrb[4].mxu0 %v14247_v12  ;;  %4529 = vmatmul.mubr.bf16.vlgmr.msra.gmra.mrb[4].mxu1 %v14247_v12 }
 0x1fa   :  { %4415 = vmatpush1.bf16.msra.mxu0 %v12503_v34  ;;  %4538 = vmatpush1.bf16.msra.mxu1 %v12506_v35  ;;  %v12595_v34 = vld [vmem:[#allocation2 + $0x132c] ss:$52 sps:$4 sm:$0xff]   ;;  %v12598_v35 = vld [vmem:[#allocation2 + $0x1334] ss:$52 sps:$4 sm:$0xff]  }
 0x1fb   :  { %4416 = vmatprep.subr.bf16.mxu0 %v12511_v36  ;;  %4539 = vmatprep.subr.bf16.mxu1 %v12514_v37  ;;  %v12593_v36 = vld [vmem:[#allocation2 + $0x1328] ss:$52 sps:$4 sm:$0xff]   ;;  %v12596_v37 = vld [vmem:[#allocation2 + $0x1330] ss:$52 sps:$4 sm:$0xff]  }
 0x1fc   :  { %4446 = vmatprep.mubr.bf16.mxu0 %v14252_v17  ;;  %4569 = vmatprep.mubr.bf16.mxu1 %v14252_v17 }
 0x1fe   :  { %4417 = vmatpush1.bf16.msra.mxu0 %v12509_v38  ;;  %4540 = vmatpush1.bf16.msra.mxu1 %v12512_v39  ;;  %v12601_v38 = vld [vmem:[#allocation2 + $0x24] ss:$52 sps:$4 sm:$0xff]   ;;  %v12604_v39 = vld [vmem:[#allocation2 + $0x2c] ss:$52 sps:$4 sm:$0xff]  }
 0x1ff   :  { %4418 = vmatprep.subr.bf16.mxu0 %v12517_v40  ;;  %4541 = vmatprep.subr.bf16.mxu1 %v12520_v41  ;;  %v12599_v40 = vld [vmem:[#allocation2 + $0x20] ss:$52 sps:$4 sm:$0xff]   ;;  %v12602_v41 = vld [vmem:[#allocation2 + $0x28] ss:$52 sps:$4 sm:$0xff]  }
 0x202   :  { %4419 = vmatpush1.bf16.msra.mxu0 %v12515_v42  ;;  %4542 = vmatpush1.bf16.msra.mxu1 %v12518_v43  ;;  %v12607_v42 = vld [vmem:[#allocation2 + $0x8c] ss:$52 sps:$4 sm:$0xff]   ;;  %v12610_v43 = vld [vmem:[#allocation2 + $0x94] ss:$52 sps:$4 sm:$0xff]  }
 0x203   :  { %4420 = vmatprep.subr.bf16.mxu0 %v12523_v44  ;;  %4543 = vmatprep.subr.bf16.mxu1 %v12526_v45  ;;  %v12605_v44 = vld [vmem:[#allocation2 + $0x88] ss:$52 sps:$4 sm:$0xff]   ;;  %v12608_v45 = vld [vmem:[#allocation2 + $0x90] ss:$52 sps:$4 sm:$0xff]  }
 0x206   :  { %4421 = vmatpush1.bf16.msra.mxu0 %v12521_v46  ;;  %4544 = vmatpush1.bf16.msra.mxu1 %v12524_v47  ;;  %v12613_v46 = vld [vmem:[#allocation2 + $0xf4] ss:$52 sps:$4 sm:$0xff]   ;;  %v12616_v47 = vld [vmem:[#allocation2 + $0xfc] ss:$52 sps:$4 sm:$0xff]  }
 0x207   :  { %4422 = vmatprep.subr.bf16.mxu0 %v12529_v49  ;;  %4545 = vmatprep.subr.bf16.mxu1 %v12532_v50  ;;  %v12611_v49 = vld [vmem:[#allocation2 + $0xf0] ss:$52 sps:$4 sm:$0xff]   ;;  %v12614_v50 = vld [vmem:[#allocation2 + $0xf8] ss:$52 sps:$4 sm:$0xff]  }
 0x20a   :  { %4423 = vmatpush1.bf16.msra.mxu0 %v12527_v51  ;;  %4546 = vmatpush1.bf16.msra.mxu1 %v12530_v52  ;;  %v12619_v51 = vld [vmem:[#allocation2 + $0x15c] ss:$52 sps:$4 sm:$0xff]   ;;  %v12622_v52 = vld [vmem:[#allocation2 + $0x164] ss:$52 sps:$4 sm:$0xff]  }
 0x20b   :  { %4424 = vmatprep.subr.bf16.mxu0 %v12535_v53  ;;  %4547 = vmatprep.subr.bf16.mxu1 %v12538_v54  ;;  %v12617_v53 = vld [vmem:[#allocation2 + $0x158] ss:$52 sps:$4 sm:$0xff]   ;;  %v12620_v54 = vld [vmem:[#allocation2 + $0x160] ss:$52 sps:$4 sm:$0xff]  }
 0x20e   :  { %4425 = vmatpush1.bf16.msra.mxu0 %v12533_v55  ;;  %4548 = vmatpush1.bf16.msra.mxu1 %v12536_v56  ;;  %v12625_v55 = vld [vmem:[#allocation2 + $0x1c4] ss:$52 sps:$4 sm:$0xff]   ;;  %v12628_v56 = vld [vmem:[#allocation2 + $0x1cc] ss:$52 sps:$4 sm:$0xff]  }
 0x20f   :  { %4426 = vmatprep.subr.bf16.mxu0 %v12541_v57  ;;  %4549 = vmatprep.subr.bf16.mxu1 %v12544_v58  ;;  %v12623_v57 = vld [vmem:[#allocation2 + $0x1c0] ss:$52 sps:$4 sm:$0xff]   ;;  %v12626_v58 = vld [vmem:[#allocation2 + $0x1c8] ss:$52 sps:$4 sm:$0xff]  }
 0x212   :  { %4427 = vmatpush1.bf16.msra.mxu0 %v12539_v59  ;;  %4550 = vmatpush1.bf16.msra.mxu1 %v12542_v60  ;;  %v12631_v59 = vld [vmem:[#allocation2 + $0x22c] ss:$52 sps:$4 sm:$0xff]   ;;  %v12634_v60 = vld [vmem:[#allocation2 + $0x234] ss:$52 sps:$4 sm:$0xff]  }
 0x213   :  { %4428 = vmatprep.subr.bf16.mxu0 %v12547_v61  ;;  %4551 = vmatprep.subr.bf16.mxu1 %v12550_v62  ;;  %v12629_v61 = vld [vmem:[#allocation2 + $0x228] ss:$52 sps:$4 sm:$0xff]   ;;  %v12632_v62 = vld [vmem:[#allocation2 + $0x230] ss:$52 sps:$4 sm:$0xff]  }
 0x216   :  { %4429 = vmatpush1.bf16.msra.mxu0 %v12545_v63  ;;  %4552 = vmatpush1.bf16.msra.mxu1 %v12548_v0  ;;  %v12637_v63 = vld [vmem:[#allocation2 + $0x294] ss:$52 sps:$4 sm:$0xff]   ;;  %v12640_v0 = vld [vmem:[#allocation2 + $0x29c] ss:$52 sps:$4 sm:$0xff]  }
 0x217   :  { %4430 = vmatprep.subr.bf16.mxu0 %v12553_v1  ;;  %4553 = vmatprep.subr.bf16.mxu1 %v12556_v2 }
 0x21a   :  { %4431 = vmatpush1.bf16.msra.mxu0 %v12551_v3  ;;  %4554 = vmatpush1.bf16.msra.mxu1 %v12554_v4 }
 0x21b   :  { %4432 = vmatprep.subr.bf16.mxu0 %v12559_v6  ;;  %4555 = vmatprep.subr.bf16.mxu1 %v12562_v7 }
 0x21e   :  { %4433 = vmatpush1.bf16.msra.mxu0 %v12557_v8  ;;  %4556 = vmatpush1.bf16.msra.mxu1 %v12560_v9  ;;  %v12635_v8 = vld [vmem:[#allocation2 + $0x290] ss:$52 sps:$4 sm:$0xff]   ;;  %v12638_v9 = vld [vmem:[#allocation2 + $0x298] ss:$52 sps:$4 sm:$0xff]  }
 0x21f   :  { %4434 = vmatprep.subr.bf16.mxu0 %v12565_v10  ;;  %4557 = vmatprep.subr.bf16.mxu1 %v12568_v11 }
 0x222   :  { %4435 = vmatpush1.bf16.msra.mxu0 %v12563_v13  ;;  %4558 = vmatpush1.bf16.msra.mxu1 %v12566_v14  ;;  %v12643_v13 = vld [vmem:[#allocation2 + $0x2fc] ss:$52 sps:$4 sm:$0xff]   ;;  %v12646_v14 = vld [vmem:[#allocation2 + $0x304] ss:$52 sps:$4 sm:$0xff]  }
 0x223   :  { %4436 = vmatprep.subr.bf16.mxu0 %v12571_v15  ;;  %4559 = vmatprep.subr.bf16.mxu1 %v12574_v16  ;;  %v12641_v15 = vld [vmem:[#allocation2 + $0x2f8] ss:$52 sps:$4 sm:$0xff]   ;;  %v12644_v16 = vld [vmem:[#allocation2 + $0x300] ss:$52 sps:$4 sm:$0xff]  }
 0x226   :  { %4437 = vmatpush1.bf16.msra.mxu0 %v12569_v18  ;;  %4560 = vmatpush1.bf16.msra.mxu1 %v12572_v19  ;;  %v12649_v18 = vld [vmem:[#allocation2 + $0x364] ss:$52 sps:$4 sm:$0xff]   ;;  %v12652_v19 = vld [vmem:[#allocation2 + $0x36c] ss:$52 sps:$4 sm:$0xff]  }
 0x227   :  { %4438 = vmatprep.subr.bf16.mxu0 %v12577_v21  ;;  %4561 = vmatprep.subr.bf16.mxu1 %v12580_v22  ;;  %v12647_v21 = vld [vmem:[#allocation2 + $0x360] ss:$52 sps:$4 sm:$0xff]   ;;  %v12650_v22 = vld [vmem:[#allocation2 + $0x368] ss:$52 sps:$4 sm:$0xff]  }
 0x22a   :  { %4439 = vmatpush1.bf16.msra.mxu0 %v12575_v23  ;;  %4562 = vmatpush1.bf16.msra.mxu1 %v12578_v24  ;;  %v12655_v23 = vld [vmem:[#allocation2 + $0x3cc] ss:$52 sps:$4 sm:$0xff]   ;;  %v12658_v24 = vld [vmem:[#allocation2 + $0x3d4] ss:$52 sps:$4 sm:$0xff]  }
 0x22b   :  { %4440 = vmatprep.subr.bf16.mxu0 %v12583_v25  ;;  %4563 = vmatprep.subr.bf16.mxu1 %v12586_v26  ;;  %v12653_v25 = vld [vmem:[#allocation2 + $0x3c8] ss:$52 sps:$4 sm:$0xff]   ;;  %v12656_v26 = vld [vmem:[#allocation2 + $0x3d0] ss:$52 sps:$4 sm:$0xff]  }
 0x22e   :  { %4441 = vmatpush1.bf16.msra.mxu0 %v12581_v27  ;;  %4564 = vmatpush1.bf16.msra.mxu1 %v12584_v28  ;;  %v12661_v27 = vld [vmem:[#allocation2 + $0x434] ss:$52 sps:$4 sm:$0xff]   ;;  %v12664_v28 = vld [vmem:[#allocation2 + $0x43c] ss:$52 sps:$4 sm:$0xff]  }
 0x22f   :  { %4442 = vmatprep.subr.bf16.mxu0 %v12589_v29  ;;  %4565 = vmatprep.subr.bf16.mxu1 %v12592_v30  ;;  %v12659_v29 = vld [vmem:[#allocation2 + $0x430] ss:$52 sps:$4 sm:$0xff]   ;;  %v12662_v30 = vld [vmem:[#allocation2 + $0x438] ss:$52 sps:$4 sm:$0xff]  }
 0x232   :  { %4443 = vmatpush1.bf16.msra.mxu0 %v12587_v31  ;;  %4566 = vmatpush1.bf16.msra.mxu1 %v12590_v33  ;;  %v12667_v31 = vld [vmem:[#allocation2 + $0x49c] ss:$52 sps:$4 sm:$0xff]   ;;  %v12670_v33 = vld [vmem:[#allocation2 + $0x4a4] ss:$52 sps:$4 sm:$0xff]  }
 0x233   :  { %4444 = vmatprep.subr.bf16.mxu0 %v12595_v34  ;;  %4567 = vmatprep.subr.bf16.mxu1 %v12598_v35  ;;  %v12665_v34 = vld [vmem:[#allocation2 + $0x498] ss:$52 sps:$4 sm:$0xff]   ;;  %v12668_v35 = vld [vmem:[#allocation2 + $0x4a0] ss:$52 sps:$4 sm:$0xff]  }
 0x236   :  { %4445 = vmatpush1.bf16.msra.mxu0 %v12593_v36  ;;  %4568 = vmatpush1.bf16.msra.mxu1 %v12596_v37  ;;  %v12673_v36 = vld [vmem:[#allocation2 + $0x504] ss:$52 sps:$4 sm:$0xff]   ;;  %v12676_v37 = vld [vmem:[#allocation2 + $0x50c] ss:$52 sps:$4 sm:$0xff]  }
 0x237   :  { %4578 = vmatprep.subr.bf16.mxu0 %v12601_v38  ;;  %4701 = vmatprep.subr.bf16.mxu1 %v12604_v39  ;;  %v12671_v38 = vld [vmem:[#allocation2 + $0x500] ss:$52 sps:$4 sm:$0xff]   ;;  %v12674_v39 = vld [vmem:[#allocation2 + $0x508] ss:$52 sps:$4 sm:$0xff]  }
 0x239   :  { %4447 = vmatmul.mubr.bf16.vlgmr.msra.gmra.mrb[4].mxu0 %v14261_v20  ;;  %4570 = vmatmul.mubr.bf16.vlgmr.msra.gmra.mrb[4].mxu1 %v14261_v20 }
 0x23a   :  { %4579 = vmatpush1.bf16.msra.mxu0 %v12599_v40  ;;  %4702 = vmatpush1.bf16.msra.mxu1 %v12602_v41  ;;  %v12679_v40 = vld [vmem:[#allocation2 + $0x56c] ss:$52 sps:$4 sm:$0xff]   ;;  %v12682_v41 = vld [vmem:[#allocation2 + $0x574] ss:$52 sps:$4 sm:$0xff]  }
 0x23b   :  { %4580 = vmatprep.subr.bf16.mxu0 %v12607_v42  ;;  %4703 = vmatprep.subr.bf16.mxu1 %v12610_v43  ;;  %v12677_v42 = vld [vmem:[#allocation2 + $0x568] ss:$52 sps:$4 sm:$0xff]   ;;  %v12680_v43 = vld [vmem:[#allocation2 + $0x570] ss:$52 sps:$4 sm:$0xff]  }
 0x23c   :  { %4610 = vmatprep.mubr.bf16.mxu0 %v14226_v48  ;;  %4733 = vmatprep.mubr.bf16.mxu1 %v14226_v48 }
 0x23e   :  { %4581 = vmatpush1.bf16.msra.mxu0 %v12605_v44  ;;  %4704 = vmatpush1.bf16.msra.mxu1 %v12608_v45  ;;  %v12685_v44 = vld [vmem:[#allocation2 + $0x5d4] ss:$52 sps:$4 sm:$0xff]   ;;  %v12688_v45 = vld [vmem:[#allocation2 + $0x5dc] ss:$52 sps:$4 sm:$0xff]  }
 0x23f   :  { %4582 = vmatprep.subr.bf16.mxu0 %v12613_v46  ;;  %4705 = vmatprep.subr.bf16.mxu1 %v12616_v47  ;;  %v12683_v46 = vld [vmem:[#allocation2 + $0x5d0] ss:$52 sps:$4 sm:$0xff]   ;;  %v12686_v47 = vld [vmem:[#allocation2 + $0x5d8] ss:$52 sps:$4 sm:$0xff]  }
 0x242   :  { %4583 = vmatpush1.bf16.msra.mxu0 %v12611_v49  ;;  %4706 = vmatpush1.bf16.msra.mxu1 %v12614_v50  ;;  %v12691_v49 = vld [vmem:[#allocation2 + $0x63c] ss:$52 sps:$4 sm:$0xff]   ;;  %v12694_v50 = vld [vmem:[#allocation2 + $0x644] ss:$52 sps:$4 sm:$0xff]  }
 0x243   :  { %4584 = vmatprep.subr.bf16.mxu0 %v12619_v51  ;;  %4707 = vmatprep.subr.bf16.mxu1 %v12622_v52  ;;  %v12689_v51 = vld [vmem:[#allocation2 + $0x638] ss:$52 sps:$4 sm:$0xff]   ;;  %v12692_v52 = vld [vmem:[#allocation2 + $0x640] ss:$52 sps:$4 sm:$0xff]  }
 0x246   :  { %4585 = vmatpush1.bf16.msra.mxu0 %v12617_v53  ;;  %4708 = vmatpush1.bf16.msra.mxu1 %v12620_v54  ;;  %v12697_v53 = vld [vmem:[#allocation2 + $0x6a4] ss:$52 sps:$4 sm:$0xff]   ;;  %v12700_v54 = vld [vmem:[#allocation2 + $0x6ac] ss:$52 sps:$4 sm:$0xff]  }
 0x247   :  { %4586 = vmatprep.subr.bf16.mxu0 %v12625_v55  ;;  %4709 = vmatprep.subr.bf16.mxu1 %v12628_v56  ;;  %v12695_v55 = vld [vmem:[#allocation2 + $0x6a0] ss:$52 sps:$4 sm:$0xff]   ;;  %v12698_v56 = vld [vmem:[#allocation2 + $0x6a8] ss:$52 sps:$4 sm:$0xff]  }
 0x24a   :  { %4587 = vmatpush1.bf16.msra.mxu0 %v12623_v57  ;;  %4710 = vmatpush1.bf16.msra.mxu1 %v12626_v58  ;;  %v12703_v57 = vld [vmem:[#allocation2 + $0x70c] ss:$52 sps:$4 sm:$0xff]   ;;  %v12706_v58 = vld [vmem:[#allocation2 + $0x714] ss:$52 sps:$4 sm:$0xff]  }
 0x24b   :  { %4588 = vmatprep.subr.bf16.mxu0 %v12631_v59  ;;  %4711 = vmatprep.subr.bf16.mxu1 %v12634_v60  ;;  %v12701_v59 = vld [vmem:[#allocation2 + $0x708] ss:$52 sps:$4 sm:$0xff]   ;;  %v12704_v60 = vld [vmem:[#allocation2 + $0x710] ss:$52 sps:$4 sm:$0xff]  }
 0x24c   :  { %v14279_v1 = vpop.f32.mrb[0].mxu0  ;;  %v14281_v2 = vpop.f32.mrb[0].mxu1 }
 0x24d   :  { %v14283_v3 = vpop.f32.mrb[1].mxu0  ;;  %v14285_v4 = vpop.f32.mrb[1].mxu1 }
 0x24e   :  { %v4206_v6 = vpop.f32.mrb[2].mxu0  ;;  %v4329_v7 = vpop.f32.mrb[2].mxu1  ;;  %4589 = vmatpush1.bf16.msra.mxu0 %v12629_v61  ;;  %4712 = vmatpush1.bf16.msra.mxu1 %v12632_v62  ;;  %v12709_v61 = vld [vmem:[#allocation2 + $0x774] ss:$52 sps:$4 sm:$0xff]   ;;  %v12712_v62 = vld [vmem:[#allocation2 + $0x77c] ss:$52 sps:$4 sm:$0xff]  }
 0x24f   :  { %v4207_v10 = vpop.f32.mrb[3].mxu0  ;;  %v4330_v11 = vpop.f32.mrb[3].mxu1  ;;  %4590 = vmatprep.subr.bf16.mxu0 %v12637_v63  ;;  %4713 = vmatprep.subr.bf16.mxu1 %v12640_v0  ;;  %v12707_v63 = vld [vmem:[#allocation2 + $0x770] ss:$52 sps:$4 sm:$0xff]   ;;  %v12710_v0 = vld [vmem:[#allocation2 + $0x778] ss:$52 sps:$4 sm:$0xff]  }
 0x250   :  { %v12715_v6 = vld [vmem:[#allocation2 + $0x7dc] ss:$52 sps:$4 sm:$0xff]   ;;  %v12718_v7 = vld [vmem:[#allocation2 + $0x7e4] ss:$52 sps:$4 sm:$0xff]   ;;  %v12724_v11 = vld [vmem:[#allocation2 + $0x84c] ss:$52 sps:$4 sm:$0xff]  }
 0x251   :  { %v12721_v10 = vld [vmem:[#allocation2 + $0x844] ss:$52 sps:$4 sm:$0xff]  }
 0x252   :  { %4591 = vmatpush1.bf16.msra.mxu0 %v12635_v8  ;;  %4714 = vmatpush1.bf16.msra.mxu1 %v12638_v9  ;;  %v12713_v8 = vld [vmem:[#allocation2 + $0x7d8] ss:$52 sps:$4 sm:$0xff]   ;;  %v12716_v9 = vld [vmem:[#allocation2 + $0x7e0] ss:$52 sps:$4 sm:$0xff]  }
 0x253   :  { %4592 = vmatprep.subr.bf16.mxu0 %v12643_v13  ;;  %4715 = vmatprep.subr.bf16.mxu1 %v12646_v14  ;;  %v12719_v13 = vld [vmem:[#allocation2 + $0x840] ss:$52 sps:$4 sm:$0xff]   ;;  %v12722_v14 = vld [vmem:[#allocation2 + $0x848] ss:$52 sps:$4 sm:$0xff]  }
 0x256   :  { %4593 = vmatpush1.bf16.msra.mxu0 %v12641_v15  ;;  %4716 = vmatpush1.bf16.msra.mxu1 %v12644_v16  ;;  %v12727_v15 = vld [vmem:[#allocation2 + $0x8ac] ss:$52 sps:$4 sm:$0xff]   ;;  %v12730_v16 = vld [vmem:[#allocation2 + $0x8b4] ss:$52 sps:$4 sm:$0xff]  }
 0x257   :  { %4594 = vmatprep.subr.bf16.mxu0 %v12649_v18  ;;  %4717 = vmatprep.subr.bf16.mxu1 %v12652_v19  ;;  %v12725_v18 = vld [vmem:[#allocation2 + $0x8a8] ss:$52 sps:$4 sm:$0xff]   ;;  %v12728_v19 = vld [vmem:[#allocation2 + $0x8b0] ss:$52 sps:$4 sm:$0xff]  }
 0x25a   :  { %4595 = vmatpush1.bf16.msra.mxu0 %v12647_v21  ;;  %4718 = vmatpush1.bf16.msra.mxu1 %v12650_v22  ;;  %v12733_v21 = vld [vmem:[#allocation2 + $0x914] ss:$52 sps:$4 sm:$0xff]   ;;  %v12736_v22 = vld [vmem:[#allocation2 + $0x91c] ss:$52 sps:$4 sm:$0xff]  }
 0x25b   :  { %4596 = vmatprep.subr.bf16.mxu0 %v12655_v23  ;;  %4719 = vmatprep.subr.bf16.mxu1 %v12658_v24  ;;  %v12731_v23 = vld [vmem:[#allocation2 + $0x910] ss:$52 sps:$4 sm:$0xff]   ;;  %v12734_v24 = vld [vmem:[#allocation2 + $0x918] ss:$52 sps:$4 sm:$0xff]  }
 0x25e   :  { %4597 = vmatpush1.bf16.msra.mxu0 %v12653_v25  ;;  %4720 = vmatpush1.bf16.msra.mxu1 %v12656_v26  ;;  %v12739_v25 = vld [vmem:[#allocation2 + $0x97c] ss:$52 sps:$4 sm:$0xff]   ;;  %v12742_v26 = vld [vmem:[#allocation2 + $0x984] ss:$52 sps:$4 sm:$0xff]  }
 0x25f   :  { %4598 = vmatprep.subr.bf16.mxu0 %v12661_v27  ;;  %4721 = vmatprep.subr.bf16.mxu1 %v12664_v28  ;;  %v12737_v27 = vld [vmem:[#allocation2 + $0x978] ss:$52 sps:$4 sm:$0xff]   ;;  %v12740_v28 = vld [vmem:[#allocation2 + $0x980] ss:$52 sps:$4 sm:$0xff]  }
 0x262   :  { %4599 = vmatpush1.bf16.msra.mxu0 %v12659_v29  ;;  %4722 = vmatpush1.bf16.msra.mxu1 %v12662_v30  ;;  %v12745_v29 = vld [vmem:[#allocation2 + $0x9e4] ss:$52 sps:$4 sm:$0xff]   ;;  %v12748_v30 = vld [vmem:[#allocation2 + $0x9ec] ss:$52 sps:$4 sm:$0xff]  }
 0x263   :  { %4600 = vmatprep.subr.bf16.mxu0 %v12667_v31  ;;  %4723 = vmatprep.subr.bf16.mxu1 %v12670_v33  ;;  %v12743_v31 = vld [vmem:[#allocation2 + $0x9e0] ss:$52 sps:$4 sm:$0xff]   ;;  %v12746_v33 = vld [vmem:[#allocation2 + $0x9e8] ss:$52 sps:$4 sm:$0xff]  }
 0x266   :  { %4601 = vmatpush1.bf16.msra.mxu0 %v12665_v34  ;;  %4724 = vmatpush1.bf16.msra.mxu1 %v12668_v35  ;;  %v12751_v34 = vld [vmem:[#allocation2 + $0xa4c] ss:$52 sps:$4 sm:$0xff]   ;;  %v12754_v35 = vld [vmem:[#allocation2 + $0xa54] ss:$52 sps:$4 sm:$0xff]  }
 0x267   :  { %4602 = vmatprep.subr.bf16.mxu0 %v12673_v36  ;;  %4725 = vmatprep.subr.bf16.mxu1 %v12676_v37  ;;  %v12749_v36 = vld [vmem:[#allocation2 + $0xa48] ss:$52 sps:$4 sm:$0xff]   ;;  %v12752_v37 = vld [vmem:[#allocation2 + $0xa50] ss:$52 sps:$4 sm:$0xff]  }
 0x26a   :  { %4603 = vmatpush1.bf16.msra.mxu0 %v12671_v38  ;;  %4726 = vmatpush1.bf16.msra.mxu1 %v12674_v39  ;;  %v12757_v38 = vld [vmem:[#allocation2 + $0xab4] ss:$52 sps:$4 sm:$0xff]   ;;  %v12760_v39 = vld [vmem:[#allocation2 + $0xabc] ss:$52 sps:$4 sm:$0xff]  }
 0x26b   :  { %4604 = vmatprep.subr.bf16.mxu0 %v12679_v40  ;;  %4727 = vmatprep.subr.bf16.mxu1 %v12682_v41  ;;  %v12755_v40 = vld [vmem:[#allocation2 + $0xab0] ss:$52 sps:$4 sm:$0xff]   ;;  %v12758_v41 = vld [vmem:[#allocation2 + $0xab8] ss:$52 sps:$4 sm:$0xff]  }
 0x26e   :  { %4605 = vmatpush1.bf16.msra.mxu0 %v12677_v42  ;;  %4728 = vmatpush1.bf16.msra.mxu1 %v12680_v43  ;;  %v12763_v42 = vld [vmem:[#allocation2 + $0xb1c] ss:$52 sps:$4 sm:$0xff]   ;;  %v12766_v43 = vld [vmem:[#allocation2 + $0xb24] ss:$52 sps:$4 sm:$0xff]  }
 0x26f   :  { %4606 = vmatprep.subr.bf16.mxu0 %v12685_v44  ;;  %4729 = vmatprep.subr.bf16.mxu1 %v12688_v45  ;;  %v12761_v44 = vld [vmem:[#allocation2 + $0xb18] ss:$52 sps:$4 sm:$0xff]   ;;  %v12764_v45 = vld [vmem:[#allocation2 + $0xb20] ss:$52 sps:$4 sm:$0xff]  }
 0x272   :  { %4607 = vmatpush1.bf16.msra.mxu0 %v12683_v46  ;;  %4730 = vmatpush1.bf16.msra.mxu1 %v12686_v47  ;;  %v12769_v46 = vld [vmem:[#allocation2 + $0xb84] ss:$52 sps:$4 sm:$0xff]   ;;  %v12772_v47 = vld [vmem:[#allocation2 + $0xb8c] ss:$52 sps:$4 sm:$0xff]  }
 0x273   :  { %4608 = vmatprep.subr.bf16.mxu0 %v12691_v49  ;;  %4731 = vmatprep.subr.bf16.mxu1 %v12694_v50  ;;  %v12767_v49 = vld [vmem:[#allocation2 + $0xb80] ss:$52 sps:$4 sm:$0xff]   ;;  %v12770_v50 = vld [vmem:[#allocation2 + $0xb88] ss:$52 sps:$4 sm:$0xff]  }
 0x276   :  { %4609 = vmatpush1.bf16.msra.mxu0 %v12689_v51  ;;  %4732 = vmatpush1.bf16.msra.mxu1 %v12692_v52  ;;  %v12775_v51 = vld [vmem:[#allocation2 + $0xbec] ss:$52 sps:$4 sm:$0xff]   ;;  %v12778_v52 = vld [vmem:[#allocation2 + $0xbf4] ss:$52 sps:$4 sm:$0xff]  }
 0x277   :  { %4619 = vmatprep.subr.bf16.mxu0 %v12697_v53  ;;  %4742 = vmatprep.subr.bf16.mxu1 %v12700_v54  ;;  %v12773_v53 = vld [vmem:[#allocation2 + $0xbe8] ss:$52 sps:$4 sm:$0xff]   ;;  %v12776_v54 = vld [vmem:[#allocation2 + $0xbf0] ss:$52 sps:$4 sm:$0xff]  }
 0x279   :  { %4611 = vmatmul.mubr.bf16.vlgmr.msra.gmra.mrb[8].mxu0 %v14233_v5  ;;  %4734 = vmatmul.mubr.bf16.vlgmr.msra.gmra.mrb[8].mxu1 %v14233_v5 }
 0x27a   :  { %4620 = vmatpush1.bf16.msra.mxu0 %v12695_v55  ;;  %4743 = vmatpush1.bf16.msra.mxu1 %v12698_v56  ;;  %v12781_v55 = vld [vmem:[#allocation2 + $0xc54] ss:$52 sps:$4 sm:$0xff]   ;;  %v12784_v56 = vld [vmem:[#allocation2 + $0xc5c] ss:$52 sps:$4 sm:$0xff]  }
 0x27b   :  { %4621 = vmatprep.subr.bf16.mxu0 %v12703_v57  ;;  %4744 = vmatprep.subr.bf16.mxu1 %v12706_v58  ;;  %v12779_v57 = vld [vmem:[#allocation2 + $0xc50] ss:$52 sps:$4 sm:$0xff]   ;;  %v12782_v58 = vld [vmem:[#allocation2 + $0xc58] ss:$52 sps:$4 sm:$0xff]  }
 0x27c   :  { %4651 = vmatprep.mubr.bf16.mxu0 %v14240_v32  ;;  %4774 = vmatprep.mubr.bf16.mxu1 %v14240_v32 }
 0x27e   :  { %4622 = vmatpush1.bf16.msra.mxu0 %v12701_v59  ;;  %4745 = vmatpush1.bf16.msra.mxu1 %v12704_v60  ;;  %v12787_v59 = vld [vmem:[#allocation2 + $0xcbc] ss:$52 sps:$4 sm:$0xff]   ;;  %v12790_v60 = vld [vmem:[#allocation2 + $0xcc4] ss:$52 sps:$4 sm:$0xff]  }
 0x27f   :  { %4623 = vmatprep.subr.bf16.mxu0 %v12709_v61  ;;  %4746 = vmatprep.subr.bf16.mxu1 %v12712_v62  ;;  %v12785_v61 = vld [vmem:[#allocation2 + $0xcb8] ss:$52 sps:$4 sm:$0xff]   ;;  %v12788_v62 = vld [vmem:[#allocation2 + $0xcc0] ss:$52 sps:$4 sm:$0xff]  }
 0x282   :  { %4624 = vmatpush1.bf16.msra.mxu0 %v12707_v63  ;;  %4747 = vmatpush1.bf16.msra.mxu1 %v12710_v0  ;;  %v12793_v63 = vld [vmem:[#allocation2 + $0xd24] ss:$52 sps:$4 sm:$0xff]   ;;  %v12796_v0 = vld [vmem:[#allocation2 + $0xd2c] ss:$52 sps:$4 sm:$0xff]  }
 0x283   :  { %4625 = vmatprep.subr.bf16.mxu0 %v12715_v6  ;;  %4748 = vmatprep.subr.bf16.mxu1 %v12718_v7  ;;  %v12791_v6 = vld [vmem:[#allocation2 + $0xd20] ss:$52 sps:$4 sm:$0xff]   ;;  %v12794_v7 = vld [vmem:[#allocation2 + $0xd28] ss:$52 sps:$4 sm:$0xff]  }
 0x286   :  { %4626 = vmatpush1.bf16.msra.mxu0 %v12713_v8  ;;  %4749 = vmatpush1.bf16.msra.mxu1 %v12716_v9  ;;  %v12799_v8 = vld [vmem:[#allocation2 + $0xd8c] ss:$52 sps:$4 sm:$0xff]   ;;  %v12802_v9 = vld [vmem:[#allocation2 + $0xd94] ss:$52 sps:$4 sm:$0xff]  }
 0x287   :  { %4627 = vmatprep.subr.bf16.mxu0 %v12721_v10  ;;  %4750 = vmatprep.subr.bf16.mxu1 %v12724_v11  ;;  %v12797_v10 = vld [vmem:[#allocation2 + $0xd88] ss:$52 sps:$4 sm:$0xff]   ;;  %v12800_v11 = vld [vmem:[#allocation2 + $0xd90] ss:$52 sps:$4 sm:$0xff]  }
 0x28a   :  { %4628 = vmatpush1.bf16.msra.mxu0 %v12719_v13  ;;  %4751 = vmatpush1.bf16.msra.mxu1 %v12722_v14  ;;  %v12805_v13 = vld [vmem:[#allocation2 + $0xdf4] ss:$52 sps:$4 sm:$0xff]   ;;  %v12808_v14 = vld [vmem:[#allocation2 + $0xdfc] ss:$52 sps:$4 sm:$0xff]  }
 0x28b   :  { %4629 = vmatprep.subr.bf16.mxu0 %v12727_v15  ;;  %4752 = vmatprep.subr.bf16.mxu1 %v12730_v16  ;;  %v12803_v15 = vld [vmem:[#allocation2 + $0xdf0] ss:$52 sps:$4 sm:$0xff]   ;;  %v12806_v16 = vld [vmem:[#allocation2 + $0xdf8] ss:$52 sps:$4 sm:$0xff]  }
 0x28e   :  { %4630 = vmatpush1.bf16.msra.mxu0 %v12725_v18  ;;  %4753 = vmatpush1.bf16.msra.mxu1 %v12728_v19  ;;  %v12811_v18 = vld [vmem:[#allocation2 + $0xe5c] ss:$52 sps:$4 sm:$0xff]   ;;  %v12814_v19 = vld [vmem:[#allocation2 + $0xe64] ss:$52 sps:$4 sm:$0xff]  }
 0x28f   :  { %4631 = vmatprep.subr.bf16.mxu0 %v12733_v21  ;;  %4754 = vmatprep.subr.bf16.mxu1 %v12736_v22  ;;  %v12809_v21 = vld [vmem:[#allocation2 + $0xe58] ss:$52 sps:$4 sm:$0xff]   ;;  %v12812_v22 = vld [vmem:[#allocation2 + $0xe60] ss:$52 sps:$4 sm:$0xff]  }
 0x292   :  { %4632 = vmatpush1.bf16.msra.mxu0 %v12731_v23  ;;  %4755 = vmatpush1.bf16.msra.mxu1 %v12734_v24  ;;  %v12817_v23 = vld [vmem:[#allocation2 + $0xec4] ss:$52 sps:$4 sm:$0xff]   ;;  %v12820_v24 = vld [vmem:[#allocation2 + $0xecc] ss:$52 sps:$4 sm:$0xff]  }
 0x293   :  { %4633 = vmatprep.subr.bf16.mxu0 %v12739_v25  ;;  %4756 = vmatprep.subr.bf16.mxu1 %v12742_v26  ;;  %v12815_v25 = vld [vmem:[#allocation2 + $0xec0] ss:$52 sps:$4 sm:$0xff]   ;;  %v12818_v26 = vld [vmem:[#allocation2 + $0xec8] ss:$52 sps:$4 sm:$0xff]  }
 0x296   :  { %4634 = vmatpush1.bf16.msra.mxu0 %v12737_v27  ;;  %4757 = vmatpush1.bf16.msra.mxu1 %v12740_v28  ;;  %v12823_v27 = vld [vmem:[#allocation2 + $0xf2c] ss:$52 sps:$4 sm:$0xff]   ;;  %v12826_v28 = vld [vmem:[#allocation2 + $0xf34] ss:$52 sps:$4 sm:$0xff]  }
 0x297   :  { %4635 = vmatprep.subr.bf16.mxu0 %v12745_v29  ;;  %4758 = vmatprep.subr.bf16.mxu1 %v12748_v30  ;;  %v12821_v29 = vld [vmem:[#allocation2 + $0xf28] ss:$52 sps:$4 sm:$0xff]   ;;  %v12824_v30 = vld [vmem:[#allocation2 + $0xf30] ss:$52 sps:$4 sm:$0xff]  }
 0x29a   :  { %4636 = vmatpush1.bf16.msra.mxu0 %v12743_v31  ;;  %4759 = vmatpush1.bf16.msra.mxu1 %v12746_v33  ;;  %v12829_v31 = vld [vmem:[#allocation2 + $0xf94] ss:$52 sps:$4 sm:$0xff]   ;;  %v12832_v33 = vld [vmem:[#allocation2 + $0xf9c] ss:$52 sps:$4 sm:$0xff]  }
 0x29b   :  { %4637 = vmatprep.subr.bf16.mxu0 %v12751_v34  ;;  %4760 = vmatprep.subr.bf16.mxu1 %v12754_v35  ;;  %v12827_v34 = vld [vmem:[#allocation2 + $0xf90] ss:$52 sps:$4 sm:$0xff]   ;;  %v12830_v35 = vld [vmem:[#allocation2 + $0xf98] ss:$52 sps:$4 sm:$0xff]  }
 0x29e   :  { %4638 = vmatpush1.bf16.msra.mxu0 %v12749_v36  ;;  %4761 = vmatpush1.bf16.msra.mxu1 %v12752_v37  ;;  %v12835_v36 = vld [vmem:[#allocation2 + $0xffc] ss:$52 sps:$4 sm:$0xff]   ;;  %v12838_v37 = vld [vmem:[#allocation2 + $0x1004] ss:$52 sps:$4 sm:$0xff]  }
 0x29f   :  { %4639 = vmatprep.subr.bf16.mxu0 %v12757_v38  ;;  %4762 = vmatprep.subr.bf16.mxu1 %v12760_v39  ;;  %v12833_v38 = vld [vmem:[#allocation2 + $0xff8] ss:$52 sps:$4 sm:$0xff]   ;;  %v12836_v39 = vld [vmem:[#allocation2 + $0x1000] ss:$52 sps:$4 sm:$0xff]  }
 0x2a2   :  { %4640 = vmatpush1.bf16.msra.mxu0 %v12755_v40  ;;  %4763 = vmatpush1.bf16.msra.mxu1 %v12758_v41  ;;  %v12841_v40 = vld [vmem:[#allocation2 + $0x1064] ss:$52 sps:$4 sm:$0xff]   ;;  %v12844_v41 = vld [vmem:[#allocation2 + $0x106c] ss:$52 sps:$4 sm:$0xff]  }
 0x2a3   :  { %4641 = vmatprep.subr.bf16.mxu0 %v12763_v42  ;;  %4764 = vmatprep.subr.bf16.mxu1 %v12766_v43  ;;  %v12839_v42 = vld [vmem:[#allocation2 + $0x1060] ss:$52 sps:$4 sm:$0xff]   ;;  %v12842_v43 = vld [vmem:[#allocation2 + $0x1068] ss:$52 sps:$4 sm:$0xff]  }
 0x2a6   :  { %4642 = vmatpush1.bf16.msra.mxu0 %v12761_v44  ;;  %4765 = vmatpush1.bf16.msra.mxu1 %v12764_v45  ;;  %v12847_v44 = vld [vmem:[#allocation2 + $0x10cc] ss:$52 sps:$4 sm:$0xff]   ;;  %v12850_v45 = vld [vmem:[#allocation2 + $0x10d4] ss:$52 sps:$4 sm:$0xff]  }
 0x2a7   :  { %4643 = vmatprep.subr.bf16.mxu0 %v12769_v46  ;;  %4766 = vmatprep.subr.bf16.mxu1 %v12772_v47  ;;  %v12845_v46 = vld [vmem:[#allocation2 + $0x10c8] ss:$52 sps:$4 sm:$0xff]   ;;  %v12848_v47 = vld [vmem:[#allocation2 + $0x10d0] ss:$52 sps:$4 sm:$0xff]  }
 0x2aa   :  { %4644 = vmatpush1.bf16.msra.mxu0 %v12767_v49  ;;  %4767 = vmatpush1.bf16.msra.mxu1 %v12770_v50  ;;  %v12853_v49 = vld [vmem:[#allocation2 + $0x1134] ss:$52 sps:$4 sm:$0xff]   ;;  %v12856_v50 = vld [vmem:[#allocation2 + $0x113c] ss:$52 sps:$4 sm:$0xff]  }
 0x2ab   :  { %4645 = vmatprep.subr.bf16.mxu0 %v12775_v51  ;;  %4768 = vmatprep.subr.bf16.mxu1 %v12778_v52  ;;  %v12851_v51 = vld [vmem:[#allocation2 + $0x1130] ss:$52 sps:$4 sm:$0xff]   ;;  %v12854_v52 = vld [vmem:[#allocation2 + $0x1138] ss:$52 sps:$4 sm:$0xff]  }
 0x2ae   :  { %4646 = vmatpush1.bf16.msra.mxu0 %v12773_v53  ;;  %4769 = vmatpush1.bf16.msra.mxu1 %v12776_v54  ;;  %v12859_v53 = vld [vmem:[#allocation2 + $0x119c] ss:$52 sps:$4 sm:$0xff]   ;;  %v12862_v54 = vld [vmem:[#allocation2 + $0x11a4] ss:$52 sps:$4 sm:$0xff]  }
 0x2af   :  { %4647 = vmatprep.subr.bf16.mxu0 %v12781_v55  ;;  %4770 = vmatprep.subr.bf16.mxu1 %v12784_v56  ;;  %v12857_v55 = vld [vmem:[#allocation2 + $0x1198] ss:$52 sps:$4 sm:$0xff]   ;;  %v12860_v56 = vld [vmem:[#allocation2 + $0x11a0] ss:$52 sps:$4 sm:$0xff]  }
 0x2b2   :  { %4648 = vmatpush1.bf16.msra.mxu0 %v12779_v57  ;;  %4771 = vmatpush1.bf16.msra.mxu1 %v12782_v58  ;;  %v12865_v57 = vld [vmem:[#allocation2 + $0x1204] ss:$52 sps:$4 sm:$0xff]   ;;  %v12868_v58 = vld [vmem:[#allocation2 + $0x120c] ss:$52 sps:$4 sm:$0xff]  }
 0x2b3   :  { %4649 = vmatprep.subr.bf16.mxu0 %v12787_v59  ;;  %4772 = vmatprep.subr.bf16.mxu1 %v12790_v60  ;;  %v12863_v59 = vld [vmem:[#allocation2 + $0x1200] ss:$52 sps:$4 sm:$0xff]   ;;  %v12866_v60 = vld [vmem:[#allocation2 + $0x1208] ss:$52 sps:$4 sm:$0xff]  }
 0x2b6   :  { %4650 = vmatpush1.bf16.msra.mxu0 %v12785_v61  ;;  %4773 = vmatpush1.bf16.msra.mxu1 %v12788_v62  ;;  %v12871_v61 = vld [vmem:[#allocation2 + $0x126c] ss:$52 sps:$4 sm:$0xff]   ;;  %v12874_v62 = vld [vmem:[#allocation2 + $0x1274] ss:$52 sps:$4 sm:$0xff]  }
 0x2b7   :  { %4660 = vmatprep.subr.bf16.mxu0 %v12793_v63  ;;  %4783 = vmatprep.subr.bf16.mxu1 %v12796_v0  ;;  %v12869_v63 = vld [vmem:[#allocation2 + $0x1268] ss:$52 sps:$4 sm:$0xff]   ;;  %v12872_v0 = vld [vmem:[#allocation2 + $0x1270] ss:$52 sps:$4 sm:$0xff]  }
 0x2b9   :  { %4652 = vmatmul.mubr.bf16.vlgmr.msra.gmra.mrb[8].mxu0 %v14247_v12  ;;  %4775 = vmatmul.mubr.bf16.vlgmr.msra.gmra.mrb[8].mxu1 %v14247_v12 }
 0x2ba   :  { %4661 = vmatpush1.bf16.msra.mxu0 %v12791_v6  ;;  %4784 = vmatpush1.bf16.msra.mxu1 %v12794_v7  ;;  %v12877_v6 = vld [vmem:[#allocation2 + $0x12d4] ss:$52 sps:$4 sm:$0xff]   ;;  %v12880_v7 = vld [vmem:[#allocation2 + $0x12dc] ss:$52 sps:$4 sm:$0xff]  }
 0x2bb   :  { %4662 = vmatprep.subr.bf16.mxu0 %v12799_v8  ;;  %4785 = vmatprep.subr.bf16.mxu1 %v12802_v9  ;;  %v12875_v8 = vld [vmem:[#allocation2 + $0x12d0] ss:$52 sps:$4 sm:$0xff]   ;;  %v12878_v9 = vld [vmem:[#allocation2 + $0x12d8] ss:$52 sps:$4 sm:$0xff]  }
 0x2bc   :  { %4692 = vmatprep.mubr.bf16.mxu0 %v14252_v17  ;;  %4815 = vmatprep.mubr.bf16.mxu1 %v14252_v17 }
 0x2be   :  { %4663 = vmatpush1.bf16.msra.mxu0 %v12797_v10  ;;  %4786 = vmatpush1.bf16.msra.mxu1 %v12800_v11  ;;  %v12883_v10 = vld [vmem:[#allocation2 + $0x133c] ss:$52 sps:$4 sm:$0xff]   ;;  %v12886_v11 = vld [vmem:[#allocation2 + $0x1344] ss:$52 sps:$4 sm:$0xff]  }
 0x2bf   :  { %4664 = vmatprep.subr.bf16.mxu0 %v12805_v13  ;;  %4787 = vmatprep.subr.bf16.mxu1 %v12808_v14  ;;  %v12881_v13 = vld [vmem:[#allocation2 + $0x1338] ss:$52 sps:$4 sm:$0xff]   ;;  %v12884_v14 = vld [vmem:[#allocation2 + $0x1340] ss:$52 sps:$4 sm:$0xff]  }
 0x2c2   :  { %4665 = vmatpush1.bf16.msra.mxu0 %v12803_v15  ;;  %4788 = vmatpush1.bf16.msra.mxu1 %v12806_v16  ;;  %v12887_v15 = vld [vmem:[#allocation2 + $0x370] ss:$52 sps:$4 sm:$0xff]  }
 0x2c3   :  { %4666 = vmatprep.subr.bf16.mxu0 %v12811_v18  ;;  %4789 = vmatprep.subr.bf16.mxu1 %v12814_v19  ;;  %v12888_v16 = vld [vmem:[#allocation2 + $0x9f0] ss:$52 sps:$4 sm:$0xff]  }
 0x2c4   :  { %v12889_v18 = vld [vmem:[#allocation2 + $0x30] ss:$52 sps:$4 sm:$0xff]  }
 0x2c5   :  { %v12890_v19 = vld [vmem:[#allocation2 + $0x6b0] ss:$52 sps:$4 sm:$0xff]  }
 0x2c6   :  { %4667 = vmatpush1.bf16.msra.mxu0 %v12809_v21  ;;  %4790 = vmatpush1.bf16.msra.mxu1 %v12812_v22  ;;  %v12891_v21 = vld [vmem:[#allocation2 + $0x3d8] ss:$52 sps:$4 sm:$0xff]  }
 0x2c7   :  { %4668 = vmatprep.subr.bf16.mxu0 %v12817_v23  ;;  %4791 = vmatprep.subr.bf16.mxu1 %v12820_v24  ;;  %v12892_v22 = vld [vmem:[#allocation2 + $0xa58] ss:$52 sps:$4 sm:$0xff]  }
 0x2c8   :  { %v12893_v23 = vld [vmem:[#allocation2 + $0x98] ss:$52 sps:$4 sm:$0xff]  }
 0x2c9   :  { %v12894_v24 = vld [vmem:[#allocation2 + $0x718] ss:$52 sps:$4 sm:$0xff]  }
 0x2ca   :  { %4669 = vmatpush1.bf16.msra.mxu0 %v12815_v25  ;;  %4792 = vmatpush1.bf16.msra.mxu1 %v12818_v26  ;;  %v12895_v25 = vld [vmem:[#allocation2 + $0x440] ss:$52 sps:$4 sm:$0xff]  }
 0x2cb   :  { %4670 = vmatprep.subr.bf16.mxu0 %v12823_v27  ;;  %4793 = vmatprep.subr.bf16.mxu1 %v12826_v28  ;;  %v12896_v26 = vld [vmem:[#allocation2 + $0xac0] ss:$52 sps:$4 sm:$0xff]  }
 0x2cc   :  { %v12897_v27 = vld [vmem:[#allocation2 + $0x100] ss:$52 sps:$4 sm:$0xff]  }
 0x2cd   :  { %v12898_v28 = vld [vmem:[#allocation2 + $0x780] ss:$52 sps:$4 sm:$0xff]  }
 0x2ce   :  { %4671 = vmatpush1.bf16.msra.mxu0 %v12821_v29  ;;  %4794 = vmatpush1.bf16.msra.mxu1 %v12824_v30  ;;  %v12899_v29 = vld [vmem:[#allocation2 + $0x4a8] ss:$52 sps:$4 sm:$0xff]  }
 0x2cf   :  { %4672 = vmatprep.subr.bf16.mxu0 %v12829_v31  ;;  %4795 = vmatprep.subr.bf16.mxu1 %v12832_v33  ;;  %v12900_v30 = vld [vmem:[#allocation2 + $0xb28] ss:$52 sps:$4 sm:$0xff]  }
 0x2d0   :  { %v12901_v31 = vld [vmem:[#allocation2 + $0x168] ss:$52 sps:$4 sm:$0xff]  }
 0x2d1   :  { %v12902_v33 = vld [vmem:[#allocation2 + $0x7e8] ss:$52 sps:$4 sm:$0xff]  }
 0x2d2   :  { %4673 = vmatpush1.bf16.msra.mxu0 %v12827_v34  ;;  %4796 = vmatpush1.bf16.msra.mxu1 %v12830_v35  ;;  %v853_v34 = vlaneseq  ;;  %v12903_v35 = vld [vmem:[#allocation2 + $0x510] ss:$52 sps:$4 sm:$0xff]  }
 0x2d3   :  { %4674 = vmatprep.subr.bf16.mxu0 %v12835_v36  ;;  %4797 = vmatprep.subr.bf16.mxu1 %v12838_v37  ;;  %v12904_v36 = vld [vmem:[#allocation2 + $0xb90] ss:$52 sps:$4 sm:$0xff]  }
 0x2d4   :  { %v12905_v37 = vld [vmem:[#allocation2 + $0x1d0] ss:$52 sps:$4 sm:$0xff]  }
 0x2d6   :  { %4675 = vmatpush1.bf16.msra.mxu0 %v12833_v38  ;;  %4798 = vmatpush1.bf16.msra.mxu1 %v12836_v39  ;;  %v12906_v38 = vld [vmem:[#allocation2 + $0x850] ss:$52 sps:$4 sm:$0xff]   ;;  %v12908_v39 = vld [vmem:[#allocation2 + $0xbf8] ss:$52 sps:$4 sm:$0xff]  }
 0x2d7   :  { %4676 = vmatprep.subr.bf16.mxu0 %v12841_v40  ;;  %4799 = vmatprep.subr.bf16.mxu1 %v12844_v41  ;;  %v14301_v40 = vld [vmem:[#allocation4] sm:$0xff]  ;;  %v12909_v41 = vld [vmem:[#allocation2 + $0x238] ss:$52 sps:$4 sm:$0xff]  }
 0x2da   :  { %4677 = vmatpush1.bf16.msra.mxu0 %v12839_v42  ;;  %4800 = vmatpush1.bf16.msra.mxu1 %v12842_v43  ;;  %v12910_v42 = vld [vmem:[#allocation2 + $0x8b8] ss:$52 sps:$4 sm:$0xff]  }
 0x2db   :  { %4678 = vmatprep.subr.bf16.mxu0 %v12847_v44  ;;  %4801 = vmatprep.subr.bf16.mxu1 %v12850_v45  ;;  %v12911_v44 = vld [vmem:[#allocation2 + $0x5e0] ss:$52 sps:$4 sm:$0xff]  }
 0x2dc   :  { %v12912_v45 = vld [vmem:[#allocation2 + $0xc60] ss:$52 sps:$4 sm:$0xff]  }
 0x2de   :  { %4679 = vmatpush1.bf16.msra.mxu0 %v12845_v46  ;;  %4802 = vmatpush1.bf16.msra.mxu1 %v12848_v47 }
 0x2df   :  { %4680 = vmatprep.subr.bf16.mxu0 %v12853_v49  ;;  %4803 = vmatprep.subr.bf16.mxu1 %v12856_v50  ;;  %v12913_v49 = vld [vmem:[#allocation2 + $0x2a0] ss:$52 sps:$4 sm:$0xff]  }
 0x2e0   :  { %v12914_v50 = vld [vmem:[#allocation2 + $0x920] ss:$52 sps:$4 sm:$0xff]  }
 0x2e2   :  { %4681 = vmatpush1.bf16.msra.mxu0 %v12851_v51  ;;  %4804 = vmatpush1.bf16.msra.mxu1 %v12854_v52 }
 0x2e3   :  { %4682 = vmatprep.subr.bf16.mxu0 %v12859_v53  ;;  %4805 = vmatprep.subr.bf16.mxu1 %v12862_v54 }
 0x2e6   :  { %4683 = vmatpush1.bf16.msra.mxu0 %v12857_v55  ;;  %4806 = vmatpush1.bf16.msra.mxu1 %v12860_v56 }
 0x2e7   :  { %4684 = vmatprep.subr.bf16.mxu0 %v12865_v57  ;;  %4807 = vmatprep.subr.bf16.mxu1 %v12868_v58  ;;  %v12915_v58 = vld [vmem:[#allocation2 + $0x648] ss:$52 sps:$4 sm:$0xff]  }
 0x2ea   :  { %4685 = vmatpush1.bf16.msra.mxu0 %v12863_v59  ;;  %4808 = vmatpush1.bf16.msra.mxu1 %v12866_v60  ;;  %v12916_v59 = vld [vmem:[#allocation2 + $0xcc8] ss:$52 sps:$4 sm:$0xff]  }
 0x2eb   :  { %4686 = vmatprep.subr.bf16.mxu0 %v12871_v61  ;;  %4809 = vmatprep.subr.bf16.mxu1 %v12874_v62  ;;  %v12917_v60 = vld [vmem:[#allocation2 + $0x308] ss:$52 sps:$4 sm:$0xff]  }
 0x2ec   :  { %v12918_v62 = vld [vmem:[#allocation2 + $0x988] ss:$52 sps:$4 sm:$0xff]  }
 0x2ee   :  { %4687 = vmatpush1.bf16.msra.mxu0 %v12869_v63  ;;  %4810 = vmatpush1.bf16.msra.mxu1 %v12872_v0  ;;  %v12919_v63 = vld [vmem:[#allocation2 + $0x1070] ss:$52 sps:$4 sm:$0xff]  }
 0x2ef   :  { %4688 = vmatprep.subr.bf16.mxu0 %v12877_v6  ;;  %4811 = vmatprep.subr.bf16.mxu1 %v12880_v7  ;;  %v12922_v0 = vld [vmem:[#allocation6 + $0x4] ss:$20 sps:$4 sm:$0xff]   ;;  %v12920_v6 = vld [vmem:[#allocation6] ss:$20 sps:$4 sm:$0xff]  }
 0x2f0   :  { %v12923_v7 = vld [vmem:[#allocation2 + $0xd30] ss:$52 sps:$4 sm:$0xff]  }
 0x2f2   :  { %4689 = vmatpush1.bf16.msra.mxu0 %v12875_v8  ;;  %4812 = vmatpush1.bf16.msra.mxu1 %v12878_v9  ;;  %v12924_v9 = vld [vmem:[#allocation2 + $0x10d8] ss:$52 sps:$4 sm:$0xff]  }
 0x2f3   :  { %4690 = vmatprep.subr.bf16.mxu0 %v12883_v10  ;;  %4813 = vmatprep.subr.bf16.mxu1 %v12886_v11  ;;  %v12927_v10 = vld [vmem:[#allocation6 + $0x2c] ss:$20 sps:$4 sm:$0xff]  }
 0x2f6   :  { %4691 = vmatpush1.bf16.msra.mxu0 %v12881_v13  ;;  %4814 = vmatpush1.bf16.msra.mxu1 %v12884_v14  ;;  %v12928_v13 = vld [vmem:[#allocation2 + $0xd98] ss:$52 sps:$4 sm:$0xff]   ;;  %v12929_v14 = vld [vmem:[#allocation2 + $0x1140] ss:$52 sps:$4 sm:$0xff]  }
 0x2f7   :  { %11546 = vmatprep.subr.bf16.mxu0 %v12887_v15  ;;  %11568 = vmatprep.subr.bf16.mxu1 %v12888_v16  ;;  %v12932_v15 = vld [vmem:[#allocation6 + $0x54] ss:$20 sps:$4 sm:$0xff]   ;;  %v12930_v16 = vld [vmem:[#allocation6 + $0x50] ss:$20 sps:$4 sm:$0xff]  }
 0x2f9   :  { %4693 = vmatmul.mubr.bf16.vlgmr.msra.gmra.mrb[8].mxu0 %v14261_v20  ;;  %4816 = vmatmul.mubr.bf16.vlgmr.msra.gmra.mrb[8].mxu1 %v14261_v20 }
 0x2fa   :  { %11547 = vmatpush3.bf16.msra.mxu0 %v12889_v18  ;;  %11569 = vmatpush3.bf16.msra.mxu1 %v12890_v19  ;;  %v12933_v18 = vld [vmem:[#allocation2 + $0xe00] ss:$52 sps:$4 sm:$0xff]   ;;  %v12935_v19 = vld [vmem:[#allocation6 + $0x78] ss:$20 sps:$4 sm:$0xff]  }
 0x2fb   :  { %11548 = vmatprep.subr.bf16.mxu0 %v12891_v21  ;;  %11570 = vmatprep.subr.bf16.mxu1 %v12892_v22  ;;  %v12938_v21 = vld [vmem:[#allocation2 + $0xe68] ss:$52 sps:$4 sm:$0xff]   ;;  %v12939_v22 = vld [vmem:[#allocation2 + $0x1210] ss:$52 sps:$4 sm:$0xff]  }
 0x2fc   :  { %4856 = vmatprep.mubr.bf16.mxu0 %v14226_v48  ;;  %4896 = vmatprep.mubr.bf16.mxu1 %v14240_v32  ;;  %v14299_v48 = vshrl.u32 %v853_v34, 7  ;;  %v12907_v32 = vld [vmem:[#allocation2 + $0x578] ss:$52 sps:$4 sm:$0xff]   ;;  %v12954_v34 = vld [vmem:[#allocation2 + $0x1348] ss:$52 sps:$4 sm:$0xff]  }
 0x2fe   :  { %11549 = vmatpush3.bf16.msra.mxu0 %v12893_v23  ;;  %11571 = vmatpush3.bf16.msra.mxu1 %v12894_v24  ;;  %v14304_v43 = vsub.s32 1, %v14299_v48  ;;  %v12942_v23 = vld [vmem:[#allocation6 + $0xa4] ss:$20 sps:$4 sm:$0xff]   ;;  %v12940_v24 = vld [vmem:[#allocation6 + $0xa0] ss:$20 sps:$4 sm:$0xff]  }
 0x2ff   :  { %11550 = vmatprep.subr.bf16.mxu0 %v12895_v25  ;;  %11572 = vmatprep.subr.bf16.mxu1 %v12896_v26  ;;  %v12943_v25 = vld [vmem:[#allocation2 + $0xed0] ss:$52 sps:$4 sm:$0xff]  }
 0x300   :  { %v860_v51 = vrot.slane %v14301_v40, %v14304_v43  ;;  %v12947_v26 = vld [vmem:[#allocation6 + $0xcc] ss:$20 sps:$4 sm:$0xff]  }
 0x302   :  { %11551 = vmatpush3.bf16.msra.mxu0 %v12897_v27  ;;  %11573 = vmatpush3.bf16.msra.mxu1 %v12898_v28  ;;  %v11891_v61 = vadd.f32 %v14283_v3, %v860_v51  ;;  %v12925_v3 = vld [vmem:[#allocation6 + $0x28] ss:$20 sps:$4 sm:$0xff]  }
 0x303   :  { %11552 = vmatprep.subr.bf16.mxu0 %v12899_v29  ;;  %11574 = vmatprep.subr.bf16.mxu1 %v12900_v30  ;;  %v12945_v27 = vld [vmem:[#allocation6 + $0xc8] ss:$20 sps:$4 sm:$0xff]  }
 0x304   :  { %v4945_v8 = vmax.f32 %v11891_v61, 0.0  ;;  %v12948_v28 = vld [vmem:[#allocation2 + $0xf38] ss:$52 sps:$4 sm:$0xff]   ;;  %v12949_v29 = vld [vmem:[#allocation2 + $0x12e0] ss:$52 sps:$4 sm:$0xff]  }
 0x305   :  { %v12952_v30 = vld [vmem:[#allocation6 + $0xf4] ss:$20 sps:$4 sm:$0xff]   ;;  %v12976_v51 = vld [vmem:[#allocation6 + $0x5c] ss:$20 sps:$4 sm:$0xff]  }
 0x306   :  { %11553 = vmatpush3.bf16.msra.mxu0 %v12901_v31  ;;  %11575 = vmatpush3.bf16.msra.mxu1 %v12902_v33  ;;  %v14317_v11 = vpack.c.bf16 %v4945_v8, %v4945_v8  ;;  %v12950_v31 = vld [vmem:[#allocation6 + $0xf0] ss:$20 sps:$4 sm:$0xff]   ;;  %v12983_v61 = vld [vmem:[#allocation6 + $0x1e0] ss:$20 sps:$4 sm:$0xff]   ;;  %v12989_v8 = vld [vmem:[#allocation6 + $0x208] ss:$20 sps:$4 sm:$0xff]  }
 0x307   :  { %11554 = vmatprep.subr.bf16.mxu0 %v12903_v35  ;;  %11576 = vmatprep.subr.bf16.mxu1 %v12904_v36  ;;  %v12953_v33 = vld [vmem:[#allocation2 + $0xfa0] ss:$52 sps:$4 sm:$0xff]   ;;  %v12955_v36 = vld [vmem:[#allocation6 + $0x118] ss:$20 sps:$4 sm:$0xff]  }
 0x308   :  { %v12957_v35 = vld [vmem:[#allocation6 + $0x11c] ss:$20 sps:$4 sm:$0xff]  }
 0x30a   :  { %11555 = vmatpush3.bf16.msra.mxu0 %v12905_v37  ;;  %11577 = vmatpush3.bf16.msra.mxu1 %v12906_v38  ;;  %v12958_v37 = vld [vmem:[#allocation2 + $0x1008] ss:$52 sps:$4 sm:$0xff]  }
 0x30b   :  { %11556 = vmatprep.subr.bf16.mxu0 %v12907_v32  ;;  %11578 = vmatprep.subr.bf16.mxu1 %v12908_v39  ;;  %v12961_v38 = vld [vmem:[#allocation6 + $0x144] ss:$20 sps:$4 sm:$0xff]   ;;  %v12964_v32 = vld [vmem:[#allocation6 + $0xc] ss:$20 sps:$4 sm:$0xff]  }
 0x30c   :  { %v14306_v46 = vpop.f32.mrb[4].mxu0  ;;  %v14308_v47 = vpop.f32.mrb[4].mxu1  ;;  %v12959_v39 = vld [vmem:[#allocation6 + $0x140] ss:$20 sps:$4 sm:$0xff]  }
 0x30d   :  { %v14312_v52 = vpop.f32.mrb[5].mxu0  ;;  %v14314_v53 = vpop.f32.mrb[5].mxu1 }
 0x30e   :  { %v4452_v54 = vpop.f32.mrb[6].mxu0  ;;  %v4575_v55 = vpop.f32.mrb[6].mxu1  ;;  %11557 = vmatpush3.bf16.msra.mxu0 %v12909_v41  ;;  %11579 = vmatpush3.bf16.msra.mxu1 %v12910_v42  ;;  %v12962_v41 = vld [vmem:[#allocation6 + $0x8] ss:$20 sps:$4 sm:$0xff]   ;;  %v12967_v42 = vld [vmem:[#allocation6 + $0x16c] ss:$20 sps:$4 sm:$0xff]  }
 0x30f   :  { %v4453_v56 = vpop.f32.mrb[7].mxu0  ;;  %v4576_v57 = vpop.f32.mrb[7].mxu1  ;;  %11558 = vmatprep.subr.bf16.mxu0 %v12911_v44  ;;  %11580 = vmatprep.subr.bf16.mxu1 %v12912_v45  ;;  %v12965_v44 = vld [vmem:[#allocation6 + $0x168] ss:$20 sps:$4 sm:$0xff]   ;;  %v12971_v54 = vld [vmem:[#allocation6 + $0x190] ss:$20 sps:$4 sm:$0xff]  }
 0x310   :  { %v12970_v45 = vld [vmem:[#allocation6 + $0x34] ss:$20 sps:$4 sm:$0xff]   ;;  %v12974_v55 = vld [vmem:[#allocation6 + $0x58] ss:$20 sps:$4 sm:$0xff]   ;;  %v12979_v56 = vld [vmem:[#allocation6 + $0x1bc] ss:$20 sps:$4 sm:$0xff]  }
 0x311   :  { %v12982_v57 = vld [vmem:[#allocation6 + $0x84] ss:$20 sps:$4 sm:$0xff]  }
 0x312   :  { %11559 = vmatpush3.bf16.msra.mxu0 %v12913_v49  ;;  %11581 = vmatpush3.bf16.msra.mxu1 %v12914_v50  ;;  %v12968_v49 = vld [vmem:[#allocation6 + $0x30] ss:$20 sps:$4 sm:$0xff]   ;;  %v12973_v50 = vld [vmem:[#allocation6 + $0x194] ss:$20 sps:$4 sm:$0xff]  }
 0x313   :  { %11560 = vmatprep.subr.bf16.mxu0 %v12915_v58  ;;  %11582 = vmatprep.subr.bf16.mxu1 %v12916_v59  ;;  %v12977_v58 = vld [vmem:[#allocation6 + $0x1b8] ss:$20 sps:$4 sm:$0xff]   ;;  %v12980_v59 = vld [vmem:[#allocation6 + $0x80] ss:$20 sps:$4 sm:$0xff]  }
 0x316   :  { %11561 = vmatpush3.bf16.msra.mxu0 %v12917_v60  ;;  %11583 = vmatpush3.bf16.msra.mxu1 %v12918_v62  ;;  %v12988_v60 = vld [vmem:[#allocation6 + $0xac] ss:$20 sps:$4 sm:$0xff]   ;;  %v12986_v62 = vld [vmem:[#allocation6 + $0xa8] ss:$20 sps:$4 sm:$0xff]  }
 0x317   :  { %11590 = vmatprep.subr.bf16.mxu0 %v12919_v63  ;;  %8325 = vmatprep.subr.bf16.mxu1 %v12922_v0  ;;  %v14326_v63 = vsub.s32 0, %v14299_v48  ;;  %v14329_v0 = vsub.s32 3, %v14299_v48 }
 0x319   :  { %4857 = vmatmul.mubr.bf16.vlgmr.msra.gmra.mrb[12].mxu0 %v14233_v5  ;;  %4897 = vmatmul.mubr.bf16.vlgmr.msra.gmra.mrb[12].mxu1 %v14247_v12  ;;  %v12934_v5 = vld [vmem:[#allocation2 + $0x11a8] ss:$52 sps:$4 sm:$0xff]  }
 0x31a   :  { %11591 = vmatpush3.bf16.msra.mxu0 %v12923_v7  ;;  %8326 = vmatpush1.bf16.msra.mxu1 %v12920_v6  ;;  %v12937_v12 = vld [vmem:[#allocation6 + $0x7c] ss:$20 sps:$4 sm:$0xff]   ;;  %v12991_v6 = vld [vmem:[#allocation6 + $0x20c] ss:$20 sps:$4 sm:$0xff]   ;;  %v12994_v7 = vld [vmem:[#allocation6 + $0xd4] ss:$20 sps:$4 sm:$0xff]  }
 0x31b   :  { %8357 = vmatprep.mubr.bf16.mxu1 %v14317_v11  ;;  %11592 = vmatprep.subr.bf16.mxu0 %v12924_v9  ;;  %v12992_v9 = vld [vmem:[#allocation6 + $0xd0] ss:$20 sps:$4 sm:$0xff]  }
 0x31c   :  { %8327 = vmatprep.subr.bf16.mxu1 %v12927_v10  ;;  %4936 = vmatprep.mubr.bf16.mxu0 %v14252_v17  ;;  %v12944_v17 = vld [vmem:[#allocation2 + $0x1278] ss:$52 sps:$4 sm:$0xff]  }
 0x31d   :  { %v12997_v10 = vld [vmem:[#allocation6 + $0x234] ss:$20 sps:$4 sm:$0xff]  }
 0x31e   :  { %11593 = vmatpush3.bf16.msra.mxu0 %v12928_v13  ;;  %8328 = vmatpush1.bf16.msra.mxu1 %v12925_v3  ;;  %v856_v3 = vrot.slane %v14301_v40, %v14326_v63  ;;  %v868_v13 = vrot.slane %v14301_v40, %v14329_v0 }
 0x31f   :  { %11594 = vmatprep.subr.bf16.mxu0 %v12929_v14  ;;  %8329 = vmatprep.subr.bf16.mxu1 %v12932_v15  ;;  %v13000_v14 = vld [vmem:[#allocation6 + $0xfc] ss:$20 sps:$4 sm:$0xff]  }
 0x320   :  { %v12995_v15 = vld [vmem:[#allocation6 + $0x230] ss:$20 sps:$4 sm:$0xff]  }
 0x322   :  { %11595 = vmatpush3.bf16.msra.mxu0 %v12933_v18  ;;  %8330 = vmatpush1.bf16.msra.mxu1 %v12930_v16  ;;  %v12998_v16 = vld [vmem:[#allocation6 + $0xf8] ss:$20 sps:$4 sm:$0xff]   ;;  %v13003_v18 = vld [vmem:[#allocation6 + $0x25c] ss:$20 sps:$4 sm:$0xff]  }
 0x323   :  { %11596 = vmatprep.subr.bf16.mxu0 %v12934_v5  ;;  %8331 = vmatprep.subr.bf16.mxu1 %v12937_v12  ;;  %v13006_v5 = vld [vmem:[#allocation6 + $0x124] ss:$20 sps:$4 sm:$0xff]   ;;  %v11890_v12 = vadd.f32 %v14279_v1, %v856_v3  ;;  %v13066_v3 = vld [vmem:[#allocation6 + $0x2b4] ss:$20 sps:$4 sm:$0xff]  }
 0x326   :  { %11597 = vmatpush3.bf16.msra.mxu0 %v12938_v21  ;;  %8332 = vmatpush1.bf16.msra.mxu1 %v12935_v19  ;;  %v11893_v19 = vadd.f32 %v14285_v4, %v868_v13  ;;  %v13001_v21 = vld [vmem:[#allocation6 + $0x258] ss:$20 sps:$4 sm:$0xff]   ;;  %v13061_v13 = vld [vmem:[#allocation6 + $0x3e8] ss:$20 sps:$4 sm:$0xff]  }
 0x327   :  { %11598 = vmatprep.subr.bf16.mxu0 %v12939_v22  ;;  %8333 = vmatprep.subr.bf16.mxu1 %v12942_v23  ;;  %v13004_v22 = vld [vmem:[#allocation6 + $0x120] ss:$20 sps:$4 sm:$0xff]   ;;  %v4944_v23 = vmax.f32 %v11890_v12, 0.0  ;;  %v13070_v12 = vld [vmem:[#allocation6 + $0x2d8] ss:$20 sps:$4 sm:$0xff]  }
 0x329   :  { %v14337_v1 = vpack.c.bf16 %v4944_v23, %v4944_v23 }
 0x32a   :  { %11599 = vmatpush3.bf16.msra.mxu0 %v12943_v25  ;;  %8334 = vmatpush1.bf16.msra.mxu1 %v12940_v24  ;;  %v4947_v24 = vmax.f32 %v11893_v19, 0.0  ;;  %v13009_v25 = vld [vmem:[#allocation6 + $0x284] ss:$20 sps:$4 sm:$0xff]   ;;  %v13075_v19 = vld [vmem:[#allocation6 + $0x43c] ss:$20 sps:$4 sm:$0xff]  }
 0x32b   :  { %11600 = vmatprep.subr.bf16.mxu0 %v12944_v17  ;;  %8335 = vmatprep.subr.bf16.mxu1 %v12947_v26  ;;  %v13012_v17 = vld [vmem:[#allocation6 + $0x14c] ss:$20 sps:$4 sm:$0xff]  }
 0x32c   :  { %v13007_v26 = vld [vmem:[#allocation6 + $0x280] ss:$20 sps:$4 sm:$0xff]   ;;  %v14339_v4 = vpack.c.bf16 %v4947_v24, %v4947_v24 }
 0x32d   :  { %v13076_v24 = vld [vmem:[#allocation6 + $0x300] ss:$20 sps:$4 sm:$0xff]  }
 0x32e   :  { %11601 = vmatpush3.bf16.msra.mxu0 %v12948_v28  ;;  %8336 = vmatpush1.bf16.msra.mxu1 %v12945_v27  ;;  %v13010_v27 = vld [vmem:[#allocation6 + $0x148] ss:$20 sps:$4 sm:$0xff]   ;;  %v13015_v28 = vld [vmem:[#allocation6 + $0x2ac] ss:$20 sps:$4 sm:$0xff]  }
 0x32f   :  { %11602 = vmatprep.subr.bf16.mxu0 %v12949_v29  ;;  %8337 = vmatprep.subr.bf16.mxu1 %v12952_v30  ;;  %v13018_v29 = vld [vmem:[#allocation6 + $0x174] ss:$20 sps:$4 sm:$0xff]  }
 0x330   :  { %v13013_v30 = vld [vmem:[#allocation6 + $0x2a8] ss:$20 sps:$4 sm:$0xff]  }
 0x332   :  { %11603 = vmatpush3.bf16.msra.mxu0 %v12953_v33  ;;  %8338 = vmatpush1.bf16.msra.mxu1 %v12950_v31  ;;  %v13016_v31 = vld [vmem:[#allocation6 + $0x170] ss:$20 sps:$4 sm:$0xff]   ;;  %v13021_v33 = vld [vmem:[#allocation6 + $0x2d4] ss:$20 sps:$4 sm:$0xff]  }
 0x333   :  { %11604 = vmatprep.subr.bf16.mxu0 %v12954_v34  ;;  %8339 = vmatprep.subr.bf16.mxu1 %v12957_v35  ;;  %v13019_v34 = vld [vmem:[#allocation6 + $0x2d0] ss:$20 sps:$4 sm:$0xff]  }
 0x334   :  { %v13024_v35 = vld [vmem:[#allocation6 + $0x19c] ss:$20 sps:$4 sm:$0xff]  }
 0x336   :  { %11605 = vmatpush3.bf16.msra.mxu0 %v12958_v37  ;;  %8340 = vmatpush1.bf16.msra.mxu1 %v12955_v36  ;;  %v13022_v36 = vld [vmem:[#allocation6 + $0x198] ss:$20 sps:$4 sm:$0xff]   ;;  %v13027_v37 = vld [vmem:[#allocation6 + $0x2fc] ss:$20 sps:$4 sm:$0xff]  }
 0x337   :  { %8341 = vmatprep.subr.bf16.mxu1 %v12961_v38  ;;  %8612 = vmatprep.subr.bf16.mxu0 %v12964_v32  ;;  %v13025_v38 = vld [vmem:[#allocation6 + $0x2f8] ss:$20 sps:$4 sm:$0xff]  }
 0x338   :  { %v13030_v32 = vld [vmem:[#allocation6 + $0x1c4] ss:$20 sps:$4 sm:$0xff]  }
 0x339   :  { %4937 = vmatmul.mubr.bf16.vlgmr.msra.gmra.mrb[16].mxu0 %v14261_v20  ;;  %v12985_v20 = vld [vmem:[#allocation6 + $0x1e4] ss:$20 sps:$4 sm:$0xff]  }
 0x33a   :  { %8342 = vmatpush1.bf16.msra.mxu1 %v12959_v39  ;;  %8613 = vmatpush1.bf16.msra.mxu0 %v12962_v41  ;;  %v13028_v39 = vld [vmem:[#allocation6 + $0x1c0] ss:$20 sps:$4 sm:$0xff]   ;;  %v13033_v41 = vld [vmem:[#allocation6 + $0x324] ss:$20 sps:$4 sm:$0xff]  }
 0x33b   :  { %8644 = vmatprep.mubr.bf16.mxu0 %v14317_v11  ;;  %8343 = vmatprep.subr.bf16.mxu1 %v12967_v42  ;;  %v13031_v42 = vld [vmem:[#allocation6 + $0x320] ss:$20 sps:$4 sm:$0xff]  }
 0x33c   :  { %8614 = vmatprep.subr.bf16.mxu0 %v12970_v45  ;;  %v13034_v45 = vld [vmem:[#allocation6 + $0x1e8] ss:$20 sps:$4 sm:$0xff]  }
 0x33e   :  { %8344 = vmatpush1.bf16.msra.mxu1 %v12965_v44  ;;  %8615 = vmatpush1.bf16.msra.mxu0 %v12968_v49  ;;  %v13036_v44 = vld [vmem:[#allocation6 + $0x1ec] ss:$20 sps:$4 sm:$0xff]  }
 0x33f   :  { %8345 = vmatprep.subr.bf16.mxu1 %v12973_v50  ;;  %8616 = vmatprep.subr.bf16.mxu0 %v12976_v51  ;;  %v13039_v49 = vld [vmem:[#allocation6 + $0x34c] ss:$20 sps:$4 sm:$0xff]   ;;  %v13037_v50 = vld [vmem:[#allocation6 + $0x348] ss:$20 sps:$4 sm:$0xff]  }
 0x340   :  { %v13042_v51 = vld [vmem:[#allocation6 + $0x214] ss:$20 sps:$4 sm:$0xff]  }
 0x342   :  { %8346 = vmatpush1.bf16.msra.mxu1 %v12971_v54  ;;  %8617 = vmatpush1.bf16.msra.mxu0 %v12974_v55  ;;  %v13040_v54 = vld [vmem:[#allocation6 + $0x210] ss:$20 sps:$4 sm:$0xff]   ;;  %v13045_v55 = vld [vmem:[#allocation6 + $0x374] ss:$20 sps:$4 sm:$0xff]  }
 0x343   :  { %8347 = vmatprep.subr.bf16.mxu1 %v12979_v56  ;;  %8618 = vmatprep.subr.bf16.mxu0 %v12982_v57  ;;  %v13043_v56 = vld [vmem:[#allocation6 + $0x370] ss:$20 sps:$4 sm:$0xff]  }
 0x344   :  { %v13048_v57 = vld [vmem:[#allocation6 + $0x23c] ss:$20 sps:$4 sm:$0xff]  }
 0x346   :  { %8348 = vmatpush1.bf16.msra.mxu1 %v12977_v58  ;;  %8619 = vmatpush1.bf16.msra.mxu0 %v12980_v59  ;;  %v13046_v58 = vld [vmem:[#allocation6 + $0x238] ss:$20 sps:$4 sm:$0xff]   ;;  %v13051_v59 = vld [vmem:[#allocation6 + $0x39c] ss:$20 sps:$4 sm:$0xff]  }
 0x347   :  { %8349 = vmatprep.subr.bf16.mxu1 %v12985_v20  ;;  %8620 = vmatprep.subr.bf16.mxu0 %v12988_v60  ;;  %v13054_v20 = vld [vmem:[#allocation6 + $0x264] ss:$20 sps:$4 sm:$0xff]  }
 0x348   :  { %v13049_v60 = vld [vmem:[#allocation6 + $0x398] ss:$20 sps:$4 sm:$0xff]  }
 0x34a   :  { %8350 = vmatpush1.bf16.msra.mxu1 %v12983_v61  ;;  %8621 = vmatpush1.bf16.msra.mxu0 %v12986_v62  ;;  %v14344_v61 = vsub.s32 2, %v14299_v48  ;;  %v13052_v62 = vld [vmem:[#allocation6 + $0x260] ss:$20 sps:$4 sm:$0xff]  }
 0x34b   :  { %8351 = vmatprep.subr.bf16.mxu1 %v12991_v6  ;;  %8622 = vmatprep.subr.bf16.mxu0 %v12994_v7  ;;  %v13057_v6 = vld [vmem:[#allocation6 + $0x3c4] ss:$20 sps:$4 sm:$0xff]   ;;  %v13055_v7 = vld [vmem:[#allocation6 + $0x3c0] ss:$20 sps:$4 sm:$0xff]  }
 0x34e   :  { %8352 = vmatpush1.bf16.msra.mxu1 %v12989_v8  ;;  %8623 = vmatpush1.bf16.msra.mxu0 %v12992_v9  ;;  %v13060_v8 = vld [vmem:[#allocation6 + $0x28c] ss:$20 sps:$4 sm:$0xff]   ;;  %v13058_v9 = vld [vmem:[#allocation6 + $0x288] ss:$20 sps:$4 sm:$0xff]  }
 0x34f   :  { %8353 = vmatprep.subr.bf16.mxu1 %v12997_v10  ;;  %8624 = vmatprep.subr.bf16.mxu0 %v13000_v14  ;;  %v13063_v10 = vld [vmem:[#allocation6 + $0x3ec] ss:$20 sps:$4 sm:$0xff]   ;;  %v13064_v14 = vld [vmem:[#allocation6 + $0x2b0] ss:$20 sps:$4 sm:$0xff]  }
 0x352   :  { %8354 = vmatpush1.bf16.msra.mxu1 %v12995_v15  ;;  %8625 = vmatpush1.bf16.msra.mxu0 %v12998_v16  ;;  %v13069_v15 = vld [vmem:[#allocation6 + $0x414] ss:$20 sps:$4 sm:$0xff]   ;;  %v13067_v16 = vld [vmem:[#allocation6 + $0x410] ss:$20 sps:$4 sm:$0xff]  }
 0x353   :  { %8355 = vmatprep.subr.bf16.mxu1 %v13003_v18  ;;  %8626 = vmatprep.subr.bf16.mxu0 %v13006_v5  ;;  %v13072_v18 = vld [vmem:[#allocation6 + $0x2dc] ss:$20 sps:$4 sm:$0xff]   ;;  %v864_v5 = vrot.slane %v14301_v40, %v14344_v61  ;;  %v875_v40 = vsub.s32 5, %v14299_v48 }
 0x355   :  { %v11892_v23 = vadd.f32 %v14281_v2, %v864_v5  ;;  %v13093_v2 = vld [vmem:[#allocation6 + $0x4b4] ss:$20 sps:$4 sm:$0xff]  }
 0x356   :  { %8356 = vmatpush1.bf16.msra.mxu1 %v13001_v21  ;;  %8627 = vmatpush1.bf16.msra.mxu0 %v13004_v22  ;;  %v13073_v21 = vld [vmem:[#allocation6 + $0x438] ss:$20 sps:$4 sm:$0xff]   ;;  %v13138_v5 = vld [vmem:[#allocation6 + $0x494] ss:$20 sps:$4 sm:$0xff]  }
 0x357   :  { %8366 = vmatprep.subr.bf16.mxu1 %v13009_v25  ;;  %8628 = vmatprep.subr.bf16.mxu0 %v13012_v17  ;;  %v13078_v22 = vld [vmem:[#allocation6 + $0x304] ss:$20 sps:$4 sm:$0xff]   ;;  %v13079_v17 = vld [vmem:[#allocation6 + $0x460] ss:$20 sps:$4 sm:$0xff]  }
 0x358   :  { %v13081_v25 = vld [vmem:[#allocation6 + $0x464] ss:$20 sps:$4 sm:$0xff]  }
 0x359   :  { %8358 = vmatmul.mubr.bf16.vlgmr.msra.gmra.mrb[16].mxu1 %v14337_v1 }
 0x35a   :  { %8367 = vmatpush1.bf16.msra.mxu1 %v13007_v26  ;;  %8398 = vmatprep.mubr.bf16.mxu1 %v14339_v4  ;;  %v13084_v26 = vld [vmem:[#allocation6 + $0x32c] ss:$20 sps:$4 sm:$0xff]  }
 0x35b   :  { %8629 = vmatpush1.bf16.msra.mxu0 %v13010_v27  ;;  %8368 = vmatprep.subr.bf16.mxu1 %v13015_v28  ;;  %v4946_v27 = vmax.f32 %v11892_v23, 0.0  ;;  %v13082_v28 = vld [vmem:[#allocation6 + $0x328] ss:$20 sps:$4 sm:$0xff]   ;;  %v13142_v23 = vld [vmem:[#allocation6 + $0x4b8] ss:$20 sps:$4 sm:$0xff]  }
 0x35c   :  { %8630 = vmatprep.subr.bf16.mxu0 %v13018_v29  ;;  %v13087_v29 = vld [vmem:[#allocation6 + $0x48c] ss:$20 sps:$4 sm:$0xff]  }
 0x35e   :  { %8369 = vmatpush1.bf16.msra.mxu1 %v13013_v30  ;;  %v13085_v30 = vld [vmem:[#allocation6 + $0x488] ss:$20 sps:$4 sm:$0xff]  }
 0x35f   :  { %8631 = vmatpush1.bf16.msra.mxu0 %v13016_v31  ;;  %8370 = vmatprep.subr.bf16.mxu1 %v13021_v33  ;;  %v13090_v31 = vld [vmem:[#allocation6 + $0x354] ss:$20 sps:$4 sm:$0xff]   ;;  %v13088_v33 = vld [vmem:[#allocation6 + $0x350] ss:$20 sps:$4 sm:$0xff]  }
 0x360   :  { %8632 = vmatprep.subr.bf16.mxu0 %v13024_v35 }
 0x362   :  { %8371 = vmatpush1.bf16.msra.mxu1 %v13019_v34  ;;  %v14352_v34 = vld [vmem:[#allocation4] sm:$0xff] }
 0x363   :  { %8633 = vmatpush1.bf16.msra.mxu0 %v13022_v36  ;;  %8372 = vmatprep.subr.bf16.mxu1 %v13027_v37  ;;  %v876_v35 = vrot.slane %v14352_v34, %v875_v40  ;;  %v13091_v36 = vld [vmem:[#allocation6 + $0x4b0] ss:$20 sps:$4 sm:$0xff]   ;;  %v13151_v40 = vld [vmem:[#allocation6 + $0x640] ss:$20 sps:$4 sm:$0xff]  }
 0x364   :  { %8634 = vmatprep.subr.bf16.mxu0 %v13030_v32  ;;  %v13096_v37 = vld [vmem:[#allocation6 + $0x37c] ss:$20 sps:$4 sm:$0xff]  }
 0x365   :  { %v13099_v32 = vld [vmem:[#allocation6 + $0x4dc] ss:$20 sps:$4 sm:$0xff]  }
 0x366   :  { %8373 = vmatpush1.bf16.msra.mxu1 %v13025_v38  ;;  %v13094_v38 = vld [vmem:[#allocation6 + $0x378] ss:$20 sps:$4 sm:$0xff]  }
 0x367   :  { %8635 = vmatpush1.bf16.msra.mxu0 %v13028_v39  ;;  %8374 = vmatprep.subr.bf16.mxu1 %v13033_v41  ;;  %v11895_v39 = vadd.f32 %v14312_v52, %v876_v35  ;;  %v13097_v41 = vld [vmem:[#allocation6 + $0x4d8] ss:$20 sps:$4 sm:$0xff]   ;;  %v13165_v35 = vld [vmem:[#allocation6 + $0x694] ss:$20 sps:$4 sm:$0xff]  }
 0x368   :  { %8636 = vmatprep.subr.bf16.mxu0 %v13036_v44  ;;  %v13100_v44 = vld [vmem:[#allocation6 + $0x3a0] ss:$20 sps:$4 sm:$0xff]  }
 0x36a   :  { %8375 = vmatpush1.bf16.msra.mxu1 %v13031_v42  ;;  %v13102_v42 = vld [vmem:[#allocation6 + $0x3a4] ss:$20 sps:$4 sm:$0xff]  }
 0x36b   :  { %8637 = vmatpush1.bf16.msra.mxu0 %v13034_v45  ;;  %8376 = vmatprep.subr.bf16.mxu1 %v13039_v49  ;;  %v13105_v45 = vld [vmem:[#allocation6 + $0x504] ss:$20 sps:$4 sm:$0xff]   ;;  %v4949_v49 = vmax.f32 %v11895_v39, 0.0 }
 0x36c   :  { %8638 = vmatprep.subr.bf16.mxu0 %v13042_v51  ;;  %v13108_v51 = vld [vmem:[#allocation6 + $0x3cc] ss:$20 sps:$4 sm:$0xff]  }
 0x36d   :  { %v14358_v52 = vpack.c.bf16 %v4949_v49, %v4949_v49  ;;  %v13166_v39 = vld [vmem:[#allocation6 + $0x558] ss:$20 sps:$4 sm:$0xff]  }
 0x36e   :  { %8377 = vmatpush1.bf16.msra.mxu1 %v13037_v50  ;;  %v13103_v50 = vld [vmem:[#allocation6 + $0x500] ss:$20 sps:$4 sm:$0xff]   ;;  %v13177_v49 = vld [vmem:[#allocation6 + $0x6e4] ss:$20 sps:$4 sm:$0xff]  }
 0x36f   :  { %8639 = vmatpush1.bf16.msra.mxu0 %v13040_v54  ;;  %8378 = vmatprep.subr.bf16.mxu1 %v13045_v55  ;;  %v13106_v54 = vld [vmem:[#allocation6 + $0x3c8] ss:$20 sps:$4 sm:$0xff]   ;;  %v13111_v55 = vld [vmem:[#allocation6 + $0x52c] ss:$20 sps:$4 sm:$0xff]  }
 0x370   :  { %8640 = vmatprep.subr.bf16.mxu0 %v13048_v57  ;;  %v13114_v57 = vld [vmem:[#allocation6 + $0x3f4] ss:$20 sps:$4 sm:$0xff]  }
 0x372   :  { %8379 = vmatpush1.bf16.msra.mxu1 %v13043_v56  ;;  %v14356_v56 = vpack.c.bf16 %v4946_v27, %v4946_v27  ;;  %v13153_v27 = vld [vmem:[#allocation6 + $0x644] ss:$20 sps:$4 sm:$0xff]  }
 0x373   :  { %8641 = vmatpush1.bf16.msra.mxu0 %v13046_v58  ;;  %8380 = vmatprep.subr.bf16.mxu1 %v13051_v59  ;;  %v13109_v58 = vld [vmem:[#allocation6 + $0x528] ss:$20 sps:$4 sm:$0xff]   ;;  %v13112_v59 = vld [vmem:[#allocation6 + $0x3f0] ss:$20 sps:$4 sm:$0xff]  }
 0x374   :  { %8642 = vmatprep.subr.bf16.mxu0 %v13054_v20  ;;  %v13117_v20 = vld [vmem:[#allocation6 + $0x554] ss:$20 sps:$4 sm:$0xff]  }
 0x376   :  { %8381 = vmatpush1.bf16.msra.mxu1 %v13049_v60  ;;  %v13115_v60 = vld [vmem:[#allocation6 + $0x550] ss:$20 sps:$4 sm:$0xff]  }
 0x377   :  { %8643 = vmatpush1.bf16.msra.mxu0 %v13052_v62  ;;  %8382 = vmatprep.subr.bf16.mxu1 %v13057_v6  ;;  %v13120_v62 = vld [vmem:[#allocation6 + $0x41c] ss:$20 sps:$4 sm:$0xff]   ;;  %v13118_v6 = vld [vmem:[#allocation6 + $0x418] ss:$20 sps:$4 sm:$0xff]  }
 0x378   :  { %8653 = vmatprep.subr.bf16.mxu0 %v13060_v8  ;;  %v13121_v8 = vld [vmem:[#allocation6 + $0x578] ss:$20 sps:$4 sm:$0xff]  }
 0x37a   :  { %8645 = vmatmul.mubr.bf16.vlgmr.msra.gmra.mrb[20].mxu0 %v14337_v1  ;;  %8383 = vmatpush1.bf16.msra.mxu1 %v13055_v7  ;;  %v13123_v7 = vld [vmem:[#allocation6 + $0x57c] ss:$20 sps:$4 sm:$0xff]  }
 0x37b   :  { %8654 = vmatpush1.bf16.msra.mxu0 %v13058_v9  ;;  %8685 = vmatprep.mubr.bf16.mxu0 %v14339_v4  ;;  %v13126_v9 = vld [vmem:[#allocation6 + $0x444] ss:$20 sps:$4 sm:$0xff]  }
 0x37c   :  { %8384 = vmatprep.subr.bf16.mxu1 %v13063_v10  ;;  %8655 = vmatprep.subr.bf16.mxu0 %v13066_v3  ;;  %v13124_v10 = vld [vmem:[#allocation6 + $0x440] ss:$20 sps:$4 sm:$0xff]   ;;  %v13129_v3 = vld [vmem:[#allocation6 + $0x5a4] ss:$20 sps:$4 sm:$0xff]  }
 0x37e   :  { %8385 = vmatpush1.bf16.msra.mxu1 %v13061_v13  ;;  %v13127_v13 = vld [vmem:[#allocation6 + $0x5a0] ss:$20 sps:$4 sm:$0xff]  }
 0x37f   :  { %8656 = vmatpush1.bf16.msra.mxu0 %v13064_v14  ;;  %8386 = vmatprep.subr.bf16.mxu1 %v13069_v15  ;;  %v13132_v14 = vld [vmem:[#allocation6 + $0x46c] ss:$20 sps:$4 sm:$0xff]   ;;  %v13130_v15 = vld [vmem:[#allocation6 + $0x468] ss:$20 sps:$4 sm:$0xff]  }
 0x380   :  { %8657 = vmatprep.subr.bf16.mxu0 %v13072_v18  ;;  %v13133_v18 = vld [vmem:[#allocation6 + $0x5c8] ss:$20 sps:$4 sm:$0xff]  }
 0x382   :  { %8387 = vmatpush1.bf16.msra.mxu1 %v13067_v16  ;;  %v13135_v16 = vld [vmem:[#allocation6 + $0x5cc] ss:$20 sps:$4 sm:$0xff]  }
 0x383   :  { %8658 = vmatpush1.bf16.msra.mxu0 %v13070_v12  ;;  %8388 = vmatprep.subr.bf16.mxu1 %v13075_v19  ;;  %v13136_v12 = vld [vmem:[#allocation6 + $0x490] ss:$20 sps:$4 sm:$0xff]   ;;  %v13141_v19 = vld [vmem:[#allocation6 + $0x5f4] ss:$20 sps:$4 sm:$0xff]  }
 0x384   :  { %8659 = vmatprep.subr.bf16.mxu0 %v13078_v22  ;;  %v13144_v22 = vld [vmem:[#allocation6 + $0x4bc] ss:$20 sps:$4 sm:$0xff]  }
 0x386   :  { %8389 = vmatpush1.bf16.msra.mxu1 %v13073_v21  ;;  %v13139_v21 = vld [vmem:[#allocation6 + $0x5f0] ss:$20 sps:$4 sm:$0xff]  }
 0x387   :  { %8660 = vmatpush1.bf16.msra.mxu0 %v13076_v24  ;;  %8390 = vmatprep.subr.bf16.mxu1 %v13081_v25  ;;  %v13147_v24 = vld [vmem:[#allocation6 + $0x61c] ss:$20 sps:$4 sm:$0xff]   ;;  %v13145_v25 = vld [vmem:[#allocation6 + $0x618] ss:$20 sps:$4 sm:$0xff]  }
 0x388   :  { %8661 = vmatprep.subr.bf16.mxu0 %v13084_v26  ;;  %v13148_v26 = vld [vmem:[#allocation6 + $0x4e0] ss:$20 sps:$4 sm:$0xff]  }
 0x38a   :  { %8391 = vmatpush1.bf16.msra.mxu1 %v13079_v17  ;;  %v13150_v17 = vld [vmem:[#allocation6 + $0x4e4] ss:$20 sps:$4 sm:$0xff]  }
 0x38b   :  { %8662 = vmatpush1.bf16.msra.mxu0 %v13082_v28  ;;  %8392 = vmatprep.subr.bf16.mxu1 %v13087_v29  ;;  %v13156_v28 = vld [vmem:[#allocation6 + $0x50c] ss:$20 sps:$4 sm:$0xff]   ;;  %v13154_v29 = vld [vmem:[#allocation6 + $0x508] ss:$20 sps:$4 sm:$0xff]  }
 0x38c   :  { %8663 = vmatprep.subr.bf16.mxu0 %v13090_v31  ;;  %v13162_v31 = vld [vmem:[#allocation6 + $0x534] ss:$20 sps:$4 sm:$0xff]  }
 0x38e   :  { %8393 = vmatpush1.bf16.msra.mxu1 %v13085_v30  ;;  %v13159_v30 = vld [vmem:[#allocation6 + $0x66c] ss:$20 sps:$4 sm:$0xff]  }
 0x38f   :  { %8664 = vmatpush1.bf16.msra.mxu0 %v13088_v33  ;;  %8394 = vmatprep.subr.bf16.mxu1 %v13093_v2  ;;  %v13157_v33 = vld [vmem:[#allocation6 + $0x668] ss:$20 sps:$4 sm:$0xff]   ;;  %v13160_v2 = vld [vmem:[#allocation6 + $0x530] ss:$20 sps:$4 sm:$0xff]  }
 0x390   :  { %8665 = vmatprep.subr.bf16.mxu0 %v13096_v37  ;;  %v13168_v37 = vld [vmem:[#allocation6 + $0x55c] ss:$20 sps:$4 sm:$0xff]  }
 0x392   :  { %8395 = vmatpush1.bf16.msra.mxu1 %v13091_v36  ;;  %v13163_v36 = vld [vmem:[#allocation6 + $0x690] ss:$20 sps:$4 sm:$0xff]  }
 0x393   :  { %8666 = vmatpush1.bf16.msra.mxu0 %v13094_v38  ;;  %8396 = vmatprep.subr.bf16.mxu1 %v13099_v32  ;;  %v14365_v38 = vsub.s32 4, %v14299_v48  ;;  %v883_v32 = vsub.s32 7, %v14299_v48 }
 0x394   :  { %8667 = vmatprep.subr.bf16.mxu0 %v13102_v42  ;;  %v13169_v42 = vld [vmem:[#allocation6 + $0x6b8] ss:$20 sps:$4 sm:$0xff]  }
 0x396   :  { %8397 = vmatpush1.bf16.msra.mxu1 %v13097_v41  ;;  %v13171_v41 = vld [vmem:[#allocation6 + $0x6bc] ss:$20 sps:$4 sm:$0xff]  }
 0x397   :  { %8668 = vmatpush1.bf16.msra.mxu0 %v13100_v44  ;;  %8407 = vmatprep.subr.bf16.mxu1 %v13105_v45  ;;  %v13174_v44 = vld [vmem:[#allocation6 + $0x584] ss:$20 sps:$4 sm:$0xff]   ;;  %v13172_v45 = vld [vmem:[#allocation6 + $0x580] ss:$20 sps:$4 sm:$0xff]  }
 0x398   :  { %8669 = vmatprep.subr.bf16.mxu0 %v13108_v51  ;;  %v13175_v51 = vld [vmem:[#allocation6 + $0x6e0] ss:$20 sps:$4 sm:$0xff]  }
 0x399   :  { %8399 = vmatmul.mubr.bf16.vlgmr.msra.gmra.mrb[16].mxu1 %v14356_v56 }
 0x39a   :  { %8408 = vmatpush1.bf16.msra.mxu1 %v13103_v50  ;;  %8439 = vmatprep.mubr.bf16.mxu1 %v14358_v52  ;;  %v13180_v50 = vld [vmem:[#allocation6 + $0x5ac] ss:$20 sps:$4 sm:$0xff]  }
 0x39b   :  { %8670 = vmatpush1.bf16.msra.mxu0 %v13106_v54  ;;  %8409 = vmatprep.subr.bf16.mxu1 %v13111_v55  ;;  %v14368_v54 = vld [vmem:[#allocation4 + $0x8] sm:$0x1f] }
 0x39c   :  { %8671 = vmatprep.subr.bf16.mxu0 %v13114_v57  ;;  %v13178_v55 = vld [vmem:[#allocation6 + $0x5a8] ss:$20 sps:$4 sm:$0xff]   ;;  %v13183_v57 = vld [vmem:[#allocation6 + $0x70c] ss:$20 sps:$4 sm:$0xff]  }
 0x39e   :  { %8410 = vmatpush1.bf16.msra.mxu1 %v13109_v58  ;;  %v13186_v58 = vld [vmem:[#allocation6 + $0x5d4] ss:$20 sps:$4 sm:$0xff]  }
 0x39f   :  { %8672 = vmatpush1.bf16.msra.mxu0 %v13112_v59  ;;  %8411 = vmatprep.subr.bf16.mxu1 %v13117_v20  ;;  %v872_v59 = vrot.slane %v14352_v34, %v14365_v38  ;;  %v884_v20 = vrot.slane %v14352_v34, %v883_v32  ;;  %v13213_v32 = vld [vmem:[#allocation6 + $0x7d4] ss:$20 sps:$4 sm:$0xff]  }
 0x3a0   :  { %8673 = vmatprep.subr.bf16.mxu0 %v13120_v62  ;;  %v896_v62 = vrot.slane %v14368_v54, %v14344_v61 }
 0x3a2   :  { %8412 = vmatpush1.bf16.msra.mxu1 %v13115_v60  ;;  %v13181_v60 = vld [vmem:[#allocation6 + $0x708] ss:$20 sps:$4 sm:$0xff]  }
 0x3a3   :  { %8674 = vmatpush1.bf16.msra.mxu0 %v13118_v6  ;;  %8413 = vmatprep.subr.bf16.mxu1 %v13123_v7  ;;  %v900_v6 = vrot.slane %v14368_v54, %v14329_v0  ;;  %v13184_v7 = vld [vmem:[#allocation6 + $0x5d0] ss:$20 sps:$4 sm:$0xff]  }
 0x3a4   :  { %8675 = vmatprep.subr.bf16.mxu0 %v13126_v9  ;;  %v13192_v9 = vld [vmem:[#allocation6 + $0x5fc] ss:$20 sps:$4 sm:$0xff]  }
 0x3a6   :  { %8414 = vmatpush1.bf16.msra.mxu1 %v13121_v8  ;;  %v13189_v8 = vld [vmem:[#allocation6 + $0x734] ss:$20 sps:$4 sm:$0xff]  }
 0x3a7   :  { %8676 = vmatpush1.bf16.msra.mxu0 %v13124_v10  ;;  %8415 = vmatprep.subr.bf16.mxu1 %v13129_v3  ;;  %v11894_v10 = vadd.f32 %v14306_v46, %v872_v59  ;;  %v11897_v3 = vadd.f32 %v14314_v53, %v884_v20  ;;  %v13190_v53 = vld [vmem:[#allocation6 + $0x5f8] ss:$20 sps:$4 sm:$0xff]   ;;  %v13234_v20 = vld [vmem:[#allocation6 + $0x714] ss:$20 sps:$4 sm:$0xff]  }
 0x3a8   :  { %8677 = vmatprep.subr.bf16.mxu0 %v13132_v14  ;;  %v13231_v59 = vld [vmem:[#allocation6 + $0x84c] ss:$20 sps:$4 sm:$0xff]  }
 0x3aa   :  { %8416 = vmatpush1.bf16.msra.mxu1 %v13127_v13 }
 0x3ab   :  { %8678 = vmatpush1.bf16.msra.mxu0 %v13130_v15  ;;  %8417 = vmatprep.subr.bf16.mxu1 %v13135_v16  ;;  %v13187_v15 = vld [vmem:[#allocation6 + $0x730] ss:$20 sps:$4 sm:$0xff]  }
 0x3ac   :  { %8679 = vmatprep.subr.bf16.mxu0 %v13138_v5 }
 0x3ae   :  { %8418 = vmatpush1.bf16.msra.mxu1 %v13133_v18 }
 0x3af   :  { %8680 = vmatpush1.bf16.msra.mxu0 %v13136_v12  ;;  %8419 = vmatprep.subr.bf16.mxu1 %v13141_v19 }
 0x3b0   :  { %8681 = vmatprep.subr.bf16.mxu0 %v13144_v22 }
 0x3b2   :  { %8420 = vmatpush1.bf16.msra.mxu1 %v13139_v21 }
 0x3b3   :  { %8682 = vmatpush1.bf16.msra.mxu0 %v13142_v23  ;;  %8421 = vmatprep.subr.bf16.mxu1 %v13147_v24  ;;  %v13195_v23 = vld [vmem:[#allocation6 + $0x75c] ss:$20 sps:$4 sm:$0xff]   ;;  %v4948_v24 = vmax.f32 %v11894_v10, 0.0 }
 0x3b4   :  { %8683 = vmatprep.subr.bf16.mxu0 %v13150_v17  ;;  %v13198_v17 = vld [vmem:[#allocation6 + $0x624] ss:$20 sps:$4 sm:$0xff]   ;;  %v13240_v10 = vld [vmem:[#allocation6 + $0x73c] ss:$20 sps:$4 sm:$0xff]  }
 0x3b6   :  { %8422 = vmatpush1.bf16.msra.mxu1 %v13145_v25  ;;  %v4951_v25 = vmax.f32 %v11897_v3, 0.0 }
 0x3b7   :  { %8684 = vmatpush1.bf16.msra.mxu0 %v13148_v26  ;;  %8423 = vmatprep.subr.bf16.mxu1 %v13153_v27  ;;  %v13193_v26 = vld [vmem:[#allocation6 + $0x758] ss:$20 sps:$4 sm:$0xff]   ;;  %v13196_v27 = vld [vmem:[#allocation6 + $0x620] ss:$20 sps:$4 sm:$0xff]  }
 0x3b8   :  { %8694 = vmatprep.subr.bf16.mxu0 %v13156_v28  ;;  %v13204_v28 = vld [vmem:[#allocation6 + $0x64c] ss:$20 sps:$4 sm:$0xff]  }
 0x3ba   :  { %8686 = vmatmul.mubr.bf16.vlgmr.msra.gmra.mrb[20].mxu0 %v14356_v56  ;;  %8424 = vmatpush1.bf16.msra.mxu1 %v13151_v40  ;;  %v13201_v40 = vld [vmem:[#allocation6 + $0x784] ss:$20 sps:$4 sm:$0xff]  }
 0x3bb   :  { %8695 = vmatpush1.bf16.msra.mxu0 %v13154_v29  ;;  %8726 = vmatprep.mubr.bf16.mxu0 %v14358_v52  ;;  %v13199_v29 = vld [vmem:[#allocation6 + $0x780] ss:$20 sps:$4 sm:$0xff]  }
 0x3bc   :  { %8425 = vmatprep.subr.bf16.mxu1 %v13159_v30  ;;  %8696 = vmatprep.subr.bf16.mxu0 %v13162_v31  ;;  %v13202_v30 = vld [vmem:[#allocation6 + $0x648] ss:$20 sps:$4 sm:$0xff]   ;;  %v13207_v31 = vld [vmem:[#allocation6 + $0x7ac] ss:$20 sps:$4 sm:$0xff]  }
 0x3be   :  { %8426 = vmatpush1.bf16.msra.mxu1 %v13157_v33  ;;  %v14387_v33 = vpack.c.bf16 %v4948_v24, %v4948_v24  ;;  %v13243_v24 = vld [vmem:[#allocation6 + $0x89c] ss:$20 sps:$4 sm:$0xff]  }
 0x3bf   :  { %8697 = vmatpush1.bf16.msra.mxu0 %v13160_v2  ;;  %8427 = vmatprep.subr.bf16.mxu1 %v13165_v35  ;;  %v14389_v2 = vpack.c.bf16 %v4951_v25, %v4951_v25  ;;  %v13210_v35 = vld [vmem:[#allocation6 + $0x674] ss:$20 sps:$4 sm:$0xff]  }
 0x3c0   :  { %8698 = vmatprep.subr.bf16.mxu0 %v13168_v37  ;;  %v13208_v37 = vld [vmem:[#allocation6 + $0x670] ss:$20 sps:$4 sm:$0xff]  }
 0x3c2   :  { %8428 = vmatpush1.bf16.msra.mxu1 %v13163_v36  ;;  %v13205_v36 = vld [vmem:[#allocation6 + $0x7a8] ss:$20 sps:$4 sm:$0xff]  }
 0x3c3   :  { %8699 = vmatpush1.bf16.msra.mxu0 %v13166_v39  ;;  %8429 = vmatprep.subr.bf16.mxu1 %v13171_v41  ;;  %v13211_v39 = vld [vmem:[#allocation6 + $0x7d0] ss:$20 sps:$4 sm:$0xff]  }
 0x3c4   :  { %8700 = vmatprep.subr.bf16.mxu0 %v13174_v44  ;;  %v13216_v41 = vld [vmem:[#allocation6 + $0x69c] ss:$20 sps:$4 sm:$0xff]  }
 0x3c5   :  { %v13219_v44 = vld [vmem:[#allocation6 + $0x7fc] ss:$20 sps:$4 sm:$0xff]  }
 0x3c6   :  { %8430 = vmatpush1.bf16.msra.mxu1 %v13169_v42  ;;  %v13214_v42 = vld [vmem:[#allocation6 + $0x698] ss:$20 sps:$4 sm:$0xff]  }
 0x3c7   :  { %8701 = vmatpush1.bf16.msra.mxu0 %v13172_v45  ;;  %8431 = vmatprep.subr.bf16.mxu1 %v13177_v49  ;;  %v13222_v45 = vld [vmem:[#allocation6 + $0x6c4] ss:$20 sps:$4 sm:$0xff]  }
 0x3c8   :  { %8702 = vmatprep.subr.bf16.mxu0 %v13180_v50  ;;  %v13217_v49 = vld [vmem:[#allocation6 + $0x7f8] ss:$20 sps:$4 sm:$0xff]   ;;  %v13220_v50 = vld [vmem:[#allocation6 + $0x6c0] ss:$20 sps:$4 sm:$0xff]  }
 0x3ca   :  { %8432 = vmatpush1.bf16.msra.mxu1 %v13175_v51  ;;  %v13225_v51 = vld [vmem:[#allocation6 + $0x824] ss:$20 sps:$4 sm:$0xff]  }
 0x3cb   :  { %8703 = vmatpush1.bf16.msra.mxu0 %v13178_v55  ;;  %8433 = vmatprep.subr.bf16.mxu1 %v13183_v57  ;;  %v13228_v55 = vld [vmem:[#allocation6 + $0x6ec] ss:$20 sps:$4 sm:$0xff]  }
 0x3cc   :  { %v14379_v13 = vpop.f32.mrb[8].mxu0  ;;  %v4817_v14 = vpop.f32.mrb[8].mxu1  ;;  %8704 = vmatprep.subr.bf16.mxu0 %v13186_v58  ;;  %v13223_v57 = vld [vmem:[#allocation6 + $0x820] ss:$20 sps:$4 sm:$0xff]   ;;  %v13226_v58 = vld [vmem:[#allocation6 + $0x6e8] ss:$20 sps:$4 sm:$0xff]  }
 0x3cd   :  { %v14381_v16 = vadd.f32 %v4817_v14, %v896_v62  ;;  %v14383_v18 = vpop.f32.mrb[9].mxu0  ;;  %v4819_v5 = vpop.f32.mrb[9].mxu1  ;;  %v13232_v62 = vld [vmem:[#allocation6 + $0x710] ss:$20 sps:$4 sm:$0xff]  }
 0x3ce   :  { %v14385_v12 = vadd.f32 %v4819_v5, %v900_v6  ;;  %v4698_v19 = vpop.f32.mrb[10].mxu0  ;;  %v4821_v21 = vpop.f32.mrb[10].mxu1  ;;  %8434 = vmatpush1.bf16.msra.mxu1 %v13181_v60  ;;  %v13229_v60 = vld [vmem:[#allocation6 + $0x848] ss:$20 sps:$4 sm:$0xff]  }
 0x3cf   :  { %8705 = vmatpush1.bf16.msra.mxu0 %v13184_v7  ;;  %v4699_v22 = vpop.f32.mrb[11].mxu0  ;;  %v4822_v46 = vpop.f32.mrb[11].mxu1  ;;  %8435 = vmatprep.subr.bf16.mxu1 %v13189_v8  ;;  %v13237_v6 = vld [vmem:[#allocation6 + $0x874] ss:$20 sps:$4 sm:$0xff]   ;;  %v904_v8 = vrot.slane %v14368_v54, %v14365_v38 }
 0x3d0   :  { %8706 = vmatprep.subr.bf16.mxu0 %v13192_v9  ;;  %v13235_v22 = vld [vmem:[#allocation6 + $0x870] ss:$20 sps:$4 sm:$0xff]  }
 0x3d2   :  { %8436 = vmatpush1.bf16.msra.mxu1 %v13187_v15 }
 0x3d3   :  { %8707 = vmatpush1.bf16.msra.mxu0 %v13190_v53  ;;  %8437 = vmatprep.subr.bf16.mxu1 %v13195_v23  ;;  %v13238_v53 = vld [vmem:[#allocation6 + $0x738] ss:$20 sps:$4 sm:$0xff]  }
 0x3d4   :  { %8708 = vmatprep.subr.bf16.mxu0 %v13198_v17  ;;  %v13246_v17 = vld [vmem:[#allocation6 + $0x764] ss:$20 sps:$4 sm:$0xff]  }
 0x3d6   :  { %8438 = vmatpush1.bf16.msra.mxu1 %v13193_v26 }
 0x3d7   :  { %8709 = vmatpush1.bf16.msra.mxu0 %v13196_v27  ;;  %8448 = vmatprep.subr.bf16.mxu1 %v13201_v40  ;;  %v13241_v27 = vld [vmem:[#allocation6 + $0x898] ss:$20 sps:$4 sm:$0xff]   ;;  %v13244_v40 = vld [vmem:[#allocation6 + $0x760] ss:$20 sps:$4 sm:$0xff]  }
 0x3d8   :  { %8710 = vmatprep.subr.bf16.mxu0 %v13204_v28  ;;  %v13249_v28 = vld [vmem:[#allocation6 + $0x8c4] ss:$20 sps:$4 sm:$0xff]  }
 0x3d9   :  { %8440 = vmatmul.mubr.bf16.vlgmr.msra.gmra.mrb[16].mxu1 %v14387_v33 }
 0x3da   :  { %8449 = vmatpush1.bf16.msra.mxu1 %v13199_v29  ;;  %8480 = vmatprep.mubr.bf16.mxu1 %v14389_v2  ;;  %v13252_v29 = vld [vmem:[#allocation6 + $0x78c] ss:$20 sps:$4 sm:$0xff]  }
 0x3db   :  { %8711 = vmatpush1.bf16.msra.mxu0 %v13202_v30  ;;  %8450 = vmatprep.subr.bf16.mxu1 %v13207_v31  ;;  %v13247_v30 = vld [vmem:[#allocation6 + $0x8c0] ss:$20 sps:$4 sm:$0xff]   ;;  %v13250_v31 = vld [vmem:[#allocation6 + $0x788] ss:$20 sps:$4 sm:$0xff]  }
 0x3dc   :  { %8712 = vmatprep.subr.bf16.mxu0 %v13210_v35  ;;  %v13255_v35 = vld [vmem:[#allocation6 + $0x8ec] ss:$20 sps:$4 sm:$0xff]  }
 0x3de   :  { %8451 = vmatpush1.bf16.msra.mxu1 %v13205_v36  ;;  %v13258_v36 = vld [vmem:[#allocation6 + $0x7b4] ss:$20 sps:$4 sm:$0xff]  }
 0x3df   :  { %8713 = vmatpush1.bf16.msra.mxu0 %v13208_v37  ;;  %8452 = vmatprep.subr.bf16.mxu1 %v13213_v32  ;;  %v13253_v37 = vld [vmem:[#allocation6 + $0x8e8] ss:$20 sps:$4 sm:$0xff]   ;;  %v13256_v32 = vld [vmem:[#allocation6 + $0x7b0] ss:$20 sps:$4 sm:$0xff]  }
 0x3e0   :  { %8714 = vmatprep.subr.bf16.mxu0 %v13216_v41  ;;  %v13264_v41 = vld [vmem:[#allocation6 + $0x7dc] ss:$20 sps:$4 sm:$0xff]  }
 0x3e2   :  { %8453 = vmatpush1.bf16.msra.mxu1 %v13211_v39  ;;  %v13261_v39 = vld [vmem:[#allocation6 + $0x914] ss:$20 sps:$4 sm:$0xff]  }
 0x3e3   :  { %8715 = vmatpush1.bf16.msra.mxu0 %v13214_v42  ;;  %8454 = vmatprep.subr.bf16.mxu1 %v13219_v44  ;;  %v13259_v42 = vld [vmem:[#allocation6 + $0x910] ss:$20 sps:$4 sm:$0xff]   ;;  %v13262_v44 = vld [vmem:[#allocation6 + $0x7d8] ss:$20 sps:$4 sm:$0xff]  }
 0x3e4   :  { %8716 = vmatprep.subr.bf16.mxu0 %v13222_v45  ;;  %v13267_v45 = vld [vmem:[#allocation6 + $0x93c] ss:$20 sps:$4 sm:$0xff]  }
 0x3e6   :  { %8455 = vmatpush1.bf16.msra.mxu1 %v13217_v49  ;;  %v13270_v49 = vld [vmem:[#allocation6 + $0x804] ss:$20 sps:$4 sm:$0xff]  }
 0x3e7   :  { %8717 = vmatpush1.bf16.msra.mxu0 %v13220_v50  ;;  %8456 = vmatprep.subr.bf16.mxu1 %v13225_v51  ;;  %v13265_v50 = vld [vmem:[#allocation6 + $0x938] ss:$20 sps:$4 sm:$0xff]   ;;  %v13268_v51 = vld [vmem:[#allocation6 + $0x800] ss:$20 sps:$4 sm:$0xff]  }
 0x3e8   :  { %8718 = vmatprep.subr.bf16.mxu0 %v13228_v55  ;;  %v13273_v55 = vld [vmem:[#allocation6 + $0x964] ss:$20 sps:$4 sm:$0xff]  }
 0x3ea   :  { %8457 = vmatpush1.bf16.msra.mxu1 %v13223_v57  ;;  %v13276_v57 = vld [vmem:[#allocation6 + $0x82c] ss:$20 sps:$4 sm:$0xff]  }
 0x3eb   :  { %8719 = vmatpush1.bf16.msra.mxu0 %v13226_v58  ;;  %8458 = vmatprep.subr.bf16.mxu1 %v13231_v59  ;;  %v13271_v58 = vld [vmem:[#allocation6 + $0x960] ss:$20 sps:$4 sm:$0xff]   ;;  %v879_v59 = vsub.s32 6, %v14299_v48  ;;  %v13288_v48 = vld [vmem:[#allocation6 + $0x87c] ss:$20 sps:$4 sm:$0xff]  }
 0x3ec   :  { %v11562_v7 = vpop.f32.mrb[12].mxu0  ;;  %8720 = vmatprep.subr.bf16.mxu0 %v13234_v20  ;;  %v11584_v9 = vpop.f32.mrb[12].mxu1  ;;  %v13274_v20 = vld [vmem:[#allocation6 + $0x828] ss:$20 sps:$4 sm:$0xff]  }
 0x3ed   :  { %v11563_v3 = vpop.f32.mrb[13].mxu0  ;;  %v11585_v14 = vpop.f32.mrb[13].mxu1 }
 0x3ee   :  { %v11564_v15 = vadd.f32 %v11563_v3, %v11562_v7  ;;  %v11565_v5 = vpop.f32.mrb[14].mxu0  ;;  %8459 = vmatpush1.bf16.msra.mxu1 %v13229_v60  ;;  %v11586_v19 = vadd.f32 %v11585_v14, %v11584_v9  ;;  %v11587_v21 = vpop.f32.mrb[14].mxu1  ;;  %v13279_v60 = vld [vmem:[#allocation6 + $0x98c] ss:$20 sps:$4 sm:$0xff]   ;;  %v880_v7 = vrot.slane %v14352_v34, %v879_v59  ;;  %v13285_v9 = vld [vmem:[#allocation6 + $0x9b4] ss:$20 sps:$4 sm:$0xff]  }
 0x3ef   :  { %8721 = vmatpush1.bf16.msra.mxu0 %v13232_v62  ;;  %v11566_v46 = vpop.f32.mrb[15].mxu0  ;;  %8460 = vmatprep.subr.bf16.mxu1 %v13237_v6  ;;  %v11588_v23 = vpop.f32.mrb[15].mxu1  ;;  %v13282_v62 = vld [vmem:[#allocation6 + $0x854] ss:$20 sps:$4 sm:$0xff]   ;;  %v13286_v34 = vld [vmem:[#allocation6 + $0x878] ss:$20 sps:$4 sm:$0xff]  }
 0x3f0   :  { %v4859_v25 = vadd.f32 %v11564_v15, %v904_v8  ;;  %8722 = vmatprep.subr.bf16.mxu0 %v13240_v10  ;;  %v13277_v6 = vld [vmem:[#allocation6 + $0x988] ss:$20 sps:$4 sm:$0xff]   ;;  %v13280_v8 = vld [vmem:[#allocation6 + $0x850] ss:$20 sps:$4 sm:$0xff]   ;;  %v892_v10 = vrot.slane %v14368_v54, %v14304_v43  ;;  %v11896_v21 = vadd.f32 %v14308_v47, %v880_v7  ;;  %v13327_v59 = vld [vmem:[#allocation6 + $0xacc] ss:$20 sps:$4 sm:$0xff]  }
 0x3f1   :  { %v13291_v46 = vld [vmem:[#allocation6 + $0x9dc] ss:$20 sps:$4 sm:$0xff]  }
 0x3f2   :  { %v14395_v26 = vadd.f32 %v11586_v19, %v4859_v25  ;;  %8461 = vmatpush1.bf16.msra.mxu1 %v13235_v22  ;;  %v13283_v19 = vld [vmem:[#allocation6 + $0x9b0] ss:$20 sps:$4 sm:$0xff]   ;;  %v13289_v25 = vld [vmem:[#allocation6 + $0x9d8] ss:$20 sps:$4 sm:$0xff]  }
 0x3f3   :  { %8723 = vmatpush1.bf16.msra.mxu0 %v13238_v53  ;;  %8462 = vmatprep.subr.bf16.mxu1 %v13243_v24  ;;  %v11899_v53 = vadd.f32 %v14383_v18, %v892_v10  ;;  %v13294_v24 = vld [vmem:[#allocation6 + $0x8a4] ss:$20 sps:$4 sm:$0xff]   ;;  %v13298_v18 = vld [vmem:[#allocation6 + $0x8c8] ss:$20 sps:$4 sm:$0xff]  }
 0x3f4   :  { %8724 = vmatprep.subr.bf16.mxu0 %v13246_v17  ;;  %v4950_v17 = vmax.f32 %v11896_v21, 0.0  ;;  %v13336_v7 = vld [vmem:[#allocation6 + $0x9bc] ss:$20 sps:$4 sm:$0xff]  }
 0x3f5   :  { %v4953_v47 = vmax.f32 %v11899_v53, 0.0  ;;  %v13339_v10 = vld [vmem:[#allocation6 + $0xb1c] ss:$20 sps:$4 sm:$0xff]  }
 0x3f6   :  { %8463 = vmatpush1.bf16.msra.mxu1 %v13241_v27  ;;  %v13292_v27 = vld [vmem:[#allocation6 + $0x8a0] ss:$20 sps:$4 sm:$0xff]   ;;  %v13346_v21 = vld [vmem:[#allocation6 + $0xa08] ss:$20 sps:$4 sm:$0xff]   ;;  %v13352_v53 = vld [vmem:[#allocation6 + $0xa30] ss:$20 sps:$4 sm:$0xff]  }
 0x3f7   :  { %8725 = vmatpush1.bf16.msra.mxu0 %v13244_v40  ;;  %8464 = vmatprep.subr.bf16.mxu1 %v13249_v28  ;;  %v13297_v40 = vld [vmem:[#allocation6 + $0xa04] ss:$20 sps:$4 sm:$0xff]   ;;  %v13300_v28 = vld [vmem:[#allocation6 + $0x8cc] ss:$20 sps:$4 sm:$0xff]  }
 0x3f8   :  { %8735 = vmatprep.subr.bf16.mxu0 %v13252_v29  ;;  %v13295_v29 = vld [vmem:[#allocation6 + $0xa00] ss:$20 sps:$4 sm:$0xff]  }
 0x3fa   :  { %8727 = vmatmul.mubr.bf16.vlgmr.msra.gmra.mrb[20].mxu0 %v14387_v33  ;;  %8465 = vmatpush1.bf16.msra.mxu1 %v13247_v30  ;;  %v14408_v30 = vpack.c.bf16 %v4950_v17, %v4950_v17  ;;  %v13355_v17 = vld [vmem:[#allocation6 + $0xb90] ss:$20 sps:$4 sm:$0xff]  }
 0x3fb   :  { %8736 = vmatpush1.bf16.msra.mxu0 %v13250_v31  ;;  %8767 = vmatprep.mubr.bf16.mxu0 %v14389_v2  ;;  %v14410_v31 = vpack.c.bf16 %v4953_v47, %v4953_v47  ;;  %v13366_v47 = vld [vmem:[#allocation6 + $0xa84] ss:$20 sps:$4 sm:$0xff]  }
 0x3fc   :  { %8466 = vmatprep.subr.bf16.mxu1 %v13255_v35  ;;  %8737 = vmatprep.subr.bf16.mxu0 %v13258_v36  ;;  %v13306_v35 = vld [vmem:[#allocation6 + $0x8f4] ss:$20 sps:$4 sm:$0xff]  }
 0x3fd   :  { %v13301_v36 = vld [vmem:[#allocation6 + $0xa28] ss:$20 sps:$4 sm:$0xff]  }
 0x3fe   :  { %8467 = vmatpush1.bf16.msra.mxu1 %v13253_v37  ;;  %v13304_v37 = vld [vmem:[#allocation6 + $0x8f0] ss:$20 sps:$4 sm:$0xff]  }
 0x3ff   :  { %8738 = vmatpush1.bf16.msra.mxu0 %v13256_v32  ;;  %8468 = vmatprep.subr.bf16.mxu1 %v13261_v39  ;;  %v13309_v32 = vld [vmem:[#allocation6 + $0xa54] ss:$20 sps:$4 sm:$0xff]   ;;  %v13312_v39 = vld [vmem:[#allocation6 + $0x91c] ss:$20 sps:$4 sm:$0xff]  }
 0x400   :  { %8739 = vmatprep.subr.bf16.mxu0 %v13264_v41  ;;  %v13307_v41 = vld [vmem:[#allocation6 + $0xa50] ss:$20 sps:$4 sm:$0xff]  }
 0x402   :  { %8469 = vmatpush1.bf16.msra.mxu1 %v13259_v42  ;;  %v13310_v42 = vld [vmem:[#allocation6 + $0x918] ss:$20 sps:$4 sm:$0xff]  }
 0x403   :  { %8740 = vmatpush1.bf16.msra.mxu0 %v13262_v44  ;;  %8470 = vmatprep.subr.bf16.mxu1 %v13267_v45  ;;  %v13315_v44 = vld [vmem:[#allocation6 + $0xa7c] ss:$20 sps:$4 sm:$0xff]   ;;  %v13318_v45 = vld [vmem:[#allocation6 + $0x944] ss:$20 sps:$4 sm:$0xff]  }
 0x404   :  { %8741 = vmatprep.subr.bf16.mxu0 %v13270_v49  ;;  %v13313_v49 = vld [vmem:[#allocation6 + $0xa78] ss:$20 sps:$4 sm:$0xff]  }
 0x406   :  { %8471 = vmatpush1.bf16.msra.mxu1 %v13265_v50  ;;  %v13316_v50 = vld [vmem:[#allocation6 + $0x940] ss:$20 sps:$4 sm:$0xff]  }
 0x407   :  { %8742 = vmatpush1.bf16.msra.mxu0 %v13268_v51  ;;  %8472 = vmatprep.subr.bf16.mxu1 %v13273_v55  ;;  %v13321_v51 = vld [vmem:[#allocation6 + $0xaa4] ss:$20 sps:$4 sm:$0xff]   ;;  %v13324_v55 = vld [vmem:[#allocation6 + $0x96c] ss:$20 sps:$4 sm:$0xff]  }
 0x408   :  { %8743 = vmatprep.subr.bf16.mxu0 %v13276_v57  ;;  %v13319_v57 = vld [vmem:[#allocation6 + $0xaa0] ss:$20 sps:$4 sm:$0xff]  }
 0x40a   :  { %8473 = vmatpush1.bf16.msra.mxu1 %v13271_v58  ;;  %v13322_v58 = vld [vmem:[#allocation6 + $0x968] ss:$20 sps:$4 sm:$0xff]  }
 0x40b   :  { %8744 = vmatpush1.bf16.msra.mxu0 %v13274_v20  ;;  %8474 = vmatprep.subr.bf16.mxu1 %v13279_v60  ;;  %v13330_v20 = vld [vmem:[#allocation6 + $0x994] ss:$20 sps:$4 sm:$0xff]  }
 0x40c   :  { %v11606_v3 = vpop.f32.mrb[16].mxu0  ;;  %8745 = vmatprep.subr.bf16.mxu0 %v13282_v62  ;;  %v13325_v60 = vld [vmem:[#allocation6 + $0xac8] ss:$20 sps:$4 sm:$0xff]   ;;  %v13328_v62 = vld [vmem:[#allocation6 + $0x990] ss:$20 sps:$4 sm:$0xff]  }
 0x40d   :  { %v11607_v14 = vpop.f32.mrb[17].mxu0 }
 0x40e   :  { %v11608_v15 = vadd.f32 %v11607_v14, %v11606_v3  ;;  %v11609_v5 = vpop.f32.mrb[18].mxu0  ;;  %8475 = vmatpush1.bf16.msra.mxu1 %v13277_v6  ;;  %v13333_v6 = vld [vmem:[#allocation6 + $0xaf4] ss:$20 sps:$4 sm:$0xff]   ;;  %v13342_v3 = vld [vmem:[#allocation6 + $0x9e4] ss:$20 sps:$4 sm:$0xff]  }
 0x40f   :  { %8746 = vmatpush1.bf16.msra.mxu0 %v13280_v8  ;;  %v11610_v22 = vpop.f32.mrb[19].mxu0  ;;  %8476 = vmatprep.subr.bf16.mxu1 %v13285_v9  ;;  %v13331_v8 = vld [vmem:[#allocation6 + $0xaf0] ss:$20 sps:$4 sm:$0xff]   ;;  %v13334_v9 = vld [vmem:[#allocation6 + $0x9b8] ss:$20 sps:$4 sm:$0xff]  }
 0x410   :  { %v14406_v23 = vadd.f32 %v11608_v15, %v14395_v26  ;;  %8747 = vmatprep.subr.bf16.mxu0 %v13288_v48  ;;  %v13303_v26 = vld [vmem:[#allocation6 + $0xa2c] ss:$20 sps:$4 sm:$0xff]   ;;  %v13345_v15 = vld [vmem:[#allocation6 + $0xb44] ss:$20 sps:$4 sm:$0xff]  }
 0x411   :  { %v13337_v48 = vld [vmem:[#allocation6 + $0xb18] ss:$20 sps:$4 sm:$0xff]   ;;  %v13340_v14 = vld [vmem:[#allocation6 + $0x9e0] ss:$20 sps:$4 sm:$0xff]  }
 0x412   :  { %8477 = vmatpush1.bf16.msra.mxu1 %v13283_v19  ;;  %v13348_v5 = vld [vmem:[#allocation6 + $0xa0c] ss:$20 sps:$4 sm:$0xff]  }
 0x413   :  { %8748 = vmatpush1.bf16.msra.mxu0 %v13286_v34  ;;  %8478 = vmatprep.subr.bf16.mxu1 %v13291_v46  ;;  %v13343_v19 = vld [vmem:[#allocation6 + $0xb40] ss:$20 sps:$4 sm:$0xff]   ;;  %v13349_v46 = vld [vmem:[#allocation6 + $0xb68] ss:$20 sps:$4 sm:$0xff]  }
 0x414   :  { %8749 = vmatprep.subr.bf16.mxu0 %v13294_v24  ;;  %v13351_v22 = vld [vmem:[#allocation6 + $0xb6c] ss:$20 sps:$4 sm:$0xff]   ;;  %v13354_v34 = vld [vmem:[#allocation6 + $0xa34] ss:$20 sps:$4 sm:$0xff]  }
 0x415   :  { %v13357_v24 = vld [vmem:[#allocation6 + $0xb94] ss:$20 sps:$4 sm:$0xff]  }
 0x416   :  { %8479 = vmatpush1.bf16.msra.mxu1 %v13289_v25  ;;  %v13360_v25 = vld [vmem:[#allocation6 + $0xa5c] ss:$20 sps:$4 sm:$0xff]  }
 0x417   :  { %8750 = vmatpush1.bf16.msra.mxu0 %v13292_v27  ;;  %8489 = vmatprep.subr.bf16.mxu1 %v13297_v40  ;;  %v13358_v27 = vld [vmem:[#allocation6 + $0xa58] ss:$20 sps:$4 sm:$0xff]   ;;  %v13363_v40 = vld [vmem:[#allocation6 + $0xbbc] ss:$20 sps:$4 sm:$0xff]  }
 0x418   :  { %8751 = vmatprep.subr.bf16.mxu0 %v13300_v28  ;;  %v13361_v28 = vld [vmem:[#allocation6 + $0xbb8] ss:$20 sps:$4 sm:$0xff]  }
 0x419   :  { %8481 = vmatmul.mubr.bf16.vlgmr.msra.gmra.mrb[16].mxu1 %v14408_v30 }
 0x41a   :  { %8490 = vmatpush1.bf16.msra.mxu1 %v13295_v29  ;;  %8521 = vmatprep.mubr.bf16.mxu1 %v14410_v31  ;;  %v13364_v29 = vld [vmem:[#allocation6 + $0xa80] ss:$20 sps:$4 sm:$0xff]  }
 0x41b   :  { %8752 = vmatpush1.bf16.msra.mxu0 %v13298_v18  ;;  %8491 = vmatprep.subr.bf16.mxu1 %v13303_v26  ;;  %v13369_v18 = vld [vmem:[#allocation6 + $0xbe4] ss:$20 sps:$4 sm:$0xff]   ;;  %v13372_v26 = vld [vmem:[#allocation6 + $0xaac] ss:$20 sps:$4 sm:$0xff]  }
 0x41c   :  { %8753 = vmatprep.subr.bf16.mxu0 %v13306_v35  ;;  %v13367_v35 = vld [vmem:[#allocation6 + $0xbe0] ss:$20 sps:$4 sm:$0xff]  }
 0x41e   :  { %8492 = vmatpush1.bf16.msra.mxu1 %v13301_v36  ;;  %v13370_v36 = vld [vmem:[#allocation6 + $0xaa8] ss:$20 sps:$4 sm:$0xff]  }
 0x41f   :  { %8754 = vmatpush1.bf16.msra.mxu0 %v13304_v37  ;;  %8493 = vmatprep.subr.bf16.mxu1 %v13309_v32  ;;  %v13375_v37 = vld [vmem:[#allocation6 + $0xc0c] ss:$20 sps:$4 sm:$0xff]   ;;  %v13378_v32 = vld [vmem:[#allocation6 + $0xad4] ss:$20 sps:$4 sm:$0xff]  }
 0x420   :  { %8755 = vmatprep.subr.bf16.mxu0 %v13312_v39  ;;  %v13373_v39 = vld [vmem:[#allocation6 + $0xc08] ss:$20 sps:$4 sm:$0xff]  }
 0x422   :  { %8494 = vmatpush1.bf16.msra.mxu1 %v13307_v41  ;;  %v888_v41 = vrot.slane %v14368_v54, %v14326_v63  ;;  %v13388_v54 = vld [vmem:[#allocation6 + $0xb20] ss:$20 sps:$4 sm:$0xff]  }
 0x423   :  { %8756 = vmatpush1.bf16.msra.mxu0 %v13310_v42  ;;  %8495 = vmatprep.subr.bf16.mxu1 %v13315_v44  ;;  %v13376_v42 = vld [vmem:[#allocation6 + $0xad0] ss:$20 sps:$4 sm:$0xff]   ;;  %v13381_v44 = vld [vmem:[#allocation6 + $0xc34] ss:$20 sps:$4 sm:$0xff]  }
 0x424   :  { %8757 = vmatprep.subr.bf16.mxu0 %v13318_v45  ;;  %v13384_v45 = vld [vmem:[#allocation6 + $0xafc] ss:$20 sps:$4 sm:$0xff]  }
 0x426   :  { %8496 = vmatpush1.bf16.msra.mxu1 %v13313_v49  ;;  %v13379_v49 = vld [vmem:[#allocation6 + $0xc30] ss:$20 sps:$4 sm:$0xff]  }
 0x427   :  { %8758 = vmatpush1.bf16.msra.mxu0 %v13316_v50  ;;  %8497 = vmatprep.subr.bf16.mxu1 %v13321_v51  ;;  %v11898_v50 = vadd.f32 %v14379_v13, %v888_v41  ;;  %v13382_v51 = vld [vmem:[#allocation6 + $0xaf8] ss:$20 sps:$4 sm:$0xff]  }
 0x428   :  { %8759 = vmatprep.subr.bf16.mxu0 %v13324_v55  ;;  %v13387_v55 = vld [vmem:[#allocation6 + $0xc5c] ss:$20 sps:$4 sm:$0xff]   ;;  %v13444_v41 = vld [vmem:[#allocation6 + $0xc8c] ss:$20 sps:$4 sm:$0xff]  }
 0x42a   :  { %8498 = vmatpush1.bf16.msra.mxu1 %v13319_v57  ;;  %v13390_v57 = vld [vmem:[#allocation6 + $0xb24] ss:$20 sps:$4 sm:$0xff]  }
 0x42b   :  { %8760 = vmatpush1.bf16.msra.mxu0 %v13322_v58  ;;  %8499 = vmatprep.subr.bf16.mxu1 %v13327_v59  ;;  %v13385_v58 = vld [vmem:[#allocation6 + $0xc58] ss:$20 sps:$4 sm:$0xff]   ;;  %v4952_v59 = vmax.f32 %v11898_v50, 0.0  ;;  %v13445_v50 = vld [vmem:[#allocation6 + $0xde8] ss:$20 sps:$4 sm:$0xff]  }
 0x42c   :  { %8761 = vmatprep.subr.bf16.mxu0 %v13330_v20  ;;  %v13393_v20 = vld [vmem:[#allocation6 + $0xc84] ss:$20 sps:$4 sm:$0xff]  }
 0x42d   :  { %v14420_v13 = vpack.c.bf16 %v4952_v59, %v4952_v59  ;;  %v13454_v59 = vld [vmem:[#allocation6 + $0xcd8] ss:$20 sps:$4 sm:$0xff]  }
 0x42e   :  { %8500 = vmatpush1.bf16.msra.mxu1 %v13325_v60  ;;  %v4955_v60 = vmax.f32 %v14385_v12, 0.0  ;;  %v13397_v12 = vld [vmem:[#allocation6 + $0xca8] ss:$20 sps:$4 sm:$0xff]  }
 0x42f   :  { %8762 = vmatpush1.bf16.msra.mxu0 %v13328_v62  ;;  %8501 = vmatprep.subr.bf16.mxu1 %v13333_v6  ;;  %v13396_v62 = vld [vmem:[#allocation6 + $0xb4c] ss:$20 sps:$4 sm:$0xff]  }
 0x430   :  { %8763 = vmatprep.subr.bf16.mxu0 %v13336_v7  ;;  %v13391_v6 = vld [vmem:[#allocation6 + $0xc80] ss:$20 sps:$4 sm:$0xff]   ;;  %v13394_v7 = vld [vmem:[#allocation6 + $0xb48] ss:$20 sps:$4 sm:$0xff]  }
 0x432   :  { %8502 = vmatpush1.bf16.msra.mxu1 %v13331_v8  ;;  %v13399_v8 = vld [vmem:[#allocation6 + $0xcac] ss:$20 sps:$4 sm:$0xff]  }
 0x433   :  { %8764 = vmatpush1.bf16.msra.mxu0 %v13334_v9  ;;  %8503 = vmatprep.subr.bf16.mxu1 %v13339_v10  ;;  %v14422_v9 = vpack.c.bf16 %v4955_v60, %v4955_v60  ;;  %v13402_v10 = vld [vmem:[#allocation6 + $0xb74] ss:$20 sps:$4 sm:$0xff]   ;;  %v13457_v60 = vld [vmem:[#allocation6 + $0xe38] ss:$20 sps:$4 sm:$0xff]  }
 0x434   :  { %8765 = vmatprep.subr.bf16.mxu0 %v13342_v3  ;;  %v13400_v3 = vld [vmem:[#allocation6 + $0xb70] ss:$20 sps:$4 sm:$0xff]  }
 0x436   :  { %8504 = vmatpush1.bf16.msra.mxu1 %v13337_v48  ;;  %v13405_v48 = vld [vmem:[#allocation6 + $0xcd4] ss:$20 sps:$4 sm:$0xff]  }
 0x437   :  { %8766 = vmatpush1.bf16.msra.mxu0 %v13340_v14  ;;  %8505 = vmatprep.subr.bf16.mxu1 %v13345_v15  ;;  %v13408_v14 = vld [vmem:[#allocation6 + $0xb9c] ss:$20 sps:$4 sm:$0xff]  }
 0x438   :  { %8776 = vmatprep.subr.bf16.mxu0 %v13348_v5  ;;  %v13403_v15 = vld [vmem:[#allocation6 + $0xcd0] ss:$20 sps:$4 sm:$0xff]   ;;  %v13406_v5 = vld [vmem:[#allocation6 + $0xb98] ss:$20 sps:$4 sm:$0xff]  }
 0x43a   :  { %8768 = vmatmul.mubr.bf16.vlgmr.msra.gmra.mrb[20].mxu0 %v14408_v30  ;;  %8506 = vmatpush1.bf16.msra.mxu1 %v13343_v19  ;;  %v13411_v19 = vld [vmem:[#allocation6 + $0xcfc] ss:$20 sps:$4 sm:$0xff]  }
 0x43b   :  { %8777 = vmatpush1.bf16.msra.mxu0 %v13346_v21  ;;  %8808 = vmatprep.mubr.bf16.mxu0 %v14410_v31  ;;  %v13414_v21 = vld [vmem:[#allocation6 + $0xbc4] ss:$20 sps:$4 sm:$0xff]  }
 0x43c   :  { %8507 = vmatprep.subr.bf16.mxu1 %v13351_v22  ;;  %8778 = vmatprep.subr.bf16.mxu0 %v13354_v34  ;;  %v13409_v22 = vld [vmem:[#allocation6 + $0xcf8] ss:$20 sps:$4 sm:$0xff]   ;;  %v13412_v34 = vld [vmem:[#allocation6 + $0xbc0] ss:$20 sps:$4 sm:$0xff]  }
 0x43e   :  { %8508 = vmatpush1.bf16.msra.mxu1 %v13349_v46  ;;  %v13417_v46 = vld [vmem:[#allocation6 + $0xd24] ss:$20 sps:$4 sm:$0xff]  }
 0x43f   :  { %8779 = vmatpush1.bf16.msra.mxu0 %v13352_v53  ;;  %8509 = vmatprep.subr.bf16.mxu1 %v13357_v24  ;;  %v13420_v53 = vld [vmem:[#allocation6 + $0xbec] ss:$20 sps:$4 sm:$0xff]  }
 0x440   :  { %8780 = vmatprep.subr.bf16.mxu0 %v13360_v25  ;;  %v13415_v24 = vld [vmem:[#allocation6 + $0xd20] ss:$20 sps:$4 sm:$0xff]   ;;  %v13418_v25 = vld [vmem:[#allocation6 + $0xbe8] ss:$20 sps:$4 sm:$0xff]  }
 0x442   :  { %8510 = vmatpush1.bf16.msra.mxu1 %v13355_v17  ;;  %v13423_v17 = vld [vmem:[#allocation6 + $0xd4c] ss:$20 sps:$4 sm:$0xff]  }
 0x443   :  { %8781 = vmatpush1.bf16.msra.mxu0 %v13358_v27  ;;  %8511 = vmatprep.subr.bf16.mxu1 %v13363_v40  ;;  %v13426_v27 = vld [vmem:[#allocation6 + $0xc14] ss:$20 sps:$4 sm:$0xff]  }
 0x444   :  { %8782 = vmatprep.subr.bf16.mxu0 %v13366_v47  ;;  %v13421_v40 = vld [vmem:[#allocation6 + $0xd48] ss:$20 sps:$4 sm:$0xff]   ;;  %v13424_v47 = vld [vmem:[#allocation6 + $0xc10] ss:$20 sps:$4 sm:$0xff]  }
 0x446   :  { %8512 = vmatpush1.bf16.msra.mxu1 %v13361_v28  ;;  %v13429_v28 = vld [vmem:[#allocation6 + $0xd74] ss:$20 sps:$4 sm:$0xff]  }
 0x447   :  { %8783 = vmatpush1.bf16.msra.mxu0 %v13364_v29  ;;  %8513 = vmatprep.subr.bf16.mxu1 %v13369_v18  ;;  %v13432_v29 = vld [vmem:[#allocation6 + $0xc3c] ss:$20 sps:$4 sm:$0xff]  }
 0x448   :  { %8784 = vmatprep.subr.bf16.mxu0 %v13372_v26  ;;  %v13427_v18 = vld [vmem:[#allocation6 + $0xd70] ss:$20 sps:$4 sm:$0xff]   ;;  %v13430_v26 = vld [vmem:[#allocation6 + $0xc38] ss:$20 sps:$4 sm:$0xff]  }
 0x44a   :  { %8514 = vmatpush1.bf16.msra.mxu1 %v13367_v35  ;;  %v13435_v35 = vld [vmem:[#allocation6 + $0xd9c] ss:$20 sps:$4 sm:$0xff]  }
 0x44b   :  { %8785 = vmatpush1.bf16.msra.mxu0 %v13370_v36  ;;  %8515 = vmatprep.subr.bf16.mxu1 %v13375_v37  ;;  %v13438_v36 = vld [vmem:[#allocation6 + $0xc64] ss:$20 sps:$4 sm:$0xff]  }
 0x44c   :  { %8786 = vmatprep.subr.bf16.mxu0 %v13378_v32  ;;  %v13433_v37 = vld [vmem:[#allocation6 + $0xd98] ss:$20 sps:$4 sm:$0xff]   ;;  %v13436_v32 = vld [vmem:[#allocation6 + $0xc60] ss:$20 sps:$4 sm:$0xff]  }
 0x44e   :  { %8516 = vmatpush1.bf16.msra.mxu1 %v13373_v39  ;;  %v13441_v39 = vld [vmem:[#allocation6 + $0xdc4] ss:$20 sps:$4 sm:$0xff]  }
 0x44f   :  { %8787 = vmatpush1.bf16.msra.mxu0 %v13376_v42  ;;  %8517 = vmatprep.subr.bf16.mxu1 %v13381_v44  ;;  %v13439_v42 = vld [vmem:[#allocation6 + $0xdc0] ss:$20 sps:$4 sm:$0xff]   ;;  %v13442_v44 = vld [vmem:[#allocation6 + $0xc88] ss:$20 sps:$4 sm:$0xff]  }
 0x450   :  { %8788 = vmatprep.subr.bf16.mxu0 %v13384_v45  ;;  %v13447_v45 = vld [vmem:[#allocation6 + $0xdec] ss:$20 sps:$4 sm:$0xff]  }
 0x452   :  { %8518 = vmatpush1.bf16.msra.mxu1 %v13379_v49  ;;  %v13450_v49 = vld [vmem:[#allocation6 + $0xcb4] ss:$20 sps:$4 sm:$0xff]  }
 0x453   :  { %8789 = vmatpush1.bf16.msra.mxu0 %v13382_v51  ;;  %8519 = vmatprep.subr.bf16.mxu1 %v13387_v55  ;;  %v13448_v51 = vld [vmem:[#allocation6 + $0xcb0] ss:$20 sps:$4 sm:$0xff]   ;;  %v13453_v55 = vld [vmem:[#allocation6 + $0xe14] ss:$20 sps:$4 sm:$0xff]  }
 0x454   :  { %8790 = vmatprep.subr.bf16.mxu0 %v13390_v57  ;;  %v13456_v57 = vld [vmem:[#allocation6 + $0xcdc] ss:$20 sps:$4 sm:$0xff]  }
 0x456   :  { %8520 = vmatpush1.bf16.msra.mxu1 %v13385_v58  ;;  %v13451_v58 = vld [vmem:[#allocation6 + $0xe10] ss:$20 sps:$4 sm:$0xff]  }
 0x457   :  { %8791 = vmatpush1.bf16.msra.mxu0 %v13388_v54  ;;  %8530 = vmatprep.subr.bf16.mxu1 %v13393_v20  ;;  %v13459_v54 = vld [vmem:[#allocation6 + $0xe3c] ss:$20 sps:$4 sm:$0xff]   ;;  %v13462_v20 = vld [vmem:[#allocation6 + $0xd04] ss:$20 sps:$4 sm:$0xff]  }
 0x458   :  { %8792 = vmatprep.subr.bf16.mxu0 %v13396_v62  ;;  %v13460_v62 = vld [vmem:[#allocation6 + $0xd00] ss:$20 sps:$4 sm:$0xff]  }
 0x459   :  { %8522 = vmatmul.mubr.bf16.vlgmr.msra.gmra.mrb[16].mxu1 %v14420_v13 }
 0x45a   :  { %8531 = vmatpush1.bf16.msra.mxu1 %v13391_v6  ;;  %8562 = vmatprep.mubr.bf16.mxu1 %v14422_v9  ;;  %v13465_v6 = vld [vmem:[#allocation6 + $0xe64] ss:$20 sps:$4 sm:$0xff]  }
 0x45b   :  { %8793 = vmatpush1.bf16.msra.mxu0 %v13394_v7  ;;  %8532 = vmatprep.subr.bf16.mxu1 %v13399_v8  ;;  %v13468_v7 = vld [vmem:[#allocation6 + $0xd2c] ss:$20 sps:$4 sm:$0xff]  }
 0x45c   :  { %8794 = vmatprep.subr.bf16.mxu0 %v13402_v10  ;;  %v13463_v8 = vld [vmem:[#allocation6 + $0xe60] ss:$20 sps:$4 sm:$0xff]   ;;  %v13466_v10 = vld [vmem:[#allocation6 + $0xd28] ss:$20 sps:$4 sm:$0xff]  }
 0x45e   :  { %8533 = vmatpush1.bf16.msra.mxu1 %v13397_v12  ;;  %v13471_v12 = vld [vmem:[#allocation6 + $0xe8c] ss:$20 sps:$4 sm:$0xff]  }
 0x45f   :  { %8795 = vmatpush1.bf16.msra.mxu0 %v13400_v3  ;;  %8534 = vmatprep.subr.bf16.mxu1 %v13405_v48  ;;  %v13474_v3 = vld [vmem:[#allocation6 + $0xd54] ss:$20 sps:$4 sm:$0xff]  }
 0x460   :  { %8796 = vmatprep.subr.bf16.mxu0 %v13408_v14  ;;  %v13469_v48 = vld [vmem:[#allocation6 + $0xe88] ss:$20 sps:$4 sm:$0xff]   ;;  %v13472_v14 = vld [vmem:[#allocation6 + $0xd50] ss:$20 sps:$4 sm:$0xff]  }
 0x462   :  { %8535 = vmatpush1.bf16.msra.mxu1 %v13403_v15  ;;  %v13477_v15 = vld [vmem:[#allocation6 + $0xeb4] ss:$20 sps:$4 sm:$0xff]  }
 0x463   :  { %8797 = vmatpush1.bf16.msra.mxu0 %v13406_v5  ;;  %8536 = vmatprep.subr.bf16.mxu1 %v13411_v19  ;;  %v13480_v5 = vld [vmem:[#allocation6 + $0xd7c] ss:$20 sps:$4 sm:$0xff]  }
 0x464   :  { %8798 = vmatprep.subr.bf16.mxu0 %v13414_v21  ;;  %v13475_v19 = vld [vmem:[#allocation6 + $0xeb0] ss:$20 sps:$4 sm:$0xff]   ;;  %v13478_v21 = vld [vmem:[#allocation6 + $0xd78] ss:$20 sps:$4 sm:$0xff]  }
 0x466   :  { %8537 = vmatpush1.bf16.msra.mxu1 %v13409_v22  ;;  %v13483_v22 = vld [vmem:[#allocation6 + $0xedc] ss:$20 sps:$4 sm:$0xff]  }
 0x467   :  { %8799 = vmatpush1.bf16.msra.mxu0 %v13412_v34  ;;  %8538 = vmatprep.subr.bf16.mxu1 %v13417_v46  ;;  %v13486_v34 = vld [vmem:[#allocation6 + $0xda4] ss:$20 sps:$4 sm:$0xff]  }
 0x468   :  { %8800 = vmatprep.subr.bf16.mxu0 %v13420_v53  ;;  %v13481_v46 = vld [vmem:[#allocation6 + $0xed8] ss:$20 sps:$4 sm:$0xff]   ;;  %v4954_v53 = vmax.f32 %v14381_v16, 0.0  ;;  %v13493_v16 = vld [vmem:[#allocation6 + $0xf28] ss:$20 sps:$4 sm:$0xff]  }
 0x46a   :  { %8539 = vmatpush1.bf16.msra.mxu1 %v13415_v24  ;;  %v13484_v24 = vld [vmem:[#allocation6 + $0xda0] ss:$20 sps:$4 sm:$0xff]  }
 0x46b   :  { %8801 = vmatpush1.bf16.msra.mxu0 %v13418_v25  ;;  %8540 = vmatprep.subr.bf16.mxu1 %v13423_v17  ;;  %v13489_v25 = vld [vmem:[#allocation6 + $0xf04] ss:$20 sps:$4 sm:$0xff]   ;;  %v13492_v17 = vld [vmem:[#allocation6 + $0xdcc] ss:$20 sps:$4 sm:$0xff]  }
 0x46c   :  { %8802 = vmatprep.subr.bf16.mxu0 %v13426_v27  ;;  %v13487_v27 = vld [vmem:[#allocation6 + $0xf00] ss:$20 sps:$4 sm:$0xff]  }
 0x46e   :  { %8541 = vmatpush1.bf16.msra.mxu1 %v13421_v40  ;;  %v14429_v40 = vpack.c.bf16 %v4954_v53, %v4954_v53  ;;  %v13549_v53 = vld [vmem:[#allocation6 + $0x60] ss:$20 sps:$4 sm:$0xff]  }
 0x46f   :  { %8803 = vmatpush1.bf16.msra.mxu0 %v13424_v47  ;;  %8542 = vmatprep.subr.bf16.mxu1 %v13429_v28  ;;  %v13490_v47 = vld [vmem:[#allocation6 + $0xdc8] ss:$20 sps:$4 sm:$0xff]   ;;  %v13495_v28 = vld [vmem:[#allocation6 + $0xf2c] ss:$20 sps:$4 sm:$0xff]  }
 0x470   :  { %8804 = vmatprep.subr.bf16.mxu0 %v13432_v29  ;;  %v13498_v29 = vld [vmem:[#allocation6 + $0xdf4] ss:$20 sps:$4 sm:$0xff]  }
 0x472   :  { %8543 = vmatpush1.bf16.msra.mxu1 %v13427_v18  ;;  %v14034_v18 = vmov 0  }
 0x473   :  { %8805 = vmatpush1.bf16.msra.mxu0 %v13430_v26  ;;  %8544 = vmatprep.subr.bf16.mxu1 %v13435_v35  ;;  %v13496_v26 = vld [vmem:[#allocation6 + $0xdf0] ss:$20 sps:$4 sm:$0xff]   ;;  %v13501_v35 = vld [vmem:[#allocation6 + $0xf54] ss:$20 sps:$4 sm:$0xff]  }
 0x474   :  { %8806 = vmatprep.subr.bf16.mxu0 %v13438_v36  ;;  %v13504_v36 = vld [vmem:[#allocation6 + $0xe1c] ss:$20 sps:$4 sm:$0xff]  }
 0x476   :  { %8545 = vmatpush1.bf16.msra.mxu1 %v13433_v37  ;;  %v13499_v37 = vld [vmem:[#allocation6 + $0xf50] ss:$20 sps:$4 sm:$0xff]  }
 0x477   :  { %8807 = vmatpush1.bf16.msra.mxu0 %v13436_v32  ;;  %8546 = vmatprep.subr.bf16.mxu1 %v13441_v39  ;;  %v13502_v32 = vld [vmem:[#allocation6 + $0xe18] ss:$20 sps:$4 sm:$0xff]   ;;  %v13507_v39 = vld [vmem:[#allocation6 + $0xf7c] ss:$20 sps:$4 sm:$0xff]  }
 0x478   :  { %8817 = vmatprep.subr.bf16.mxu0 %v13444_v41  ;;  %v13510_v41 = vld [vmem:[#allocation6 + $0xe44] ss:$20 sps:$4 sm:$0xff]  }
 0x47a   :  { %8809 = vmatmul.mubr.bf16.vlgmr.msra.gmra.mrb[20].mxu0 %v14420_v13  ;;  %8547 = vmatpush1.bf16.msra.mxu1 %v13439_v42  ;;  %v13505_v42 = vld [vmem:[#allocation6 + $0xf78] ss:$20 sps:$4 sm:$0xff]  }
 0x47b   :  { %8818 = vmatpush1.bf16.msra.mxu0 %v13442_v44  ;;  %8849 = vmatprep.mubr.bf16.mxu0 %v14422_v9  ;;  %v13508_v44 = vld [vmem:[#allocation6 + $0xe40] ss:$20 sps:$4 sm:$0xff]  }
 0x47c   :  { %8548 = vmatprep.subr.bf16.mxu1 %v13447_v45  ;;  %8819 = vmatprep.subr.bf16.mxu0 %v13450_v49  ;;  %v13513_v45 = vld [vmem:[#allocation6 + $0xfa4] ss:$20 sps:$4 sm:$0xff]   ;;  %v13516_v49 = vld [vmem:[#allocation6 + $0xe6c] ss:$20 sps:$4 sm:$0xff]  }
 0x47e   :  { %8549 = vmatpush1.bf16.msra.mxu1 %v13445_v50  ;;  %v13511_v50 = vld [vmem:[#allocation6 + $0xfa0] ss:$20 sps:$4 sm:$0xff]  }
 0x47f   :  { %8820 = vmatpush1.bf16.msra.mxu0 %v13448_v51  ;;  %8550 = vmatprep.subr.bf16.mxu1 %v13453_v55  ;;  %v13514_v51 = vld [vmem:[#allocation6 + $0xe68] ss:$20 sps:$4 sm:$0xff]   ;;  %v13519_v55 = vld [vmem:[#allocation6 + $0xfcc] ss:$20 sps:$4 sm:$0xff]  }
 0x480   :  { %8821 = vmatprep.subr.bf16.mxu0 %v13456_v57  ;;  %v13522_v57 = vld [vmem:[#allocation6 + $0xe94] ss:$20 sps:$4 sm:$0xff]  }
 0x482   :  { %8551 = vmatpush1.bf16.msra.mxu1 %v13451_v58  ;;  %v13517_v58 = vld [vmem:[#allocation6 + $0xfc8] ss:$20 sps:$4 sm:$0xff]  }
 0x483   :  { %8822 = vmatpush1.bf16.msra.mxu0 %v13454_v59  ;;  %8552 = vmatprep.subr.bf16.mxu1 %v13459_v54  ;;  %v13520_v59 = vld [vmem:[#allocation6 + $0xe90] ss:$20 sps:$4 sm:$0xff]   ;;  %v13525_v54 = vld [vmem:[#allocation6 + $0xff4] ss:$20 sps:$4 sm:$0xff]  }
 0x484   :  { %8823 = vmatprep.subr.bf16.mxu0 %v13462_v20  ;;  %v13528_v20 = vld [vmem:[#allocation6 + $0xebc] ss:$20 sps:$4 sm:$0xff]  }
 0x486   :  { %8553 = vmatpush1.bf16.msra.mxu1 %v13457_v60  ;;  %v13523_v60 = vld [vmem:[#allocation6 + $0xff0] ss:$20 sps:$4 sm:$0xff]  }
 0x487   :  { %8824 = vmatpush1.bf16.msra.mxu0 %v13460_v62  ;;  %8554 = vmatprep.subr.bf16.mxu1 %v13465_v6  ;;  %v13526_v62 = vld [vmem:[#allocation6 + $0xeb8] ss:$20 sps:$4 sm:$0xff]   ;;  %v13531_v6 = vld [vmem:[#allocation6 + $0x101c] ss:$20 sps:$4 sm:$0xff]  }
 0x488   :  { %8825 = vmatprep.subr.bf16.mxu0 %v13468_v7  ;;  %v13534_v7 = vld [vmem:[#allocation6 + $0xee4] ss:$20 sps:$4 sm:$0xff]  }
 0x48a   :  { %8555 = vmatpush1.bf16.msra.mxu1 %v13463_v8  ;;  %v13529_v8 = vld [vmem:[#allocation6 + $0x1018] ss:$20 sps:$4 sm:$0xff]  }
 0x48b   :  { %8826 = vmatpush1.bf16.msra.mxu0 %v13466_v10  ;;  %8556 = vmatprep.subr.bf16.mxu1 %v13471_v12  ;;  %v4956_v10 = vmax.f32 %v14406_v23, 0.0  ;;  %v13532_v12 = vld [vmem:[#allocation6 + $0xee0] ss:$20 sps:$4 sm:$0xff]   ;;  %v13544_v23 = vld [vmem:[#allocation6 + $0x38] ss:$20 sps:$4 sm:$0xff]  }
 0x48c   :  { %8827 = vmatprep.subr.bf16.mxu0 %v13474_v3  ;;  %v13538_v3 = vld [vmem:[#allocation6 + $0x150] ss:$20 sps:$4 sm:$0xff]  }
 0x48e   :  { %8557 = vmatpush1.bf16.msra.mxu1 %v13469_v48  ;;  %v13537_v48 = vld [vmem:[#allocation6 + $0xf0c] ss:$20 sps:$4 sm:$0xff]  }
 0x48f   :  { %8828 = vmatpush1.bf16.msra.mxu0 %v13472_v14  ;;  %8558 = vmatprep.subr.bf16.mxu1 %v13477_v15  ;;  %v13539_v14 = vld [vmem:[#allocation6 + $0x10] ss:$20 sps:$4 sm:$0xff]   ;;  %v14434_v15 = vpack.c.bf16 %v4956_v10, %v4956_v10  ;;  %v13587_v10 = vld [vmem:[#allocation6 + $0x448] ss:$20 sps:$4 sm:$0xff]  }
 0x490   :  { %8829 = vmatprep.subr.bf16.mxu0 %v13480_v5  ;;  %v13535_v5 = vld [vmem:[#allocation6 + $0xf08] ss:$20 sps:$4 sm:$0xff]  }
 0x492   :  { %8559 = vmatpush1.bf16.msra.mxu1 %v13475_v19  ;;  %v13542_v19 = vld [vmem:[#allocation6 + $0xf34] ss:$20 sps:$4 sm:$0xff]  }
 0x493   :  { %8830 = vmatpush1.bf16.msra.mxu0 %v13478_v21  ;;  %8560 = vmatprep.subr.bf16.mxu1 %v13483_v22  ;;  %v13543_v21 = vld [vmem:[#allocation6 + $0x178] ss:$20 sps:$4 sm:$0xff]   ;;  %v13540_v22 = vld [vmem:[#allocation6 + $0xf30] ss:$20 sps:$4 sm:$0xff]  }
 0x494   :  { %8831 = vmatprep.subr.bf16.mxu0 %v13486_v34  ;;  %v13548_v34 = vld [vmem:[#allocation6 + $0x1a0] ss:$20 sps:$4 sm:$0xff]  }
 0x496   :  { %8561 = vmatpush1.bf16.msra.mxu1 %v13481_v46  ;;  %v13547_v46 = vld [vmem:[#allocation6 + $0xf5c] ss:$20 sps:$4 sm:$0xff]  }
 0x497   :  { %8832 = vmatpush1.bf16.msra.mxu0 %v13484_v24  ;;  %8571 = vmatprep.subr.bf16.mxu1 %v13489_v25  ;;  %v13545_v24 = vld [vmem:[#allocation6 + $0xf58] ss:$20 sps:$4 sm:$0xff]   ;;  %v13553_v25 = vld [vmem:[#allocation6 + $0x1c8] ss:$20 sps:$4 sm:$0xff]  }
 0x498   :  { %8833 = vmatprep.subr.bf16.mxu0 %v13492_v17  ;;  %v13552_v17 = vld [vmem:[#allocation6 + $0xf84] ss:$20 sps:$4 sm:$0xff]  }
 0x499   :  { %8563 = vmatmul.mubr.bf16.vlgmr.msra.gmra.mrb[16].mxu1 %v14429_v40 }
 0x49a   :  { %8572 = vmatpush1.bf16.msra.mxu1 %v13487_v27  ;;  %8603 = vmatprep.mubr.bf16.mxu1 %v14034_v18  ;;  %v13554_v27 = vld [vmem:[#allocation6 + $0x88] ss:$20 sps:$4 sm:$0xff]  }
 0x49b   :  { %8834 = vmatpush1.bf16.msra.mxu0 %v13490_v47  ;;  %8573 = vmatprep.subr.bf16.mxu1 %v13495_v28  ;;  %v13550_v47 = vld [vmem:[#allocation6 + $0xf80] ss:$20 sps:$4 sm:$0xff]  }
 0x49c   :  { %8835 = vmatprep.subr.bf16.mxu0 %v13498_v29  ;;  %v13557_v28 = vld [vmem:[#allocation6 + $0xfac] ss:$20 sps:$4 sm:$0xff]   ;;  %v13559_v29 = vld [vmem:[#allocation6 + $0xb0] ss:$20 sps:$4 sm:$0xff]  }
 0x49e   :  { %8574 = vmatpush1.bf16.msra.mxu1 %v13493_v16  ;;  %v13555_v16 = vld [vmem:[#allocation6 + $0xfa8] ss:$20 sps:$4 sm:$0xff]  }
 0x49f   :  { %8836 = vmatpush1.bf16.msra.mxu0 %v13496_v26  ;;  %8575 = vmatprep.subr.bf16.mxu1 %v13501_v35  ;;  %v13563_v26 = vld [vmem:[#allocation6 + $0x218] ss:$20 sps:$4 sm:$0xff]   ;;  %v13562_v35 = vld [vmem:[#allocation6 + $0xfd4] ss:$20 sps:$4 sm:$0xff]  }
 0x4a0   :  { %8837 = vmatprep.subr.bf16.mxu0 %v13504_v36  ;;  %v13564_v36 = vld [vmem:[#allocation6 + $0xd8] ss:$20 sps:$4 sm:$0xff]  }
 0x4a2   :  { %8576 = vmatpush1.bf16.msra.mxu1 %v13499_v37  ;;  %v13560_v37 = vld [vmem:[#allocation6 + $0xfd0] ss:$20 sps:$4 sm:$0xff]  }
 0x4a3   :  { %8838 = vmatpush1.bf16.msra.mxu0 %v13502_v32  ;;  %8577 = vmatprep.subr.bf16.mxu1 %v13507_v39  ;;  %v13568_v32 = vld [vmem:[#allocation6 + $0x240] ss:$20 sps:$4 sm:$0xff]   ;;  %v13567_v39 = vld [vmem:[#allocation6 + $0xffc] ss:$20 sps:$4 sm:$0xff]  }
 0x4a4   :  { %8839 = vmatprep.subr.bf16.mxu0 %v13510_v41  ;;  %v13569_v41 = vld [vmem:[#allocation6 + $0x100] ss:$20 sps:$4 sm:$0xff]  }
 0x4a6   :  { %8578 = vmatpush1.bf16.msra.mxu1 %v13505_v42  ;;  %v13565_v42 = vld [vmem:[#allocation6 + $0xff8] ss:$20 sps:$4 sm:$0xff]  }
 0x4a7   :  { %8840 = vmatpush1.bf16.msra.mxu0 %v13508_v44  ;;  %8579 = vmatprep.subr.bf16.mxu1 %v13513_v45  ;;  %v13573_v44 = vld [vmem:[#allocation6 + $0x268] ss:$20 sps:$4 sm:$0xff]   ;;  %v13572_v45 = vld [vmem:[#allocation6 + $0x1024] ss:$20 sps:$4 sm:$0xff]  }
 0x4a8   :  { %8841 = vmatprep.subr.bf16.mxu0 %v13516_v49  ;;  %v13574_v49 = vld [vmem:[#allocation6 + $0x128] ss:$20 sps:$4 sm:$0xff]  }
 0x4aa   :  { %8580 = vmatpush1.bf16.msra.mxu1 %v13511_v50  ;;  %v13570_v50 = vld [vmem:[#allocation6 + $0x1020] ss:$20 sps:$4 sm:$0xff]  }
 0x4ab   :  { %8842 = vmatpush1.bf16.msra.mxu0 %v13514_v51  ;;  %8581 = vmatprep.subr.bf16.mxu1 %v13519_v55  ;;  %v13576_v51 = vld [vmem:[#allocation6 + $0x650] ss:$20 sps:$4 sm:$0xff]  }
 0x4ac   :  { %8843 = vmatprep.subr.bf16.mxu0 %v13522_v57  ;;  %v13575_v55 = vld [vmem:[#allocation6 + $0x3d0] ss:$20 sps:$4 sm:$0xff]  }
 0x4ad   :  { %v13578_v57 = vld [vmem:[#allocation6 + $0x510] ss:$20 sps:$4 sm:$0xff]  }
 0x4ae   :  { %8582 = vmatpush1.bf16.msra.mxu1 %v13517_v58  ;;  %v13577_v58 = vld [vmem:[#allocation6 + $0x290] ss:$20 sps:$4 sm:$0xff]  }
 0x4af   :  { %8844 = vmatpush1.bf16.msra.mxu0 %v13520_v59  ;;  %8583 = vmatprep.subr.bf16.mxu1 %v13525_v54  ;;  %v13579_v59 = vld [vmem:[#allocation6 + $0x3f8] ss:$20 sps:$4 sm:$0xff]  }
 0x4b0   :  { %8845 = vmatprep.subr.bf16.mxu0 %v13528_v20  ;;  %v13580_v54 = vld [vmem:[#allocation6 + $0x678] ss:$20 sps:$4 sm:$0xff]  }
 0x4b1   :  { %v13582_v20 = vld [vmem:[#allocation6 + $0x538] ss:$20 sps:$4 sm:$0xff]  }
 0x4b2   :  { %8584 = vmatpush1.bf16.msra.mxu1 %v13523_v60  ;;  %v13581_v60 = vld [vmem:[#allocation6 + $0x2b8] ss:$20 sps:$4 sm:$0xff]  }
 0x4b3   :  { %8846 = vmatpush1.bf16.msra.mxu0 %v13526_v62  ;;  %8585 = vmatprep.subr.bf16.mxu1 %v13531_v6  ;;  %v13584_v62 = vld [vmem:[#allocation6 + $0x6a0] ss:$20 sps:$4 sm:$0xff]  }
 0x4b4   :  { %8847 = vmatprep.subr.bf16.mxu0 %v13534_v7  ;;  %v13583_v6 = vld [vmem:[#allocation6 + $0x420] ss:$20 sps:$4 sm:$0xff]  }
 0x4b5   :  { %v13586_v7 = vld [vmem:[#allocation6 + $0x560] ss:$20 sps:$4 sm:$0xff]  }
 0x4b6   :  { %8586 = vmatpush1.bf16.msra.mxu1 %v13529_v8  ;;  %v13588_v8 = vld [vmem:[#allocation6 + $0x6c8] ss:$20 sps:$4 sm:$0xff]  }
 0x4b7   :  { %8848 = vmatpush1.bf16.msra.mxu0 %v13532_v12  ;;  %11612 = vmatprep.subr.bf16.mxu1 %v13538_v3  ;;  %v13590_v12 = vld [vmem:[#allocation6 + $0x588] ss:$20 sps:$4 sm:$0xff]   ;;  %v13592_v3 = vld [vmem:[#allocation6 + $0x6f0] ss:$20 sps:$4 sm:$0xff]  }
 0x4b8   :  { %8858 = vmatprep.subr.bf16.mxu0 %v13537_v48  ;;  %v13591_v48 = vld [vmem:[#allocation6 + $0x470] ss:$20 sps:$4 sm:$0xff]  }
 0x4b9   :  { %8604 = vmatmul.mubr.bf16.vlgmr.msra.gmra.mrb[16].mxu1 %v14434_v15 }
 0x4ba   :  { %8850 = vmatmul.mubr.bf16.vlgmr.msra.gmra.mrb[20].mxu0 %v14429_v40  ;;  %11613 = vmatpush3.bf16.msra.mxu1 %v13539_v14  ;;  %v13593_v14 = vld [vmem:[#allocation6 + $0x330] ss:$20 sps:$4 sm:$0xff]  }
 0x4bb   :  { %8859 = vmatpush1.bf16.msra.mxu0 %v13535_v5  ;;  %8931 = vmatprep.mubr.bf16.mxu1 %v14317_v11  ;;  %v13558_v11 = vld [vmem:[#allocation6 + $0x1f0] ss:$20 sps:$4 sm:$0xff]   ;;  %v13596_v5 = vld [vmem:[#allocation6 + $0x718] ss:$20 sps:$4 sm:$0xff]  }
 0x4bc   :  { %8860 = vmatprep.subr.bf16.mxu0 %v13542_v19  ;;  %11614 = vmatprep.subr.bf16.mxu1 %v13543_v21  ;;  %v13595_v19 = vld [vmem:[#allocation6 + $0x498] ss:$20 sps:$4 sm:$0xff]  }
 0x4bd   :  { %8890 = vmatprep.mubr.bf16.mxu0 %v14034_v18  ;;  %v13598_v21 = vld [vmem:[#allocation6 + $0x5d8] ss:$20 sps:$4 sm:$0xff]  }
 0x4be   :  { %11615 = vmatpush3.bf16.msra.mxu1 %v13544_v23  ;;  %v13597_v23 = vld [vmem:[#allocation6 + $0x358] ss:$20 sps:$4 sm:$0xff]  }
 0x4bf   :  { %8861 = vmatpush1.bf16.msra.mxu0 %v13540_v22  ;;  %11616 = vmatprep.subr.bf16.mxu1 %v13548_v34  ;;  %v13600_v22 = vld [vmem:[#allocation6 + $0x740] ss:$20 sps:$4 sm:$0xff]  }
 0x4c0   :  { %8862 = vmatprep.subr.bf16.mxu0 %v13547_v46  ;;  %v13599_v34 = vld [vmem:[#allocation6 + $0x4c0] ss:$20 sps:$4 sm:$0xff]  }
 0x4c1   :  { %v13602_v46 = vld [vmem:[#allocation6 + $0x600] ss:$20 sps:$4 sm:$0xff]  }
 0x4c2   :  { %11617 = vmatpush3.bf16.msra.mxu1 %v13549_v53  ;;  %v13601_v53 = vld [vmem:[#allocation6 + $0x380] ss:$20 sps:$4 sm:$0xff]  }
 0x4c3   :  { %8863 = vmatpush1.bf16.msra.mxu0 %v13545_v24  ;;  %11618 = vmatprep.subr.bf16.mxu1 %v13553_v25  ;;  %v13604_v24 = vld [vmem:[#allocation6 + $0x768] ss:$20 sps:$4 sm:$0xff]  }
 0x4c4   :  { %8864 = vmatprep.subr.bf16.mxu0 %v13552_v17  ;;  %v13603_v25 = vld [vmem:[#allocation6 + $0x4e8] ss:$20 sps:$4 sm:$0xff]  }
 0x4c5   :  { %v13606_v17 = vld [vmem:[#allocation6 + $0x628] ss:$20 sps:$4 sm:$0xff]  }
 0x4c6   :  { %11619 = vmatpush3.bf16.msra.mxu1 %v13554_v27  ;;  %v13605_v27 = vld [vmem:[#allocation6 + $0x3a8] ss:$20 sps:$4 sm:$0xff]  }
 0x4c7   :  { %8865 = vmatpush1.bf16.msra.mxu0 %v13550_v47  ;;  %11620 = vmatprep.subr.bf16.mxu1 %v13558_v11  ;;  %v13608_v47 = vld [vmem:[#allocation6 + $0xb50] ss:$20 sps:$4 sm:$0xff]  }
 0x4c8   :  { %8866 = vmatprep.subr.bf16.mxu0 %v13557_v28  ;;  %v13607_v11 = vld [vmem:[#allocation6 + $0x8d0] ss:$20 sps:$4 sm:$0xff]  }
 0x4c9   :  { %v13610_v28 = vld [vmem:[#allocation6 + $0xa10] ss:$20 sps:$4 sm:$0xff]  }
 0x4ca   :  { %11621 = vmatpush3.bf16.msra.mxu1 %v13559_v29  ;;  %v13609_v29 = vld [vmem:[#allocation6 + $0x790] ss:$20 sps:$4 sm:$0xff]  }
 0x4cb   :  { %8867 = vmatpush1.bf16.msra.mxu0 %v13555_v16  ;;  %11622 = vmatprep.subr.bf16.mxu1 %v13563_v26  ;;  %v13611_v16 = vld [vmem:[#allocation6 + $0x8f8] ss:$20 sps:$4 sm:$0xff]  }
 0x4cc   :  { %8868 = vmatprep.subr.bf16.mxu0 %v13562_v35  ;;  %v13612_v26 = vld [vmem:[#allocation6 + $0xb78] ss:$20 sps:$4 sm:$0xff]  }
 0x4cd   :  { %v13614_v35 = vld [vmem:[#allocation6 + $0xa38] ss:$20 sps:$4 sm:$0xff]  }
 0x4ce   :  { %11623 = vmatpush3.bf16.msra.mxu1 %v13564_v36  ;;  %v13613_v36 = vld [vmem:[#allocation6 + $0x7b8] ss:$20 sps:$4 sm:$0xff]  }
 0x4cf   :  { %8869 = vmatpush1.bf16.msra.mxu0 %v13560_v37  ;;  %11624 = vmatprep.subr.bf16.mxu1 %v13568_v32  ;;  %v13616_v37 = vld [vmem:[#allocation6 + $0xba0] ss:$20 sps:$4 sm:$0xff]  }
 0x4d0   :  { %8870 = vmatprep.subr.bf16.mxu0 %v13567_v39  ;;  %v13615_v32 = vld [vmem:[#allocation6 + $0x920] ss:$20 sps:$4 sm:$0xff]  }
 0x4d1   :  { %v13618_v39 = vld [vmem:[#allocation6 + $0xa60] ss:$20 sps:$4 sm:$0xff]  }
 0x4d2   :  { %11625 = vmatpush3.bf16.msra.mxu1 %v13569_v41  ;;  %v13620_v41 = vld [vmem:[#allocation6 + $0xbc8] ss:$20 sps:$4 sm:$0xff]  }
 0x4d3   :  { %8871 = vmatpush1.bf16.msra.mxu0 %v13565_v42  ;;  %11626 = vmatprep.subr.bf16.mxu1 %v13573_v44  ;;  %v13622_v42 = vld [vmem:[#allocation6 + $0xa88] ss:$20 sps:$4 sm:$0xff]   ;;  %v13624_v44 = vld [vmem:[#allocation6 + $0xbf0] ss:$20 sps:$4 sm:$0xff]  }
 0x4d4   :  { %8872 = vmatprep.subr.bf16.mxu0 %v13572_v45  ;;  %v13623_v45 = vld [vmem:[#allocation6 + $0x970] ss:$20 sps:$4 sm:$0xff]  }
 0x4d6   :  { %11627 = vmatpush3.bf16.msra.mxu1 %v13574_v49  ;;  %v13625_v49 = vld [vmem:[#allocation6 + $0x830] ss:$20 sps:$4 sm:$0xff]  }
 0x4d7   :  { %8873 = vmatpush1.bf16.msra.mxu0 %v13570_v50  ;;  %11656 = vmatprep.subr.bf16.mxu1 %v13576_v51  ;;  %v13628_v50 = vld [vmem:[#allocation6 + $0xc18] ss:$20 sps:$4 sm:$0xff]  }
 0x4d8   :  { %11634 = vmatprep.subr.bf16.mxu0 %v13575_v55  ;;  %v13627_v51 = vld [vmem:[#allocation6 + $0x998] ss:$20 sps:$4 sm:$0xff]  }
 0x4d9   :  { %8932 = vmatmul.mubr.bf16.vlgmr.msra.gmra.mrb[20].mxu1 %v14337_v1  ;;  %v13585_v1 = vld [vmem:[#allocation6 + $0x2e0] ss:$20 sps:$4 sm:$0xff]   ;;  %v13630_v55 = vld [vmem:[#allocation6 + $0xad8] ss:$20 sps:$4 sm:$0xff]  }
 0x4da   :  { %8891 = vmatmul.mubr.bf16.vlgmr.msra.gmra.mrb[20].mxu0 %v14434_v15  ;;  %11657 = vmatpush3.bf16.msra.mxu1 %v13578_v57  ;;  %v13629_v57 = vld [vmem:[#allocation6 + $0x858] ss:$20 sps:$4 sm:$0xff]  }
 0x4db   :  { %11635 = vmatpush3.bf16.msra.mxu0 %v13577_v58  ;;  %8971 = vmatprep.mubr.bf16.mxu0 %v14339_v4  ;;  %v13589_v4 = vld [vmem:[#allocation6 + $0x308] ss:$20 sps:$4 sm:$0xff]   ;;  %v13632_v58 = vld [vmem:[#allocation6 + $0xc40] ss:$20 sps:$4 sm:$0xff]  }
 0x4dc   :  { %9011 = vmatprep.mubr.bf16.mxu1 %v14358_v52  ;;  %11636 = vmatprep.subr.bf16.mxu0 %v13579_v59  ;;  %v13594_v52 = vld [vmem:[#allocation6 + $0x5b0] ss:$20 sps:$4 sm:$0xff]   ;;  %v13631_v59 = vld [vmem:[#allocation6 + $0x9c0] ss:$20 sps:$4 sm:$0xff]  }
 0x4dd   :  { %11658 = vmatprep.subr.bf16.mxu1 %v13580_v54  ;;  %v13634_v54 = vld [vmem:[#allocation6 + $0xb00] ss:$20 sps:$4 sm:$0xff]  }
 0x4de   :  { %11659 = vmatpush3.bf16.msra.mxu1 %v13582_v20  ;;  %v13633_v20 = vld [vmem:[#allocation6 + $0x880] ss:$20 sps:$4 sm:$0xff]  }
 0x4df   :  { %11637 = vmatpush3.bf16.msra.mxu0 %v13581_v60  ;;  %11660 = vmatprep.subr.bf16.mxu1 %v13584_v62  ;;  %v13636_v60 = vld [vmem:[#allocation6 + $0xc68] ss:$20 sps:$4 sm:$0xff]  }
 0x4e0   :  { %11638 = vmatprep.subr.bf16.mxu0 %v13583_v6  ;;  %v13635_v62 = vld [vmem:[#allocation6 + $0x9e8] ss:$20 sps:$4 sm:$0xff]  }
 0x4e1   :  { %v13638_v6 = vld [vmem:[#allocation6 + $0xb28] ss:$20 sps:$4 sm:$0xff]  }
 0x4e2   :  { %11661 = vmatpush3.bf16.msra.mxu1 %v13586_v7  ;;  %v13637_v7 = vld [vmem:[#allocation6 + $0x8a8] ss:$20 sps:$4 sm:$0xff]  }
 0x4e3   :  { %11639 = vmatpush3.bf16.msra.mxu0 %v13585_v1  ;;  %11662 = vmatprep.subr.bf16.mxu1 %v13588_v8  ;;  %v13639_v1 = vld [vmem:[#allocation6 + $0xdd0] ss:$20 sps:$4 sm:$0xff]  }
 0x4e4   :  { %11640 = vmatprep.subr.bf16.mxu0 %v13587_v10  ;;  %v13641_v8 = vld [vmem:[#allocation6 + $0xf10] ss:$20 sps:$4 sm:$0xff]   ;;  %v14035_v10 = vmov 0.0  }
 0x4e6   :  { %11663 = vmatpush3.bf16.msra.mxu1 %v13590_v12  ;;  %v13640_v12 = vld [vmem:[#allocation6 + $0xc90] ss:$20 sps:$4 sm:$0xff]  }
 0x4e7   :  { %11641 = vmatpush3.bf16.msra.mxu0 %v13589_v4  ;;  %11664 = vmatprep.subr.bf16.mxu1 %v13592_v3  ;;  %v13642_v4 = vld [vmem:[#allocation6 + $0xdf8] ss:$20 sps:$4 sm:$0xff]  }
 0x4e8   :  { %11642 = vmatprep.subr.bf16.mxu0 %v13591_v48  ;;  %v13644_v3 = vld [vmem:[#allocation6 + $0xf38] ss:$20 sps:$4 sm:$0xff]  }
 0x4e9   :  { %v13643_v48 = vld [vmem:[#allocation6 + $0xcb8] ss:$20 sps:$4 sm:$0xff]  }
 0x4ea   :  { %11665 = vmatpush3.bf16.msra.mxu1 %v13594_v52  ;;  %v13645_v52 = vld [vmem:[#allocation6 + $0xe20] ss:$20 sps:$4 sm:$0xff]  }
 0x4eb   :  { %11643 = vmatpush3.bf16.msra.mxu0 %v13593_v14  ;;  %11666 = vmatprep.subr.bf16.mxu1 %v13596_v5  ;;  %v13647_v14 = vld [vmem:[#allocation6 + $0xf60] ss:$20 sps:$4 sm:$0xff]   ;;  %v13650_v5 = vld [vmem:[#allocation6 + $0xf88] ss:$20 sps:$4 sm:$0xff]  }
 0x4ec   :  { %11644 = vmatprep.subr.bf16.mxu0 %v13595_v19  ;;  %v13651_v19 = vld [vmem:[#allocation6 + $0xe70] ss:$20 sps:$4 sm:$0xff]  }
 0x4ee   :  { %11667 = vmatpush3.bf16.msra.mxu1 %v13598_v21  ;;  %v13653_v21 = vld [vmem:[#allocation6 + $0xfb0] ss:$20 sps:$4 sm:$0xff]  }
 0x4ef   :  { %11645 = vmatpush3.bf16.msra.mxu0 %v13597_v23  ;;  %11668 = vmatprep.subr.bf16.mxu1 %v13600_v22  ;;  %v13652_v23 = vld [vmem:[#allocation6 + $0xd30] ss:$20 sps:$4 sm:$0xff]   ;;  %v13654_v22 = vld [vmem:[#allocation6 + $0xe98] ss:$20 sps:$4 sm:$0xff]  }
 0x4f0   :  { %11646 = vmatprep.subr.bf16.mxu0 %v13599_v34  ;;  %v13656_v34 = vld [vmem:[#allocation6 + $0xfd8] ss:$20 sps:$4 sm:$0xff]  }
 0x4f2   :  { %11669 = vmatpush3.bf16.msra.mxu1 %v13602_v46  ;;  %v13655_v46 = vld [vmem:[#allocation6 + $0xd58] ss:$20 sps:$4 sm:$0xff]  }
 0x4f3   :  { %11647 = vmatpush3.bf16.msra.mxu0 %v13601_v53  ;;  %11670 = vmatprep.subr.bf16.mxu1 %v13604_v24  ;;  %v13657_v53 = vld [vmem:[#allocation6 + $0xec0] ss:$20 sps:$4 sm:$0xff]  }
 0x4f4   :  { %11648 = vmatprep.subr.bf16.mxu0 %v13603_v25  ;;  %v13659_v24 = vld [vmem:[#allocation6 + $0x1000] ss:$20 sps:$4 sm:$0xff]  }
 0x4f5   :  { %v13658_v25 = vld [vmem:[#allocation6 + $0xd80] ss:$20 sps:$4 sm:$0xff]  }
 0x4f6   :  { %11671 = vmatpush3.bf16.msra.mxu1 %v13606_v17  ;;  %v13660_v17 = vld [vmem:[#allocation6 + $0xee8] ss:$20 sps:$4 sm:$0xff]  }
 0x4f7   :  { %11649 = vmatpush3.bf16.msra.mxu0 %v13605_v27  ;;  %11700 = vmatprep.subr.bf16.mxu1 %v13608_v47  ;;  %v13662_v27 = vld [vmem:[#allocation6 + $0x1028] ss:$20 sps:$4 sm:$0xff]  }
 0x4f8   :  { %11678 = vmatprep.subr.bf16.mxu0 %v13607_v11  ;;  %v13661_v47 = vld [vmem:[#allocation6 + $0xda8] ss:$20 sps:$4 sm:$0xff]  }
 0x4f9   :  { %9012 = vmatmul.mubr.bf16.vlgmr.msra.gmra.mrb[24].mxu1 %v14387_v33  ;;  %v13617_v33 = vld [vmem:[#allocation6 + $0x7e0] ss:$20 sps:$4 sm:$0xff]   ;;  %v13679_v11 = vld [vmem:[#allocation9 + $0xc0] sm:$0xff]  }
 0x4fa   :  { %8972 = vmatmul.mubr.bf16.vlgmr.msra.gmra.mrb[24].mxu0 %v14356_v56  ;;  %11701 = vmatpush3.bf16.msra.mxu1 %v13610_v28  ;;  %v13619_v56 = vld [vmem:[#allocation6 + $0x948] ss:$20 sps:$4 sm:$0xff]  }
 0x4fb   :  { %11679 = vmatpush3.bf16.msra.mxu0 %v13609_v29  ;;  %9051 = vmatprep.mubr.bf16.mxu0 %v14389_v2  ;;  %v13621_v2 = vld [vmem:[#allocation6 + $0x808] ss:$20 sps:$4 sm:$0xff]  }
 0x4fc   :  { %9091 = vmatprep.mubr.bf16.mxu1 %v14410_v31  ;;  %11680 = vmatprep.subr.bf16.mxu0 %v13611_v16  ;;  %v13626_v31 = vld [vmem:[#allocation6 + $0xab0] ss:$20 sps:$4 sm:$0xff]  }
 0x4fd   :  { %11702 = vmatprep.subr.bf16.mxu1 %v13612_v26  ;;  %v13663_v28 = vld [vmem:[#allocation9 + $0x40] sm:$0xff]   ;;  %v13681_v26 = vld [vmem:[#allocation9 + $0xc8] sm:$0xff]  }
 0x4fe   :  { %11703 = vmatpush3.bf16.msra.mxu1 %v13614_v35  ;;  %v13680_v29 = vld [vmem:[#allocation9 + $0x80] sm:$0xff]   ;;  %v13665_v35 = vld [vmem:[#allocation9 + $0x48] sm:$0xff]  }
 0x4ff   :  { %11681 = vmatpush3.bf16.msra.mxu0 %v13613_v36  ;;  %11704 = vmatprep.subr.bf16.mxu1 %v13616_v37  ;;  %v13664_v16 = vld [vmem:[#allocation9] sm:$0xff]   ;;  %v13682_v36 = vld [vmem:[#allocation9 + $0x88] sm:$0xff]  }
 0x500   :  { %11682 = vmatprep.subr.bf16.mxu0 %v13615_v32  ;;  %v13666_v37 = vld [vmem:[#allocation9 + $0x8] sm:$0xff]   ;;  %v13683_v32 = vld [vmem:[#allocation9 + $0xd0] sm:$0xff]  }
 0x502   :  { %11705 = vmatpush3.bf16.msra.mxu1 %v13618_v39  ;;  %v13667_v39 = vld [vmem:[#allocation9 + $0x50] sm:$0xff]  }
 0x503   :  { %11683 = vmatpush3.bf16.msra.mxu0 %v13617_v33  ;;  %11706 = vmatprep.subr.bf16.mxu1 %v13620_v41  ;;  %v13684_v33 = vld [vmem:[#allocation9 + $0x90] sm:$0xff]  }
 0x504   :  { %11684 = vmatprep.subr.bf16.mxu0 %v13619_v56  ;;  %v13668_v41 = vld [vmem:[#allocation9 + $0x10] sm:$0xff]   ;;  %v13685_v56 = vld [vmem:[#allocation9 + $0xd8] sm:$0xff]  }
 0x506   :  { %11707 = vmatpush3.bf16.msra.mxu1 %v13622_v42  ;;  %v13669_v42 = vld [vmem:[#allocation9 + $0x58] sm:$0xff]  }
 0x507   :  { %11685 = vmatpush3.bf16.msra.mxu0 %v13621_v2  ;;  %11708 = vmatprep.subr.bf16.mxu1 %v13624_v44  ;;  %v13687_v2 = vld [vmem:[#allocation9 + $0xe0] sm:$0xff]  }
 0x508   :  { %11686 = vmatprep.subr.bf16.mxu0 %v13623_v45  ;;  %v13671_v44 = vld [vmem:[#allocation9 + $0x60] sm:$0xff]  }
 0x509   :  { %v13688_v45 = vld [vmem:[#allocation9 + $0xa0] sm:$0xff]  }
 0x50a   :  { %11709 = vmatpush3.bf16.msra.mxu1 %v13626_v31  ;;  %v13672_v31 = vld [vmem:[#allocation9 + $0x20] sm:$0xff]  }
 0x50b   :  { %11687 = vmatpush3.bf16.msra.mxu0 %v13625_v49  ;;  %11710 = vmatprep.subr.bf16.mxu1 %v13628_v50  ;;  %v13689_v49 = vld [vmem:[#allocation9 + $0xe8] sm:$0xff]  }
 0x50c   :  { %11688 = vmatprep.subr.bf16.mxu0 %v13627_v51  ;;  %v13673_v50 = vld [vmem:[#allocation9 + $0x68] sm:$0xff]  }
 0x50d   :  { %v13690_v51 = vld [vmem:[#allocation9 + $0xa8] sm:$0xff]  }
 0x50e   :  { %11711 = vmatpush3.bf16.msra.mxu1 %v13630_v55  ;;  %v13674_v55 = vld [vmem:[#allocation9 + $0x28] sm:$0xff]  }
 0x50f   :  { %11689 = vmatpush3.bf16.msra.mxu0 %v13629_v57  ;;  %11712 = vmatprep.subr.bf16.mxu1 %v13632_v58  ;;  %v13691_v57 = vld [vmem:[#allocation9 + $0xf0] sm:$0xff]  }
 0x510   :  { %11690 = vmatprep.subr.bf16.mxu0 %v13631_v59  ;;  %v13675_v58 = vld [vmem:[#allocation9 + $0x70] sm:$0xff]  }
 0x511   :  { %v13692_v59 = vld [vmem:[#allocation9 + $0xb0] sm:$0xff]  }
 0x512   :  { %11713 = vmatpush3.bf16.msra.mxu1 %v13634_v54  ;;  %v13676_v54 = vld [vmem:[#allocation9 + $0x30] sm:$0xff]  }
 0x513   :  { %11691 = vmatpush3.bf16.msra.mxu0 %v13633_v20  ;;  %11714 = vmatprep.subr.bf16.mxu1 %v13636_v60  ;;  %v13693_v20 = vld [vmem:[#allocation9 + $0xf8] sm:$0xff]  }
 0x514   :  { %11692 = vmatprep.subr.bf16.mxu0 %v13635_v62  ;;  %v13677_v60 = vld [vmem:[#allocation9 + $0x78] sm:$0xff]  }
 0x515   :  { %v13694_v62 = vld [vmem:[#allocation9 + $0xb8] sm:$0xff]  }
 0x516   :  { %11715 = vmatpush3.bf16.msra.mxu1 %v13638_v6  ;;  %v13678_v6 = vld [vmem:[#allocation9 + $0x38] sm:$0xff]  }
 0x517   :  { %11693 = vmatpush3.bf16.msra.mxu0 %v13637_v7  ;;  %11850 = vmatprep.subr.bf16.mxu1 %v14035_v10  ;;  %v14464_v7 = vld [vmem:[#allocation7] sm:$0x1f] }
 0x518   :  { %11722 = vmatprep.subr.bf16.mxu0 %v13639_v1  ;;  %v5599_v1 = vrot.slane %v14464_v7, %v14326_v63 }
 0x519   :  { %9092 = vmatmul.mubr.bf16.vlgmr.msra.gmra.mrb[28].mxu1 %v14420_v13  ;;  %v13648_v13 = vld [vmem:[#allocation6 + $0xe48] ss:$20 sps:$4 sm:$0xff]  }
 0x51a   :  { %9052 = vmatmul.mubr.bf16.vlgmr.msra.gmra.mrb[28].mxu0 %v14408_v30  ;;  %11851 = vmatpush3.bf16.msra.mxu1 %v13641_v8  ;;  %v13646_v30 = vld [vmem:[#allocation6 + $0xce0] ss:$20 sps:$4 sm:$0xff]   ;;  %v5603_v8 = vrot.slane %v14464_v7, %v14304_v43 }
 0x51b   :  { %11723 = vmatpush3.bf16.msra.mxu0 %v13640_v12  ;;  %9131 = vmatprep.mubr.bf16.mxu0 %v14422_v9  ;;  %v13649_v9 = vld [vmem:[#allocation6 + $0xd08] ss:$20 sps:$4 sm:$0xff]  }
 0x51c   :  { %11724 = vmatprep.subr.bf16.mxu0 %v13642_v4  ;;  %11852 = vmatprep.subr.bf16.mxu1 %v14035_v10 }
 0x51d   :  { %11866 = vmatprep.mubr.msk.bf16.mxu1 %vm14036_vm0, %v14035_v10 }
 0x51e   :  { %11853 = vmatpush3.bf16.msra.mxu1 %v13644_v3 }
 0x51f   :  { %11725 = vmatpush3.bf16.msra.mxu0 %v13643_v48  ;;  %11854 = vmatprep.subr.bf16.mxu1 %v14035_v10 }
 0x520   :  { %11726 = vmatprep.subr.bf16.mxu0 %v13645_v52 }
 0x522   :  { %11855 = vmatpush3.bf16.msra.mxu1 %v13647_v14 }
 0x523   :  { %11727 = vmatpush3.bf16.msra.mxu0 %v13646_v30  ;;  %11856 = vmatprep.subr.bf16.mxu1 %v14035_v10 }
 0x524   :  { %11728 = vmatprep.subr.bf16.mxu0 %v13648_v13 }
 0x526   :  { %11857 = vmatpush3.bf16.msra.mxu1 %v13650_v5 }
 0x527   :  { %11729 = vmatpush3.bf16.msra.mxu0 %v13649_v9  ;;  %11858 = vmatprep.subr.bf16.mxu1 %v14035_v10  ;;  %v13695_v9 = vld [vmem:[#allocation9 + $0x100] sm:$0xff]  }
 0x528   :  { %11730 = vmatprep.subr.bf16.mxu0 %v13651_v19 }
 0x52a   :  { %11859 = vmatpush3.bf16.msra.mxu1 %v13653_v21  ;;  %v13696_v21 = vld [vmem:[#allocation9 + $0x108] sm:$0xff]  }
 0x52b   :  { %11731 = vmatpush3.bf16.msra.mxu0 %v13652_v23  ;;  %11860 = vmatprep.subr.bf16.mxu1 %v14035_v10  ;;  %v13697_v23 = vld [vmem:[#allocation9 + $0x110] sm:$0xff]  }
 0x52c   :  { %11732 = vmatprep.subr.bf16.mxu0 %v13654_v22  ;;  %v13698_v22 = vld [vmem:[#allocation9 + $0x118] sm:$0xff]  }
 0x52e   :  { %11861 = vmatpush3.bf16.msra.mxu1 %v13656_v34  ;;  %v13699_v34 = vld [vmem:[#allocation9 + $0x120] sm:$0xff]  }
 0x52f   :  { %11733 = vmatpush3.bf16.msra.mxu0 %v13655_v46  ;;  %11862 = vmatprep.subr.bf16.mxu1 %v14035_v10  ;;  %v13700_v46 = vld [vmem:[#allocation9 + $0x128] sm:$0xff]  }
 0x530   :  { %11734 = vmatprep.subr.bf16.mxu0 %v13657_v53  ;;  %v5607_v53 = vrot.slane %v14464_v7, %v14344_v61 }
 0x532   :  { %11863 = vmatpush3.bf16.msra.mxu1 %v13659_v24  ;;  %v13701_v24 = vld [vmem:[#allocation9 + $0x130] sm:$0xff]  }
 0x533   :  { %11735 = vmatpush3.bf16.msra.mxu0 %v13658_v25  ;;  %11864 = vmatprep.subr.bf16.mxu1 %v14035_v10  ;;  %v5611_v25 = vrot.slane %v14464_v7, %v14329_v0 }
 0x534   :  { %11736 = vmatprep.subr.bf16.mxu0 %v13660_v17 }
 0x536   :  { %11865 = vmatpush3.bf16.msra.mxu1 %v13662_v27 }
 0x537   :  { %11737 = vmatpush3.bf16.msra.mxu0 %v13661_v47  ;;  %11775 = vmatprep.subr.bf16.mxu1 %v13679_v11 }
 0x538   :  { %11753 = vmatprep.subr.bf16.mxu0 %v13663_v28 }
 0x539   :  { %11867 = vmatmul.mubr.bf16.vlgmr.msra.gmra.mrb[32].mxu1 %v14434_v15  ;;  %v13686_v15 = vld [vmem:[#allocation9 + $0x98] sm:$0xff]  }
 0x53a   :  { %9132 = vmatmul.mubr.bf16.vlgmr.msra.gmra.mrb[32].mxu0 %v14429_v40  ;;  %11776 = vmatpush3.bf16.msra.mxu1 %v13680_v29  ;;  %v13670_v40 = vld [vmem:[#allocation9 + $0x18] sm:$0xff]  }
 0x53b   :  { %11754 = vmatpush3.bf16.msra.mxu0 %v13664_v16  ;;  %11777 = vmatprep.subr.bf16.mxu1 %v13681_v26  ;;  %v13702_v26 = vld [vmem:[#allocation9 + $0x138] sm:$0xff]  }
 0x53c   :  { %11755 = vmatprep.subr.bf16.mxu0 %v13665_v35 }
 0x53e   :  { %11778 = vmatpush3.bf16.msra.mxu1 %v13682_v36 }
 0x53f   :  { %11756 = vmatpush3.bf16.msra.mxu0 %v13666_v37  ;;  %11779 = vmatprep.subr.bf16.mxu1 %v13683_v32 }
 0x540   :  { %11757 = vmatprep.subr.bf16.mxu0 %v13667_v39 }
 0x542   :  { %11780 = vmatpush3.bf16.msra.mxu1 %v13684_v33 }
 0x543   :  { %11758 = vmatpush3.bf16.msra.mxu0 %v13668_v41  ;;  %11781 = vmatprep.subr.bf16.mxu1 %v13685_v56 }
 0x544   :  { %11759 = vmatprep.subr.bf16.mxu0 %v13669_v42  ;;  %v5615_v42 = vrot.slane %v14464_v7, %v14365_v38 }
 0x546   :  { %11782 = vmatpush3.bf16.msra.mxu1 %v13686_v15 }
 0x547   :  { %11760 = vmatpush3.bf16.msra.mxu0 %v13670_v40  ;;  %11783 = vmatprep.subr.bf16.mxu1 %v13687_v2 }
 0x548   :  { %11761 = vmatprep.subr.bf16.mxu0 %v13671_v44 }
 0x54a   :  { %11784 = vmatpush3.bf16.msra.mxu1 %v13688_v45 }
 0x54b   :  { %11762 = vmatpush3.bf16.msra.mxu0 %v13672_v31  ;;  %11785 = vmatprep.subr.bf16.mxu1 %v13689_v49 }
 0x54c   :  { %11763 = vmatprep.subr.bf16.mxu0 %v13673_v50 }
 0x54e   :  { %11786 = vmatpush3.bf16.msra.mxu1 %v13690_v51 }
 0x54f   :  { %11764 = vmatpush3.bf16.msra.mxu0 %v13674_v55  ;;  %11787 = vmatprep.subr.bf16.mxu1 %v13691_v57 }
 0x550   :  { %11765 = vmatprep.subr.bf16.mxu0 %v13675_v58 }
 0x552   :  { %11788 = vmatpush3.bf16.msra.mxu1 %v13692_v59 }
 0x553   :  { %11766 = vmatpush3.bf16.msra.mxu0 %v13676_v54  ;;  %11789 = vmatprep.subr.bf16.mxu1 %v13693_v20 }
 0x554   :  { %11767 = vmatprep.subr.bf16.mxu0 %v13677_v60 }
 0x556   :  { %11790 = vmatpush3.bf16.msra.mxu1 %v13694_v62 }
 0x557   :  { %11768 = vmatpush3.bf16.msra.mxu0 %v13678_v6 }
 0x558   :  { %11870 = vmatprep.subr.bf16.mxu0 %v14035_v10 }
 0x58c   :  { %v8605_v12 = vpop.f32.mrb[16].mxu1 }
 0x58d   :  { %v11902_v4 = vadd.f32 %v8605_v12, %v5599_v1  ;;  %v8607_v3 = vpop.f32.mrb[17].mxu1 }
 0x58e   :  { %v11903_v48 = vadd.f32 %v8607_v3, %v5603_v8  ;;  %v8609_v52 = vpop.f32.mrb[18].mxu1 }
 0x58f   :  { %v9179_v14 = vmax.f32 %v11902_v4, 0.0  ;;  %v8610_v30 = vpop.f32.mrb[19].mxu1  ;;  %v13705_v52 = vld [vmem:[#allocation12 + $0x4] ss:$16 sps:$4 sm:$0xff]  }
 0x590   :  { %v9180_v13 = vmax.f32 %v11903_v48, 0.0  ;;  %v13703_v48 = vld [vmem:[#allocation12] ss:$16 sps:$4 sm:$0xff]   ;;  %9852 = vmatprep.subr.bf16.mxu1 %v13705_v52 }
 0x591   :  { %v9184_v19 = vpack.c.bf16 %v9179_v14, %v9179_v14 }
 0x592   :  { %v9185_v5 = vpack.c.bf16 %v9180_v13, %v9180_v13  ;;  %v13708_v13 = vld [vmem:[#allocation12 + $0xc] ss:$16 sps:$4 sm:$0xff]  }
 0x594   :  { %9548 = vmatprep.mubr.bf16.mxu0 %v9185_v5 }
 0x595   :  { %9549 = vmatmul.mubr.bf16.vlgmr.msra.gmra.mrb[36].mxu0 %v9184_v19  ;;  %v13711_v19 = vld [vmem:[#allocation12 + $0x24] ss:$16 sps:$4 sm:$0xff]  }
 0x596   :  { %11871 = vmatpush3.bf16.msra.mxu0 %v13695_v9  ;;  %11886 = vmatprep.mubr.msk.bf16.mxu0 %vm14036_vm0, %v14035_v10 }
 0x597   :  { %11872 = vmatprep.subr.bf16.mxu0 %v14035_v10 }
 0x59a   :  { %11873 = vmatpush3.bf16.msra.mxu0 %v13696_v21 }
 0x59b   :  { %11874 = vmatprep.subr.bf16.mxu0 %v14035_v10 }
 0x59e   :  { %11875 = vmatpush3.bf16.msra.mxu0 %v13697_v23 }
 0x59f   :  { %11876 = vmatprep.subr.bf16.mxu0 %v14035_v10 }
 0x5a2   :  { %11877 = vmatpush3.bf16.msra.mxu0 %v13698_v22 }
 0x5a3   :  { %11878 = vmatprep.subr.bf16.mxu0 %v14035_v10 }
 0x5a6   :  { %11879 = vmatpush3.bf16.msra.mxu0 %v13699_v34  ;;  %v13709_v34 = vld [vmem:[#allocation12 + $0x20] ss:$16 sps:$4 sm:$0xff]  }
 0x5a7   :  { %11880 = vmatprep.subr.bf16.mxu0 %v14035_v10 }
 0x5aa   :  { %11881 = vmatpush3.bf16.msra.mxu0 %v13700_v46 }
 0x5ab   :  { %11882 = vmatprep.subr.bf16.mxu0 %v14035_v10 }
 0x5ac   :  { %v11628_v17 = vpop.f32.mrb[20].mxu1 }
 0x5ad   :  { %v8892_v27 = vpop.f32.mrb[20].mxu0  ;;  %v11629_v47 = vpop.f32.mrb[21].mxu1 }
 0x5ae   :  { %v11904_v11 = vadd.f32 %v8892_v27, %v5607_v53  ;;  %v8894_v28 = vpop.f32.mrb[21].mxu0  ;;  %v11630_v29 = vadd.f32 %v11629_v47, %v11628_v17  ;;  %v11631_v16 = vpop.f32.mrb[22].mxu1  ;;  %11883 = vmatpush3.bf16.msra.mxu0 %v13701_v24  ;;  %v13717_v53 = vld [vmem:[#allocation12 + $0x44] ss:$16 sps:$4 sm:$0xff]   ;;  %v13715_v17 = vld [vmem:[#allocation12 + $0x40] ss:$16 sps:$4 sm:$0xff]  }
 0x5af   :  { %v11905_v35 = vadd.f32 %v8894_v28, %v5611_v25  ;;  %v8896_v36 = vpop.f32.mrb[22].mxu0  ;;  %v11632_v37 = vpop.f32.mrb[23].mxu1  ;;  %11884 = vmatprep.subr.bf16.mxu0 %v14035_v10  ;;  %v13723_v27 = vld [vmem:[#allocation12 + $0x64] ss:$16 sps:$4 sm:$0xff]   ;;  %v13721_v16 = vld [vmem:[#allocation12 + $0x60] ss:$16 sps:$4 sm:$0xff]  }
 0x5b0   :  { %v9181_v32 = vmax.f32 %v11904_v11, 0.0  ;;  %v8897_v39 = vpop.f32.mrb[23].mxu0  ;;  %v8934_v10 = vadd.f32 %v11630_v29, %v5615_v42  ;;  %v13706_v11 = vld [vmem:[#allocation12 + $0x8] ss:$16 sps:$4 sm:$0xff]   ;;  %v13714_v29 = vld [vmem:[#allocation12 + $0x2c] ss:$16 sps:$4 sm:$0xff]  }
 0x5b1   :  { %v9182_v33 = vmax.f32 %v11905_v35, 0.0  ;;  %v13712_v35 = vld [vmem:[#allocation12 + $0x28] ss:$16 sps:$4 sm:$0xff]   ;;  %v13720_v36 = vld [vmem:[#allocation12 + $0x4c] ss:$16 sps:$4 sm:$0xff]  }
 0x5b2   :  { %11885 = vmatpush3.bf16.msra.mxu0 %v13702_v26  ;;  %v9186_v56 = vpack.c.bf16 %v9181_v32, %v9181_v32  ;;  %v13729_v26 = vld [vmem:[#allocation12 + $0x84] ss:$16 sps:$4 sm:$0xff]   ;;  %v13727_v37 = vld [vmem:[#allocation12 + $0x80] ss:$16 sps:$4 sm:$0xff]   ;;  %v13718_v39 = vld [vmem:[#allocation12 + $0x48] ss:$16 sps:$4 sm:$0xff]  }
 0x5b3   :  { %v9187_v41 = vpack.c.bf16 %v9182_v33, %v9182_v33  ;;  %9893 = vmatprep.subr.bf16.mxu0 %v13708_v13  ;;  %v13735_v32 = vld [vmem:[#allocation12 + $0xa4] ss:$16 sps:$4 sm:$0xff]   ;;  %v13726_v33 = vld [vmem:[#allocation12 + $0x6c] ss:$16 sps:$4 sm:$0xff]   ;;  %v13724_v42 = vld [vmem:[#allocation12 + $0x68] ss:$16 sps:$4 sm:$0xff]  }
 0x5b5   :  { %9588 = vmatprep.mubr.bf16.mxu1 %v9187_v41  ;;  %v13733_v41 = vld [vmem:[#allocation12 + $0xa0] ss:$16 sps:$4 sm:$0xff]  }
 0x5b6   :  { %9589 = vmatmul.mubr.bf16.vlgmr.msra.gmra.mrb[36].mxu1 %v9186_v56  ;;  %v13741_v56 = vld [vmem:[#allocation12 + $0xc4] ss:$16 sps:$4 sm:$0xff]  }
 0x5b7   :  { %9884 = vmatprep.mubr.bf16.mxu1 %v14034_v18  ;;  %9853 = vmatpush1.bf16.msra.mxu1 %v13703_v48 }
 0x5b8   :  { %9854 = vmatprep.subr.bf16.mxu1 %v13711_v19 }
 0x5bb   :  { %9855 = vmatpush1.bf16.msra.mxu1 %v13709_v34  ;;  %v13758_v34 = vld [vmem:[#allocation15 + $0x88] sm:$0xff]  }
 0x5bc   :  { %9856 = vmatprep.subr.bf16.mxu1 %v13717_v53  ;;  %v13760_v53 = vld [vmem:[#allocation15 + $0xd0] sm:$0xff]  }
 0x5bf   :  { %9857 = vmatpush1.bf16.msra.mxu1 %v13715_v17  ;;  %v13763_v17 = vld [vmem:[#allocation15 + $0x58] sm:$0xff]  }
 0x5c0   :  { %9858 = vmatprep.subr.bf16.mxu1 %v13723_v27  ;;  %v13764_v27 = vld [vmem:[#allocation15 + $0xd8] sm:$0xff]  }
 0x5c3   :  { %9859 = vmatpush1.bf16.msra.mxu1 %v13721_v16  ;;  %v13769_v16 = vld [vmem:[#allocation15 + $0x20] sm:$0xff]  }
 0x5c4   :  { %9860 = vmatprep.subr.bf16.mxu1 %v13729_v26  ;;  %v13770_v26 = vld [vmem:[#allocation15 + $0xa0] sm:$0xff]  }
 0x5c7   :  { %9861 = vmatpush1.bf16.msra.mxu1 %v13727_v37  ;;  %v13773_v37 = vld [vmem:[#allocation15 + $0x28] sm:$0xff]  }
 0x5c8   :  { %9862 = vmatprep.subr.bf16.mxu1 %v13735_v32  ;;  %v13774_v32 = vld [vmem:[#allocation15 + $0xa8] sm:$0xff]  }
 0x5cb   :  { %9863 = vmatpush1.bf16.msra.mxu1 %v13733_v41  ;;  %v13777_v41 = vld [vmem:[#allocation15 + $0x30] sm:$0xff]  }
 0x5cc   :  { %v11672_v15 = vpop.f32.mrb[24].mxu1  ;;  %9864 = vmatprep.subr.bf16.mxu1 %v13741_v56  ;;  %v13778_v56 = vld [vmem:[#allocation15 + $0xb0] sm:$0xff]  }
 0x5cd   :  { %v11650_v40 = vpop.f32.mrb[24].mxu0  ;;  %v11673_v2 = vpop.f32.mrb[25].mxu1 }
 0x5ce   :  { %v11651_v44 = vpop.f32.mrb[25].mxu0  ;;  %v11674_v45 = vadd.f32 %v11673_v2, %v11672_v15  ;;  %v11675_v31 = vpop.f32.mrb[26].mxu1  ;;  %v13732_v15 = vld [vmem:[#allocation12 + $0x8c] ss:$16 sps:$4 sm:$0xff]  }
 0x5cf   :  { %v11652_v49 = vadd.f32 %v11651_v44, %v11650_v40  ;;  %v11653_v50 = vpop.f32.mrb[26].mxu0  ;;  %v11676_v51 = vpop.f32.mrb[27].mxu1  ;;  %v13730_v40 = vld [vmem:[#allocation12 + $0x88] ss:$16 sps:$4 sm:$0xff]   ;;  %v13738_v2 = vld [vmem:[#allocation12 + $0xac] ss:$16 sps:$4 sm:$0xff]  }
 0x5d0   :  { %v11654_v55 = vpop.f32.mrb[27].mxu0  ;;  %v13736_v44 = vld [vmem:[#allocation12 + $0xa8] ss:$16 sps:$4 sm:$0xff]  }
 0x5d1   :  { %v8974_v57 = vadd.f32 %v11652_v49, %v8934_v10  ;;  %v13742_v31 = vld [vmem:[#allocation12 + $0xc8] ss:$16 sps:$4 sm:$0xff]  }
 0x5d3   :  { %v9014_v58 = vadd.f32 %v11674_v45, %v8974_v57  ;;  %v13744_v45 = vld [vmem:[#allocation12 + $0xcc] ss:$16 sps:$4 sm:$0xff]   ;;  %v13747_v57 = vld [vmem:[#allocation12 + $0xe4] ss:$16 sps:$4 sm:$0xff]  }
 0x5ec   :  { %v11716_v59 = vpop.f32.mrb[28].mxu1 }
 0x5ed   :  { %v11694_v54 = vpop.f32.mrb[28].mxu0  ;;  %v11717_v20 = vpop.f32.mrb[29].mxu1 }
 0x5ee   :  { %v11695_v60 = vpop.f32.mrb[29].mxu0  ;;  %v11718_v62 = vadd.f32 %v11717_v20, %v11716_v59  ;;  %v11719_v6 = vpop.f32.mrb[30].mxu1  ;;  %v13745_v59 = vld [vmem:[#allocation12 + $0xe0] ss:$16 sps:$4 sm:$0xff]   ;;  %v13751_v20 = vld [vmem:[#allocation15 + $0x40] sm:$0xff]  }
 0x5ef   :  { %v11696_v38 = vadd.f32 %v11695_v60, %v11694_v54  ;;  %v11697_v7 = vpop.f32.mrb[30].mxu0  ;;  %v11720_v1 = vpop.f32.mrb[31].mxu1  ;;  %v13748_v54 = vld [vmem:[#allocation12 + $0xe8] ss:$16 sps:$4 sm:$0xff]  }
 0x5f0   :  { %v11698_v8 = vpop.f32.mrb[31].mxu0  ;;  %v13752_v60 = vld [vmem:[#allocation15 + $0xc0] sm:$0xff]  }
 0x5f1   :  { %v9054_v12 = vadd.f32 %v11696_v38, %v9014_v58  ;;  %v13750_v58 = vld [vmem:[#allocation12 + $0xec] ss:$16 sps:$4 sm:$0xff]  }
 0x5f3   :  { %v9094_v4 = vadd.f32 %v11718_v62, %v9054_v12  ;;  %v11440_v62 = vld [vmem:[#allocation10] ss:$0 sm:$0xff] }
 0x60c   :  { %v9173_v3 = vpop.f32.mrb[32].mxu1 }
 0x60d   :  { %v11738_v14 = vpop.f32.mrb[32].mxu0  ;;  %v11868_v30 = vpop.f32.mrb[33].mxu1 }
 0x60e   :  { %v11739_v5 = vpop.f32.mrb[33].mxu0  ;;  %v9176_v9 = vpop.f32.mrb[34].mxu1 }
 0x60f   :  { %v11740_v21 = vadd.f32 %v11739_v5, %v11738_v14  ;;  %v11741_v23 = vpop.f32.mrb[34].mxu0  ;;  %v11869_v22 = vpop.f32.mrb[35].mxu1  ;;  %v13753_v5 = vld [vmem:[#allocation15] sm:$0xff]  }
 0x610   :  { %v11742_v46 = vpop.f32.mrb[35].mxu0  ;;  %v13754_v9 = vld [vmem:[#allocation15 + $0x80] sm:$0xff]   ;;  %v13756_v23 = vld [vmem:[#allocation15 + $0xc8] sm:$0xff]  }
 0x611   :  { %v9134_v24 = vadd.f32 %v11740_v21, %v9094_v4  ;;  %v13755_v21 = vld [vmem:[#allocation15 + $0x48] sm:$0xff]   ;;  %v13759_v46 = vld [vmem:[#allocation15 + $0x50] sm:$0xff]  }
 0x612   :  { %v13757_v22 = vld [vmem:[#allocation15 + $0x8] sm:$0xff]  }
 0x613   :  { %v9174_v25 = vadd.f32 %v9173_v3, %v9134_v24  ;;  %v13761_v24 = vld [vmem:[#allocation15 + $0x10] sm:$0xff]  }
 0x615   :  { %v9183_v47 = vmax.f32 %v9174_v25, 0.0  ;;  %v13762_v25 = vld [vmem:[#allocation15 + $0x90] sm:$0xff]  }
 0x617   :  { %v9188_v28 = vpack.c.bf16 %v9183_v47, %v9183_v47  ;;  %v13765_v47 = vld [vmem:[#allocation15 + $0x18] sm:$0xff]  }
 0x619   :  { %11887 = vmatmul.mubr.bf16.vlgmr.msra.gmra.mrb[40].mxu0 %v9188_v28  ;;  %v13767_v28 = vld [vmem:[#allocation15 + $0x60] sm:$0xff]  }
 0x61a   :  { %9894 = vmatpush1.bf16.msra.mxu0 %v13706_v11  ;;  %9925 = vmatprep.mubr.bf16.mxu0 %v14034_v18  ;;  %v13739_v18 = vld [vmem:[#allocation12 + $0xc0] ss:$16 sps:$4 sm:$0xff]  }
 0x61b   :  { %9895 = vmatprep.subr.bf16.mxu0 %v13714_v29  ;;  %9865 = vmatpush1.bf16.msra.mxu1 %v13739_v18  ;;  %v13766_v11 = vld [vmem:[#allocation15 + $0x98] sm:$0xff]   ;;  %v13768_v29 = vld [vmem:[#allocation15 + $0xe0] sm:$0xff]  }
 0x61c   :  { %9866 = vmatprep.subr.bf16.mxu1 %v13747_v57  ;;  %v13781_v18 = vld [vmem:[#allocation15 + $0x38] sm:$0xff]  }
 0x61e   :  { %9896 = vmatpush1.bf16.msra.mxu0 %v13712_v35  ;;  %v13771_v35 = vld [vmem:[#allocation15 + $0x68] sm:$0xff]  }
 0x61f   :  { %9897 = vmatprep.subr.bf16.mxu0 %v13720_v36  ;;  %9867 = vmatpush1.bf16.msra.mxu1 %v13745_v59  ;;  %v13772_v36 = vld [vmem:[#allocation15 + $0xe8] sm:$0xff]  }
 0x620   :  { %11806 = vmatprep.subr.bf16.mxu1 %v13751_v20 }
 0x622   :  { %9898 = vmatpush1.bf16.msra.mxu0 %v13718_v39  ;;  %v13775_v39 = vld [vmem:[#allocation15 + $0x70] sm:$0xff]  }
 0x623   :  { %9899 = vmatprep.subr.bf16.mxu0 %v13726_v33  ;;  %v13776_v33 = vld [vmem:[#allocation15 + $0xf0] sm:$0xff]  }
 0x626   :  { %9900 = vmatpush1.bf16.msra.mxu0 %v13724_v42  ;;  %v13779_v42 = vld [vmem:[#allocation15 + $0x78] sm:$0xff]  }
 0x627   :  { %9901 = vmatprep.subr.bf16.mxu0 %v13732_v15  ;;  %v13780_v15 = vld [vmem:[#allocation15 + $0xf8] sm:$0xff]  }
 0x62a   :  { %9902 = vmatpush1.bf16.msra.mxu0 %v13730_v40  ;;  %v13782_v40 = vld [vmem:[#allocation15 + $0xb8] sm:$0xff]  }
 0x62b   :  { %9903 = vmatprep.subr.bf16.mxu0 %v13738_v2  ;;  %v9670_v2 = vld [vmem:[#allocation13] sm:$0xf] }
 0x62e   :  { %9904 = vmatpush1.bf16.msra.mxu0 %v13736_v44  ;;  %v9675_v44 = vrot.slane %v9670_v2, %v14326_v63 }
 0x62f   :  { %9905 = vmatprep.subr.bf16.mxu0 %v13744_v45  ;;  %v9683_v45 = vrot.slane %v9670_v2, %v14344_v61 }
 0x632   :  { %9906 = vmatpush1.bf16.msra.mxu0 %v13742_v31  ;;  %v9679_v31 = vrot.slane %v9670_v2, %v14304_v43 }
 0x633   :  { %9907 = vmatprep.subr.bf16.mxu0 %v13750_v58 }
 0x636   :  { %9908 = vmatpush1.bf16.msra.mxu0 %v13748_v54 }
 0x637   :  { %11828 = vmatprep.subr.bf16.mxu0 %v13752_v60 }
 0x668   :  { %v11769_v10 = vpop.f32.mrb[36].mxu0 }
 0x669   :  { %v11770_v49 = vpop.f32.mrb[37].mxu0 }
 0x66a   :  { %v11771_v50 = vadd.f32 %v11770_v49, %v11769_v10  ;;  %v11772_v51 = vpop.f32.mrb[38].mxu0  ;;  %v9687_v10 = vrot.slane %v9670_v2, %v14329_v0 }
 0x66b   :  { %v11773_v55 = vpop.f32.mrb[39].mxu0 }
 0x66c   :  { %v9551_v7 = vadd.f32 %v11771_v50, %v11440_v62 }
 0x689   :  { %v11791_v6 = vpop.f32.mrb[36].mxu1 }
 0x68a   :  { %v11792_v38 = vpop.f32.mrb[37].mxu1 }
 0x68b   :  { %v11793_v1 = vadd.f32 %v11792_v38, %v11791_v6  ;;  %v11794_v8 = vpop.f32.mrb[38].mxu1 }
 0x68c   :  { %v11795_v12 = vpop.f32.mrb[39].mxu1 }
 0x68d   :  { %v9591_v4 = vadd.f32 %v11793_v1, %v9551_v7 }
 0x6ec   :  { %v9630_v3 = vpop.f32.mrb[40].mxu0 }
 0x6ed   :  { %v9631_v48 = vadd.f32 %v9630_v3, %v9591_v4  ;;  %v11888_v52 = vpop.f32.mrb[41].mxu0  ;;  %v11513_v3 = vld [vmem:[#allocation16] ss:$0 sm:$0xff] }
 0x6ee   :  { %v9633_v14 = vpop.f32.mrb[42].mxu0 }
 0x6ef   :  { %v9636_v30 = vmax.f32 %v9631_v48, 0.0  ;;  %v11889_v13 = vpop.f32.mrb[43].mxu0 }
 0x6f1   :  { %v9637_v19 = vpack.c.bf16 %v9636_v30, %v9636_v30 }
 0x6f3   :  { %9885 = vmatmul.mubr.bf16.vlgmr.msra.gmra.mrb[40].mxu1 %v9637_v19  ;;  %9926 = vmatmul.mubr.bf16.vlgmr.msra.gmra.mrb[44].mxu0 %v9637_v19 }
 0x6f4   :  { %11807 = vmatpush3.bf16.msra.mxu1 %v13753_v5  ;;  %11829 = vmatpush3.bf16.msra.mxu0 %v13754_v9 }
 0x6f5   :  { %11808 = vmatprep.subr.bf16.mxu1 %v13755_v21  ;;  %11830 = vmatprep.subr.bf16.mxu0 %v13756_v23 }
 0x6f8   :  { %11809 = vmatpush3.bf16.msra.mxu1 %v13757_v22  ;;  %11831 = vmatpush3.bf16.msra.mxu0 %v13758_v34 }
 0x6f9   :  { %11810 = vmatprep.subr.bf16.mxu1 %v13759_v46  ;;  %11832 = vmatprep.subr.bf16.mxu0 %v13760_v53 }
 0x6fc   :  { %11811 = vmatpush3.bf16.msra.mxu1 %v13761_v24  ;;  %11833 = vmatpush3.bf16.msra.mxu0 %v13762_v25 }
 0x6fd   :  { %11812 = vmatprep.subr.bf16.mxu1 %v13763_v17  ;;  %11834 = vmatprep.subr.bf16.mxu0 %v13764_v27 }
 0x700   :  { %11813 = vmatpush3.bf16.msra.mxu1 %v13765_v47  ;;  %11835 = vmatpush3.bf16.msra.mxu0 %v13766_v11 }
 0x701   :  { %11814 = vmatprep.subr.bf16.mxu1 %v13767_v28  ;;  %11836 = vmatprep.subr.bf16.mxu0 %v13768_v29 }
 0x704   :  { %11815 = vmatpush3.bf16.msra.mxu1 %v13769_v16  ;;  %11837 = vmatpush3.bf16.msra.mxu0 %v13770_v26 }
 0x705   :  { %11816 = vmatprep.subr.bf16.mxu1 %v13771_v35  ;;  %11838 = vmatprep.subr.bf16.mxu0 %v13772_v36 }
 0x708   :  { %11817 = vmatpush3.bf16.msra.mxu1 %v13773_v37  ;;  %11839 = vmatpush3.bf16.msra.mxu0 %v13774_v32 }
 0x709   :  { %11818 = vmatprep.subr.bf16.mxu1 %v13775_v39  ;;  %11840 = vmatprep.subr.bf16.mxu0 %v13776_v33 }
 0x70c   :  { %11819 = vmatpush3.bf16.msra.mxu1 %v13777_v41  ;;  %11841 = vmatpush3.bf16.msra.mxu0 %v13778_v56 }
 0x70d   :  { %11820 = vmatprep.subr.bf16.mxu1 %v13779_v42  ;;  %11842 = vmatprep.subr.bf16.mxu0 %v13780_v15 }
 0x710   :  { %11821 = vmatpush3.bf16.msra.mxu1 %v13781_v18  ;;  %11843 = vmatpush3.bf16.msra.mxu0 %v13782_v40 }
 0x7c6   :  { %v9886_v49 = vpop.f32.mrb[40].mxu1  ;;  %v9927_v50 = vpop.f32.mrb[44].mxu0 }
 0x7c7   :  { %v9887_v51 = vadd.f32 %v9886_v49, %v9675_v44  ;;  %v9928_v55 = vadd.f32 %v9927_v50, %v9683_v45  ;;  %v9888_v57 = vpop.f32.mrb[41].mxu1  ;;  %v9929_v58 = vpop.f32.mrb[45].mxu0 }
 0x7c8   :  { %v9889_v59 = vadd.f32 %v9888_v57, %v9679_v31  ;;  %v9930_v54 = vadd.f32 %v9929_v58, %v9687_v10  ;;  %v9890_v20 = vpop.f32.mrb[42].mxu1  ;;  %v9931_v60 = vpop.f32.mrb[46].mxu0 }
 0x7c9   :  { %v9934_v62 = vmax.f32 %v9887_v51, 0.0  ;;  %v9936_v6 = vmax.f32 %v9928_v55, 0.0  ;;  %v9891_v38 = vpop.f32.mrb[43].mxu1  ;;  %v9932_v63 = vpop.f32.mrb[47].mxu0 }
 0x7ca   :  { %v9935_v7 = vmax.f32 %v9889_v59, 0.0  ;;  %v9937_v61 = vmax.f32 %v9930_v54, 0.0 }
 0x7cb   :  { %v9938_v8 = vpack.c.bf16 %v9934_v62, %v9934_v62  ;;  %v9940_v0 = vpack.c.bf16 %v9936_v6, %v9936_v6 }
 0x7cc   :  { %v9939_v1 = vpack.c.bf16 %v9935_v7, %v9935_v7  ;;  %v9941_v43 = vpack.c.bf16 %v9937_v61, %v9937_v61 }
 0x7ce   :  { %10237 = vmatprep.mubr.bf16.mxu1 %v9939_v1  ;;  %10277 = vmatprep.mubr.bf16.mxu0 %v9941_v43 }
 0x7cf   :  { %10238 = vmatmul.mubr.bf16.vlgmr.msra.gmra.mrb[44].mxu1 %v9938_v8  ;;  %10278 = vmatmul.mubr.bf16.vlgmr.msra.gmra.mrb[48].mxu0 %v9940_v0 }
 0x8a2   :  { %v11822_v12 = vpop.f32.mrb[44].mxu1  ;;  %v11844_v4 = vpop.f32.mrb[48].mxu0 }
 0x8a3   :  { %v11823_v48 = vpop.f32.mrb[45].mxu1  ;;  %v11845_v52 = vpop.f32.mrb[49].mxu0 }
 0x8a4   :  { %v11824_v14 = vadd.f32 %v11823_v48, %v11822_v12  ;;  %v11846_v30 = vadd.f32 %v11845_v52, %v11844_v4  ;;  %v11825_v13 = vpop.f32.mrb[46].mxu1  ;;  %v11847_v5 = vpop.f32.mrb[50].mxu0 }
 0x8a5   :  { %v11826_v9 = vpop.f32.mrb[47].mxu1  ;;  %v11848_v19 = vpop.f32.mrb[51].mxu0 }
 0x8a6   :  { %v10240_v21 = vadd.f32 %v11824_v14, %v11513_v3 }
 0x8a8   :  { %v10280_v23 = vadd.f32 %v11846_v30, %v10240_v21 }
 0x8aa   :  { %10285 = vst [vmem:[%s14505_s11] sm:$0xff] %v10280_v23 }
 0x8ab   :  { %10290 = vsyncpa [#allocation3], 1 }
 0x8ac   :  { %10291 = vsyncpa [#allocation5], 1 }
 0x8ad   :  { %10292 = vsyncpa [#allocation8], 1 }
 0x8ae   :  { %10293 = vsyncpa [#allocation11], 1 }
 0x8af   :  { %10294 = vsyncpa [#allocation14], 1 }
 0x8b0   :  { %10295 = vsyncpa [#allocation17], 1 }

</bundles_post_ra>
